<compile_context>
chip_gen: v5e
topology: v5e:2x2
jax: 0.10.0
libtpu: 0.0.40
codegen_flags: <defaults>
</compile_context>

<pallas_src>
import functools

import jax
import jax.numpy as jnp
from jax import lax
from jax.experimental import pallas as pl
from jax.experimental.pallas import tpu as pltpu

SHIFT = float(jnp.log(2.0))            # torch.log(torch.tensor(2.0)).item()
OUT_PAD = 128                          # lane-dense padded width for 2 logits
HIGHEST = jax.lax.Precision.HIGHEST


def _softplus(x):
    # Numerically stable softplus, matches F.softplus in fp32.
    return jnp.maximum(x, 0.0) + jnp.log(1.0 + jnp.exp(-jnp.abs(x)))


# ----------------------------------------------------------------------------
# Fused SchNet kernel.
# ----------------------------------------------------------------------------
def make_schnet_kernel(n_conv, n_hidden, n_atoms, n_edges, n_crystals, dim_e1):
    def kernel(node_ref, edge_ref, idx2c_ref, idx1r_ref, idx3r_ref,
               convw_ref, convb_ref, wf1_ref, bf1_ref, wf2_ref, bf2_ref,
               wc_ref, bc_ref, fcw_ref, fcb_ref, wo_ref, bo_ref, out_ref):
        f32 = jnp.float32
        node = node_ref[...]                                  # [N, Dv]
        edge = edge_ref[...]                                  # [E, De0]

        # One-hot gather/scatter operators, built once from the raw indices
        # (VPU compares).  Orientations chosen so every matmul is
        # untransposed: gmat @ x gathers, smat @ cfconf scatter-sums.
        gmat = (lax.broadcasted_iota(jnp.int32, (n_edges, n_atoms), 1)
                == idx2c_ref[...]).astype(f32)                # [E, N]
        smat = (lax.broadcasted_iota(jnp.int32, (n_atoms, n_edges), 0)
                == idx1r_ref[...]).astype(f32)                # [N, E]
        cmat = (lax.broadcasted_iota(jnp.int32, (n_crystals, n_atoms), 0)
                == idx3r_ref[...]).astype(f32)                # [C, N]

        # Degrees / crystal sizes are layer-independent: reciprocals once.
        inv_deg = 1.0 / jnp.maximum(
            jnp.sum(smat, axis=1, keepdims=True), 1.0)        # [N, 1]
        inv_cnt = 1.0 / jnp.maximum(
            jnp.sum(cmat, axis=1, keepdims=True), 1.0)        # [C, 1]

        # FilterGenerator for ALL conv layers at once (Wf1 lane-concatenated,
        # Wf2 block-diagonal): two matmuls at 2x lane occupancy; block c of
        # the result equals layer c's filter exactly (zero blocks add 0).
        w_all = jnp.dot(edge, wf1_ref[...], precision=HIGHEST,
                        preferred_element_type=f32) + bf1_ref[...]
        w_all = _softplus(w_all) - SHIFT
        w_all = jnp.dot(w_all, wf2_ref[...], precision=HIGHEST,
                        preferred_element_type=f32) + bf2_ref[...]
        w_all = _softplus(w_all) - SHIFT                      # [E, n_conv*De1]

        for c in range(n_conv):
            w1 = convw_ref[3 * c]                             # [Dv, Dv]
            w2 = convw_ref[3 * c + 1]
            w3 = convw_ref[3 * c + 2]
            b2 = convb_ref[2 * c:2 * c + 1, :]                # [1, Dv]
            b3 = convb_ref[2 * c + 1:2 * c + 2, :]

            # AtomWise1 (no bias).
            x = jnp.dot(node, w1, precision=HIGHEST,
                        preferred_element_type=f32)           # [N, Dv]
            wf = w_all[:, c * dim_e1:(c + 1) * dim_e1]        # [E, De1]

            # cfconf = x[idx2] * W : one-hot gather on the MXU (each gmat row
            # has exactly one 1.0 -> gather is exact), then elementwise mul.
            cfconf = jnp.dot(gmat, x, precision=HIGHEST,
                             preferred_element_type=f32) * wf  # [E, Dv]

            # scatter_mean(cfconf, idx1, out=zeros): one-hot sum + 1/deg.
            agg = jnp.dot(smat, cfconf, precision=HIGHEST,
                          preferred_element_type=f32) * inv_deg  # [N, Dv]

            # AtomWise2 / AtomWise3 + residual.
            h = jnp.dot(agg, w2, precision=HIGHEST,
                        preferred_element_type=f32) + b2
            h = _softplus(h) - SHIFT
            h = jnp.dot(h, w3, precision=HIGHEST,
                        preferred_element_type=f32) + b3
            node = node + h

        # Crystal pooling: scatter_mean(node, idx3) as one-hot matmul.
        crys = jnp.dot(cmat, node, precision=HIGHEST,
                       preferred_element_type=f32) * inv_cnt  # [C, Dv]

        # Readout MLP (conv_to_fc, fcs[...], fc_out padded to 128 lanes).
        h = jnp.dot(crys, wc_ref[...], precision=HIGHEST,
                    preferred_element_type=f32) + bc_ref[...]
        h = _softplus(h) - SHIFT
        for i in range(n_hidden):
            h = jnp.dot(h, fcw_ref[i], precision=HIGHEST,
                        preferred_element_type=f32) + fcb_ref[i:i + 1, :]
            h = _softplus(h) - SHIFT
        out_ref[...] = (jnp.dot(h, wo_ref[...], precision=HIGHEST,
                                preferred_element_type=f32) + bo_ref[...])

    return kernel


# ----------------------------------------------------------------------------
# Wrapper: embedding lookup + input packing (glue), one fused pallas_call.
# ----------------------------------------------------------------------------
def schnet_forward(node_idx, edge_fea, idx1, idx2, idx3, params, n_crystals):
    node_fea = params["embedding"][node_idx].astype(jnp.float32)  # [N, Dv]
    n_atoms, dim_v1 = node_fea.shape
    n_edges = edge_fea.shape[0]

    idx2_col = idx2.astype(jnp.int32)[:, None]     # [E, 1]
    idx1_row = idx1.astype(jnp.int32)[None, :]     # [1, E]
    idx3_row = idx3.astype(jnp.int32)[None, :]     # [1, N]

    convs = params["convs"]
    n_conv = len(convs)
    dim_e1 = convs[0][2].shape[1]                  # bf1 width

    # Pack per-role conv weights (fewer prologue DMAs).
    # conv tuple order: (w1, wf1, bf1, wf2, bf2, w2, b2, w3, b3)
    conv_w = jnp.concatenate(
        [jnp.stack([cp[0], cp[5], cp[7]]) for cp in convs], axis=0)
    conv_b = jnp.concatenate(
        [jnp.concatenate([cp[6], cp[8]], axis=0) for cp in convs], axis=0)

    # Fuse FilterGenerator across layers: lane-concat Wf1/bf1/bf2, block-diag Wf2.
    wf1_cat = jnp.concatenate([cp[1] for cp in convs], axis=1)   # [De0, nc*De1]
    bf1_cat = jnp.concatenate([cp[2] for cp in convs], axis=1)   # [1, nc*De1]
    bf2_cat = jnp.concatenate([cp[4] for cp in convs], axis=1)   # [1, nc*De1]
    wf2_blk = jnp.zeros((n_conv * dim_e1, n_conv * dim_e1), jnp.float32)
    for c, cp in enumerate(convs):
        wf2_blk = wf2_blk.at[c * dim_e1:(c + 1) * dim_e1,
                             c * dim_e1:(c + 1) * dim_e1].set(cp[3])

    # Readout.
    wc, bc = params["conv_to_fc"]
    fcs = params["fcs"]
    n_hidden = len(fcs)
    assert n_hidden >= 1, "kernel built for n_h >= 2 (matches example config)"
    fcw = jnp.stack([w for w, _ in fcs])                         # [nh, H, H]
    fcb = jnp.concatenate([b for _, b in fcs], axis=0)           # [nh, H]
    wo, bo = params["fc_out"]
    out_dim = wo.shape[1]
    # Zero-pad fc_out to a lane-dense 128-wide output; slice after the kernel.
    wo_p = jnp.zeros((wo.shape[0], OUT_PAD), jnp.float32).at[:, :out_dim].set(wo)
    bo_p = jnp.zeros((1, OUT_PAD), jnp.float32).at[:, :out_dim].set(bo)

    kernel = make_schnet_kernel(n_conv, n_hidden, n_atoms, n_edges,
                                n_crystals, dim_e1)
    vmem = pl.BlockSpec(memory_space=pltpu.MemorySpace.VMEM)
    inputs = (node_fea, edge_fea, idx2_col, idx1_row, idx3_row,
              conv_w, conv_b, wf1_cat, bf1_cat, wf2_blk, bf2_cat,
              wc, bc, fcw, fcb, wo_p, bo_p)

    out_padded = pl.pallas_call(
        kernel,
        out_shape=jax.ShapeDtypeStruct((n_crystals, OUT_PAD), jnp.float32),
        in_specs=[vmem] * len(inputs),
        out_specs=vmem,
    )(*inputs)
    return out_padded[:, :out_dim]


# ----------------------------------------------------------------------------
# Deterministic parameter construction (Linear stored as W[in, out]).
# ----------------------------------------------------------------------------
def init_params(key, dim_v0, dim_v1, dim_e0, dim_e1, n_conv, h_fea_len, n_h):
    def nxt():
        nonlocal key
        key, sub = jax.random.split(key)
        return sub

    def lin(in_d, out_d):
        w = jax.random.normal(nxt(), (in_d, out_d), jnp.float32) * 0.1
        b = jax.random.normal(nxt(), (1, out_d), jnp.float32) * 0.1
        return w, b

    params = {}
    params["embedding"] = jax.random.normal(
        nxt(), (dim_v0, dim_v1), jnp.float32) * 0.1

    convs = []
    for _ in range(n_conv):
        w1 = jax.random.normal(nxt(), (dim_v1, dim_v1), jnp.float32) * 0.1
        wf1, bf1 = lin(dim_e0, dim_e1)
        wf2, bf2 = lin(dim_e1, dim_e1)
        w2, b2 = lin(dim_v1, dim_v1)
        w3, b3 = lin(dim_v1, dim_v1)
        convs.append((w1, wf1, bf1, wf2, bf2, w2, b2, w3, b3))
    params["convs"] = convs

    params["conv_to_fc"] = lin(dim_v1, h_fea_len)
    params["fcs"] = [lin(h_fea_len, h_fea_len) for _ in range(n_h - 1)]
    params["fc_out"] = lin(h_fea_len, 2)
    return params


if __name__ == "__main__":
    # Small synthetic instance.
    dim_v0, dim_v1, dim_e0, dim_e1 = 16, 32, 16, 32
    n_conv, h_fea_len, n_h = 2, 32, 2
    n_atoms, n_edges, n_crystals = 16, 48, 2

    key = jax.random.PRNGKey(0)
    kp, k1, k2, k3, k4 = jax.random.split(key, 5)

    params = init_params(kp, dim_v0, dim_v1, dim_e0, dim_e1, n_conv,
                         h_fea_len, n_h)

    node_idx = jax.random.randint(k1, (n_atoms,), 0, dim_v0, jnp.int32)
    edge_fea = jax.random.normal(k2, (n_edges, dim_e0), jnp.float32)
    idx1 = jax.random.randint(k3, (n_edges,), 0, n_atoms, jnp.int32)
    idx2 = jax.random.randint(k4, (n_edges,), 0, n_atoms, jnp.int32)
    # Assign each atom to a crystal; ensure both crystals are non-empty.
    idx3 = jnp.concatenate([
        jnp.zeros((n_atoms // 2,), jnp.int32),
        jnp.ones((n_atoms - n_atoms // 2,), jnp.int32),
    ])

    fwd = jax.jit(functools.partial(schnet_forward, n_crystals=n_crystals))
    out = fwd(node_idx, edge_fea, idx1, idx2, idx3, params)
    jax.block_until_ready(out)

    assert out.shape == (n_crystals, 2)
    assert jnp.all(jnp.isfinite(out))
    print("KERNEL_OK")
</pallas_src>

<mosaic_0001>
module attributes {stable_mosaic.version = 11 : i64} {
  func.func @kernel(%arg0: memref<16x32xf32, #tpu.memory_space<vmem>>, %arg1: memref<48x16xf32, #tpu.memory_space<vmem>>, %arg2: memref<48x1xi32, #tpu.memory_space<vmem>>, %arg3: memref<1x48xi32, #tpu.memory_space<vmem>>, %arg4: memref<1x16xi32, #tpu.memory_space<vmem>>, %arg5: memref<6x32x32xf32, #tpu.memory_space<vmem>>, %arg6: memref<4x32xf32, #tpu.memory_space<vmem>>, %arg7: memref<16x64xf32, #tpu.memory_space<vmem>>, %arg8: memref<1x64xf32, #tpu.memory_space<vmem>>, %arg9: memref<64x64xf32, #tpu.memory_space<vmem>>, %arg10: memref<1x64xf32, #tpu.memory_space<vmem>>, %arg11: memref<32x32xf32, #tpu.memory_space<vmem>>, %arg12: memref<1x32xf32, #tpu.memory_space<vmem>>, %arg13: memref<1x32x32xf32, #tpu.memory_space<vmem>>, %arg14: memref<1x32xf32, #tpu.memory_space<vmem>>, %arg15: memref<32x128xf32, #tpu.memory_space<vmem>>, %arg16: memref<1x128xf32, #tpu.memory_space<vmem>>, %arg17: memref<2x128xf32, #tpu.memory_space<vmem>>) attributes {dimension_semantics = [], scalar_prefetch = 0 : i64, scratch_operands = 0 : i64, tpu.core_type = #tpu.core_type<tc>} {
    %c0 = arith.constant 0 : index
    %c0_0 = arith.constant 0 : index
    %0 = vector.load %arg0[%c0, %c0_0] : memref<16x32xf32, #tpu.memory_space<vmem>>, vector<16x32xf32>
    %c0_1 = arith.constant 0 : index
    %c0_2 = arith.constant 0 : index
    %1 = vector.load %arg1[%c0_1, %c0_2] : memref<48x16xf32, #tpu.memory_space<vmem>>, vector<48x16xf32>
    %2 = tpu.iota {dimensions = array<i32: 1>} : vector<48x16xi32>
    %c0_3 = arith.constant 0 : index
    %c0_4 = arith.constant 0 : index
    %3 = vector.load %arg2[%c0_3, %c0_4] : memref<48x1xi32, #tpu.memory_space<vmem>>, vector<48x1xi32>
    %4 = vector.broadcast %3 : vector<48x1xi32> to vector<48x16xi32>
    %5 = arith.cmpi eq, %2, %4 : vector<48x16xi32>
    %6 = arith.extui %5 : vector<48x16xi1> to vector<48x16xi32>
    %7 = arith.sitofp %6 : vector<48x16xi32> to vector<48x16xf32>
    %8 = tpu.iota {dimensions = array<i32: 0>} : vector<16x48xi32>
    %c0_5 = arith.constant 0 : index
    %c0_6 = arith.constant 0 : index
    %9 = vector.load %arg3[%c0_5, %c0_6] : memref<1x48xi32, #tpu.memory_space<vmem>>, vector<1x48xi32>
    %10 = vector.broadcast %9 : vector<1x48xi32> to vector<16x48xi32>
    %11 = arith.cmpi eq, %8, %10 : vector<16x48xi32>
    %12 = arith.extui %11 : vector<16x48xi1> to vector<16x48xi32>
    %13 = arith.sitofp %12 : vector<16x48xi32> to vector<16x48xf32>
    %14 = tpu.iota {dimensions = array<i32: 0>} : vector<2x16xi32>
    %c0_7 = arith.constant 0 : index
    %c0_8 = arith.constant 0 : index
    %15 = vector.load %arg4[%c0_7, %c0_8] : memref<1x16xi32, #tpu.memory_space<vmem>>, vector<1x16xi32>
    %16 = vector.broadcast %15 : vector<1x16xi32> to vector<2x16xi32>
    %17 = arith.cmpi eq, %14, %16 : vector<2x16xi32>
    %18 = arith.extui %17 : vector<2x16xi1> to vector<2x16xi32>
    %19 = arith.sitofp %18 : vector<2x16xi32> to vector<2x16xf32>
    %cst = arith.constant dense<0.000000e+00> : vector<16xf32>
    %20 = vector.multi_reduction <add>, %13, %cst [1] : vector<16x48xf32> to vector<16xf32>
    %21 = vector.shape_cast %20 : vector<16xf32> to vector<16x1xf32>
    %cst_9 = arith.constant 1.000000e+00 : f32
    %22 = vector.broadcast %cst_9 : f32 to vector<16x1xf32>
    %23 = arith.maximumf %21, %22 : vector<16x1xf32>
    %cst_10 = arith.constant 1.000000e+00 : f32
    %24 = vector.broadcast %cst_10 : f32 to vector<16x1xf32>
    %25 = arith.divf %24, %23 : vector<16x1xf32>
    %cst_11 = arith.constant dense<0.000000e+00> : vector<2xf32>
    %26 = vector.multi_reduction <add>, %19, %cst_11 [1] : vector<2x16xf32> to vector<2xf32>
    %27 = vector.shape_cast %26 : vector<2xf32> to vector<2x1xf32>
    %cst_12 = arith.constant 1.000000e+00 : f32
    %28 = vector.broadcast %cst_12 : f32 to vector<2x1xf32>
    %29 = arith.maximumf %27, %28 : vector<2x1xf32>
    %cst_13 = arith.constant 1.000000e+00 : f32
    %30 = vector.broadcast %cst_13 : f32 to vector<2x1xf32>
    %31 = arith.divf %30, %29 : vector<2x1xf32>
    %c0_14 = arith.constant 0 : index
    %c0_15 = arith.constant 0 : index
    %32 = vector.load %arg7[%c0_14, %c0_15] : memref<16x64xf32, #tpu.memory_space<vmem>>, vector<16x64xf32>
    %cst_16 = arith.constant dense<0.000000e+00> : vector<48x64xf32>
    %33 = tpu.matmul %1, %32, %cst_16 {dimension_numbers = #tpu.dot_dimension_numbers<[1], [0], [0], [1], [0, 0, 1, 1], [], []>, precision = #tpu.contract_precision<fp32>} : vector<48x16xf32>, vector<16x64xf32>, vector<48x64xf32> -> vector<48x64xf32>
    %c0_17 = arith.constant 0 : index
    %c0_18 = arith.constant 0 : index
    %34 = vector.load %arg8[%c0_17, %c0_18] : memref<1x64xf32, #tpu.memory_space<vmem>>, vector<1x64xf32>
    %35 = vector.broadcast %34 : vector<1x64xf32> to vector<48x64xf32>
    %36 = arith.addf %33, %35 : vector<48x64xf32>
    %cst_19 = arith.constant 0.000000e+00 : f32
    %37 = vector.broadcast %cst_19 : f32 to vector<48x64xf32>
    %38 = arith.maximumf %36, %37 : vector<48x64xf32>
    %39 = math.absf %36 : vector<48x64xf32>
    %cst_20 = arith.constant 0.000000e+00 : f32
    %40 = vector.broadcast %cst_20 : f32 to vector<48x64xf32>
    %41 = arith.subf %40, %39 : vector<48x64xf32>
    %42 = math.exp %41 : vector<48x64xf32>
    %cst_21 = arith.constant 1.000000e+00 : f32
    %43 = vector.broadcast %cst_21 : f32 to vector<48x64xf32>
    %44 = arith.addf %43, %42 : vector<48x64xf32>
    %45 = math.log %44 : vector<48x64xf32>
    %46 = arith.addf %38, %45 : vector<48x64xf32>
    %cst_22 = arith.constant 0.693147182 : f32
    %47 = vector.broadcast %cst_22 : f32 to vector<48x64xf32>
    %48 = arith.subf %46, %47 : vector<48x64xf32>
    %c0_23 = arith.constant 0 : index
    %c0_24 = arith.constant 0 : index
    %49 = vector.load %arg9[%c0_23, %c0_24] : memref<64x64xf32, #tpu.memory_space<vmem>>, vector<64x64xf32>
    %cst_25 = arith.constant dense<0.000000e+00> : vector<48x64xf32>
    %50 = tpu.matmul %48, %49, %cst_25 {dimension_numbers = #tpu.dot_dimension_numbers<[1], [0], [0], [1], [0, 0, 1, 1], [], []>, precision = #tpu.contract_precision<fp32>} : vector<48x64xf32>, vector<64x64xf32>, vector<48x64xf32> -> vector<48x64xf32>
    %c0_26 = arith.constant 0 : index
    %c0_27 = arith.constant 0 : index
    %51 = vector.load %arg10[%c0_26, %c0_27] : memref<1x64xf32, #tpu.memory_space<vmem>>, vector<1x64xf32>
    %52 = vector.broadcast %51 : vector<1x64xf32> to vector<48x64xf32>
    %53 = arith.addf %50, %52 : vector<48x64xf32>
    %cst_28 = arith.constant 0.000000e+00 : f32
    %54 = vector.broadcast %cst_28 : f32 to vector<48x64xf32>
    %55 = arith.maximumf %53, %54 : vector<48x64xf32>
    %56 = math.absf %53 : vector<48x64xf32>
    %cst_29 = arith.constant 0.000000e+00 : f32
    %57 = vector.broadcast %cst_29 : f32 to vector<48x64xf32>
    %58 = arith.subf %57, %56 : vector<48x64xf32>
    %59 = math.exp %58 : vector<48x64xf32>
    %cst_30 = arith.constant 1.000000e+00 : f32
    %60 = vector.broadcast %cst_30 : f32 to vector<48x64xf32>
    %61 = arith.addf %60, %59 : vector<48x64xf32>
    %62 = math.log %61 : vector<48x64xf32>
    %63 = arith.addf %55, %62 : vector<48x64xf32>
    %cst_31 = arith.constant 0.693147182 : f32
    %64 = vector.broadcast %cst_31 : f32 to vector<48x64xf32>
    %65 = arith.subf %63, %64 : vector<48x64xf32>
    %c0_32 = arith.constant 0 : index
    %c0_33 = arith.constant 0 : index
    %c0_34 = arith.constant 0 : index
    %66 = vector.load %arg5[%c0_32, %c0_33, %c0_34] : memref<6x32x32xf32, #tpu.memory_space<vmem>>, vector<1x32x32xf32>
    %67 = vector.shape_cast %66 : vector<1x32x32xf32> to vector<32x32xf32>
    %c1 = arith.constant 1 : index
    %c0_35 = arith.constant 0 : index
    %c0_36 = arith.constant 0 : index
    %68 = vector.load %arg5[%c1, %c0_35, %c0_36] : memref<6x32x32xf32, #tpu.memory_space<vmem>>, vector<1x32x32xf32>
    %69 = vector.shape_cast %68 : vector<1x32x32xf32> to vector<32x32xf32>
    %c2 = arith.constant 2 : index
    %c0_37 = arith.constant 0 : index
    %c0_38 = arith.constant 0 : index
    %70 = vector.load %arg5[%c2, %c0_37, %c0_38] : memref<6x32x32xf32, #tpu.memory_space<vmem>>, vector<1x32x32xf32>
    %71 = vector.shape_cast %70 : vector<1x32x32xf32> to vector<32x32xf32>
    %c0_39 = arith.constant 0 : index
    %c0_40 = arith.constant 0 : index
    %72 = vector.load %arg6[%c0_39, %c0_40] : memref<4x32xf32, #tpu.memory_space<vmem>>, vector<1x32xf32>
    %c1_41 = arith.constant 1 : index
    %c0_42 = arith.constant 0 : index
    %73 = vector.load %arg6[%c1_41, %c0_42] : memref<4x32xf32, #tpu.memory_space<vmem>>, vector<1x32xf32>
    %cst_43 = arith.constant dense<0.000000e+00> : vector<16x32xf32>
    %74 = tpu.matmul %0, %67, %cst_43 {dimension_numbers = #tpu.dot_dimension_numbers<[1], [0], [0], [1], [0, 0, 1, 1], [], []>, precision = #tpu.contract_precision<fp32>} : vector<16x32xf32>, vector<32x32xf32>, vector<16x32xf32> -> vector<16x32xf32>
    %75 = vector.extract_strided_slice %65 {offsets = [0, 0], sizes = [48, 32], strides = [1, 1]} : vector<48x64xf32> to vector<48x32xf32>
    %cst_44 = arith.constant dense<0.000000e+00> : vector<48x32xf32>
    %76 = tpu.matmul %7, %74, %cst_44 {dimension_numbers = #tpu.dot_dimension_numbers<[1], [0], [0], [1], [0, 0, 1, 1], [], []>, precision = #tpu.contract_precision<fp32>} : vector<48x16xf32>, vector<16x32xf32>, vector<48x32xf32> -> vector<48x32xf32>
    %77 = arith.mulf %76, %75 : vector<48x32xf32>
    %cst_45 = arith.constant dense<0.000000e+00> : vector<16x32xf32>
    %78 = tpu.matmul %13, %77, %cst_45 {dimension_numbers = #tpu.dot_dimension_numbers<[1], [0], [0], [1], [0, 0, 1, 1], [], []>, precision = #tpu.contract_precision<fp32>} : vector<16x48xf32>, vector<48x32xf32>, vector<16x32xf32> -> vector<16x32xf32>
    %79 = vector.broadcast %25 : vector<16x1xf32> to vector<16x32xf32>
    %80 = arith.mulf %78, %79 : vector<16x32xf32>
    %cst_46 = arith.constant dense<0.000000e+00> : vector<16x32xf32>
    %81 = tpu.matmul %80, %69, %cst_46 {dimension_numbers = #tpu.dot_dimension_numbers<[1], [0], [0], [1], [0, 0, 1, 1], [], []>, precision = #tpu.contract_precision<fp32>} : vector<16x32xf32>, vector<32x32xf32>, vector<16x32xf32> -> vector<16x32xf32>
    %82 = vector.broadcast %72 : vector<1x32xf32> to vector<16x32xf32>
    %83 = arith.addf %81, %82 : vector<16x32xf32>
    %cst_47 = arith.constant 0.000000e+00 : f32
    %84 = vector.broadcast %cst_47 : f32 to vector<16x32xf32>
    %85 = arith.maximumf %83, %84 : vector<16x32xf32>
    %86 = math.absf %83 : vector<16x32xf32>
    %cst_48 = arith.constant 0.000000e+00 : f32
    %87 = vector.broadcast %cst_48 : f32 to vector<16x32xf32>
    %88 = arith.subf %87, %86 : vector<16x32xf32>
    %89 = math.exp %88 : vector<16x32xf32>
    %cst_49 = arith.constant 1.000000e+00 : f32
    %90 = vector.broadcast %cst_49 : f32 to vector<16x32xf32>
    %91 = arith.addf %90, %89 : vector<16x32xf32>
    %92 = math.log %91 : vector<16x32xf32>
    %93 = arith.addf %85, %92 : vector<16x32xf32>
    %cst_50 = arith.constant 0.693147182 : f32
    %94 = vector.broadcast %cst_50 : f32 to vector<16x32xf32>
    %95 = arith.subf %93, %94 : vector<16x32xf32>
    %cst_51 = arith.constant dense<0.000000e+00> : vector<16x32xf32>
    %96 = tpu.matmul %95, %71, %cst_51 {dimension_numbers = #tpu.dot_dimension_numbers<[1], [0], [0], [1], [0, 0, 1, 1], [], []>, precision = #tpu.contract_precision<fp32>} : vector<16x32xf32>, vector<32x32xf32>, vector<16x32xf32> -> vector<16x32xf32>
    %97 = vector.broadcast %73 : vector<1x32xf32> to vector<16x32xf32>
    %98 = arith.addf %96, %97 : vector<16x32xf32>
    %99 = arith.addf %0, %98 : vector<16x32xf32>
    %c3 = arith.constant 3 : index
    %c0_52 = arith.constant 0 : index
    %c0_53 = arith.constant 0 : index
    %100 = vector.load %arg5[%c3, %c0_52, %c0_53] : memref<6x32x32xf32, #tpu.memory_space<vmem>>, vector<1x32x32xf32>
    %101 = vector.shape_cast %100 : vector<1x32x32xf32> to vector<32x32xf32>
    %c4 = arith.constant 4 : index
    %c0_54 = arith.constant 0 : index
    %c0_55 = arith.constant 0 : index
    %102 = vector.load %arg5[%c4, %c0_54, %c0_55] : memref<6x32x32xf32, #tpu.memory_space<vmem>>, vector<1x32x32xf32>
    %103 = vector.shape_cast %102 : vector<1x32x32xf32> to vector<32x32xf32>
    %c5 = arith.constant 5 : index
    %c0_56 = arith.constant 0 : index
    %c0_57 = arith.constant 0 : index
    %104 = vector.load %arg5[%c5, %c0_56, %c0_57] : memref<6x32x32xf32, #tpu.memory_space<vmem>>, vector<1x32x32xf32>
    %105 = vector.shape_cast %104 : vector<1x32x32xf32> to vector<32x32xf32>
    %c2_58 = arith.constant 2 : index
    %c0_59 = arith.constant 0 : index
    %106 = vector.load %arg6[%c2_58, %c0_59] : memref<4x32xf32, #tpu.memory_space<vmem>>, vector<1x32xf32>
    %c3_60 = arith.constant 3 : index
    %c0_61 = arith.constant 0 : index
    %107 = vector.load %arg6[%c3_60, %c0_61] : memref<4x32xf32, #tpu.memory_space<vmem>>, vector<1x32xf32>
    %cst_62 = arith.constant dense<0.000000e+00> : vector<16x32xf32>
    %108 = tpu.matmul %99, %101, %cst_62 {dimension_numbers = #tpu.dot_dimension_numbers<[1], [0], [0], [1], [0, 0, 1, 1], [], []>, precision = #tpu.contract_precision<fp32>} : vector<16x32xf32>, vector<32x32xf32>, vector<16x32xf32> -> vector<16x32xf32>
    %109 = vector.extract_strided_slice %65 {offsets = [0, 32], sizes = [48, 32], strides = [1, 1]} : vector<48x64xf32> to vector<48x32xf32>
    %cst_63 = arith.constant dense<0.000000e+00> : vector<48x32xf32>
    %110 = tpu.matmul %7, %108, %cst_63 {dimension_numbers = #tpu.dot_dimension_numbers<[1], [0], [0], [1], [0, 0, 1, 1], [], []>, precision = #tpu.contract_precision<fp32>} : vector<48x16xf32>, vector<16x32xf32>, vector<48x32xf32> -> vector<48x32xf32>
    %111 = arith.mulf %110, %109 : vector<48x32xf32>
    %cst_64 = arith.constant dense<0.000000e+00> : vector<16x32xf32>
    %112 = tpu.matmul %13, %111, %cst_64 {dimension_numbers = #tpu.dot_dimension_numbers<[1], [0], [0], [1], [0, 0, 1, 1], [], []>, precision = #tpu.contract_precision<fp32>} : vector<16x48xf32>, vector<48x32xf32>, vector<16x32xf32> -> vector<16x32xf32>
    %113 = vector.broadcast %25 : vector<16x1xf32> to vector<16x32xf32>
    %114 = arith.mulf %112, %113 : vector<16x32xf32>
    %cst_65 = arith.constant dense<0.000000e+00> : vector<16x32xf32>
    %115 = tpu.matmul %114, %103, %cst_65 {dimension_numbers = #tpu.dot_dimension_numbers<[1], [0], [0], [1], [0, 0, 1, 1], [], []>, precision = #tpu.contract_precision<fp32>} : vector<16x32xf32>, vector<32x32xf32>, vector<16x32xf32> -> vector<16x32xf32>
    %116 = vector.broadcast %106 : vector<1x32xf32> to vector<16x32xf32>
    %117 = arith.addf %115, %116 : vector<16x32xf32>
    %cst_66 = arith.constant 0.000000e+00 : f32
    %118 = vector.broadcast %cst_66 : f32 to vector<16x32xf32>
    %119 = arith.maximumf %117, %118 : vector<16x32xf32>
    %120 = math.absf %117 : vector<16x32xf32>
    %cst_67 = arith.constant 0.000000e+00 : f32
    %121 = vector.broadcast %cst_67 : f32 to vector<16x32xf32>
    %122 = arith.subf %121, %120 : vector<16x32xf32>
    %123 = math.exp %122 : vector<16x32xf32>
    %cst_68 = arith.constant 1.000000e+00 : f32
    %124 = vector.broadcast %cst_68 : f32 to vector<16x32xf32>
    %125 = arith.addf %124, %123 : vector<16x32xf32>
    %126 = math.log %125 : vector<16x32xf32>
    %127 = arith.addf %119, %126 : vector<16x32xf32>
    %cst_69 = arith.constant 0.693147182 : f32
    %128 = vector.broadcast %cst_69 : f32 to vector<16x32xf32>
    %129 = arith.subf %127, %128 : vector<16x32xf32>
    %cst_70 = arith.constant dense<0.000000e+00> : vector<16x32xf32>
    %130 = tpu.matmul %129, %105, %cst_70 {dimension_numbers = #tpu.dot_dimension_numbers<[1], [0], [0], [1], [0, 0, 1, 1], [], []>, precision = #tpu.contract_precision<fp32>} : vector<16x32xf32>, vector<32x32xf32>, vector<16x32xf32> -> vector<16x32xf32>
    %131 = vector.broadcast %107 : vector<1x32xf32> to vector<16x32xf32>
    %132 = arith.addf %130, %131 : vector<16x32xf32>
    %133 = arith.addf %99, %132 : vector<16x32xf32>
    %cst_71 = arith.constant dense<0.000000e+00> : vector<2x32xf32>
    %134 = tpu.matmul %19, %133, %cst_71 {dimension_numbers = #tpu.dot_dimension_numbers<[1], [0], [0], [1], [0, 0, 1, 1], [], []>, precision = #tpu.contract_precision<fp32>} : vector<2x16xf32>, vector<16x32xf32>, vector<2x32xf32> -> vector<2x32xf32>
    %135 = vector.broadcast %31 : vector<2x1xf32> to vector<2x32xf32>
    %136 = arith.mulf %134, %135 : vector<2x32xf32>
    %c0_72 = arith.constant 0 : index
    %c0_73 = arith.constant 0 : index
    %137 = vector.load %arg11[%c0_72, %c0_73] : memref<32x32xf32, #tpu.memory_space<vmem>>, vector<32x32xf32>
    %cst_74 = arith.constant dense<0.000000e+00> : vector<2x32xf32>
    %138 = tpu.matmul %136, %137, %cst_74 {dimension_numbers = #tpu.dot_dimension_numbers<[1], [0], [0], [1], [0, 0, 1, 1], [], []>, precision = #tpu.contract_precision<fp32>} : vector<2x32xf32>, vector<32x32xf32>, vector<2x32xf32> -> vector<2x32xf32>
    %c0_75 = arith.constant 0 : index
    %c0_76 = arith.constant 0 : index
    %139 = vector.load %arg12[%c0_75, %c0_76] : memref<1x32xf32, #tpu.memory_space<vmem>>, vector<1x32xf32>
    %140 = vector.broadcast %139 : vector<1x32xf32> to vector<2x32xf32>
    %141 = arith.addf %138, %140 : vector<2x32xf32>
    %cst_77 = arith.constant 0.000000e+00 : f32
    %142 = vector.broadcast %cst_77 : f32 to vector<2x32xf32>
    %143 = arith.maximumf %141, %142 : vector<2x32xf32>
    %144 = math.absf %141 : vector<2x32xf32>
    %cst_78 = arith.constant 0.000000e+00 : f32
    %145 = vector.broadcast %cst_78 : f32 to vector<2x32xf32>
    %146 = arith.subf %145, %144 : vector<2x32xf32>
    %147 = math.exp %146 : vector<2x32xf32>
    %cst_79 = arith.constant 1.000000e+00 : f32
    %148 = vector.broadcast %cst_79 : f32 to vector<2x32xf32>
    %149 = arith.addf %148, %147 : vector<2x32xf32>
    %150 = math.log %149 : vector<2x32xf32>
    %151 = arith.addf %143, %150 : vector<2x32xf32>
    %cst_80 = arith.constant 0.693147182 : f32
    %152 = vector.broadcast %cst_80 : f32 to vector<2x32xf32>
    %153 = arith.subf %151, %152 : vector<2x32xf32>
    %c0_81 = arith.constant 0 : index
    %c0_82 = arith.constant 0 : index
    %c0_83 = arith.constant 0 : index
    %154 = vector.load %arg13[%c0_81, %c0_82, %c0_83] : memref<1x32x32xf32, #tpu.memory_space<vmem>>, vector<1x32x32xf32>
    %155 = vector.shape_cast %154 : vector<1x32x32xf32> to vector<32x32xf32>
    %cst_84 = arith.constant dense<0.000000e+00> : vector<2x32xf32>
    %156 = tpu.matmul %153, %155, %cst_84 {dimension_numbers = #tpu.dot_dimension_numbers<[1], [0], [0], [1], [0, 0, 1, 1], [], []>, precision = #tpu.contract_precision<fp32>} : vector<2x32xf32>, vector<32x32xf32>, vector<2x32xf32> -> vector<2x32xf32>
    %c0_85 = arith.constant 0 : index
    %c0_86 = arith.constant 0 : index
    %157 = vector.load %arg14[%c0_85, %c0_86] : memref<1x32xf32, #tpu.memory_space<vmem>>, vector<1x32xf32>
    %158 = vector.broadcast %157 : vector<1x32xf32> to vector<2x32xf32>
    %159 = arith.addf %156, %158 : vector<2x32xf32>
    %cst_87 = arith.constant 0.000000e+00 : f32
    %160 = vector.broadcast %cst_87 : f32 to vector<2x32xf32>
    %161 = arith.maximumf %159, %160 : vector<2x32xf32>
    %162 = math.absf %159 : vector<2x32xf32>
    %cst_88 = arith.constant 0.000000e+00 : f32
    %163 = vector.broadcast %cst_88 : f32 to vector<2x32xf32>
    %164 = arith.subf %163, %162 : vector<2x32xf32>
    %165 = math.exp %164 : vector<2x32xf32>
    %cst_89 = arith.constant 1.000000e+00 : f32
    %166 = vector.broadcast %cst_89 : f32 to vector<2x32xf32>
    %167 = arith.addf %166, %165 : vector<2x32xf32>
    %168 = math.log %167 : vector<2x32xf32>
    %169 = arith.addf %161, %168 : vector<2x32xf32>
    %cst_90 = arith.constant 0.693147182 : f32
    %170 = vector.broadcast %cst_90 : f32 to vector<2x32xf32>
    %171 = arith.subf %169, %170 : vector<2x32xf32>
    %c0_91 = arith.constant 0 : index
    %c0_92 = arith.constant 0 : index
    %172 = vector.load %arg15[%c0_91, %c0_92] : memref<32x128xf32, #tpu.memory_space<vmem>>, vector<32x128xf32>
    %cst_93 = arith.constant dense<0.000000e+00> : vector<2x128xf32>
    %173 = tpu.matmul %171, %172, %cst_93 {dimension_numbers = #tpu.dot_dimension_numbers<[1], [0], [0], [1], [0, 0, 1, 1], [], []>, precision = #tpu.contract_precision<fp32>} : vector<2x32xf32>, vector<32x128xf32>, vector<2x128xf32> -> vector<2x128xf32>
    %c0_94 = arith.constant 0 : index
    %c0_95 = arith.constant 0 : index
    %174 = vector.load %arg16[%c0_94, %c0_95] : memref<1x128xf32, #tpu.memory_space<vmem>>, vector<1x128xf32>
    %175 = vector.broadcast %174 : vector<1x128xf32> to vector<2x128xf32>
    %176 = arith.addf %173, %175 : vector<2x128xf32>
    %c0_96 = arith.constant 0 : index
    %c0_97 = arith.constant 0 : index
    %177 = vector.load %arg17[%c0_96, %c0_97] : memref<2x128xf32, #tpu.memory_space<vmem>>, vector<2x128xf32>
    tpu.vector_store %arg17[%c0_96, %c0_97], %176 {strides = array<i32>} : memref<2x128xf32, #tpu.memory_space<vmem>>, vector<2x128xf32>,
    return
  }
}

</mosaic_0001>

<bundles_post_ra>
// kernel: schnet_forward.1
= control target key start
LH: loop header
LB: loop body
LE: loop exit
PB: predicated region body
PF: predicated region fallthrough
CT: control target
= control target key end

     0   :  { %s5669_s0 = inlined_call_operand.vmem [shape: f32[16,32], index: 0, kind: input, shape index: {}]   ;;  %s5670_s1 = inlined_call_operand.vmem [shape: f32[48,16], index: 1, kind: input, shape index: {}]   ;;  %s5671_s2 = inlined_call_operand.vmem [shape: s32[48,1], index: 2, kind: input, shape index: {}]   ;;  %s5672_s3 = inlined_call_operand.vmem [shape: s32[1,48], index: 3, kind: input, shape index: {}]   ;;  %s5673_s4 = inlined_call_operand.vmem [shape: s32[1,16], index: 4, kind: input, shape index: {}]   ;;  %s5674_s5 = inlined_call_operand.vmem [shape: f32[6,32,32], index: 5, kind: input, shape index: {}]   ;;  %s5675_s6 = inlined_call_operand.vmem [shape: f32[4,32], index: 6, kind: input, shape index: {}]   ;;  %s5676_s7 = inlined_call_operand.vmem [shape: f32[16,64], index: 7, kind: input, shape index: {}]   ;;  %s5677_s8 = inlined_call_operand.vmem [shape: f32[1,64], index: 8, kind: input, shape index: {}]   ;;  %s5678_s9 = inlined_call_operand.vmem [shape: f32[64,64], index: 9, kind: input, shape index: {}]   ;;  %s5679_s10 = inlined_call_operand.vmem [shape: f32[1,64], index: 10, kind: input, shape index: {}]   ;;  %s5680_s11 = inlined_call_operand.vmem [shape: f32[32,32], index: 11, kind: input, shape index: {}]   ;;  %s5681_s12 = inlined_call_operand.vmem [shape: f32[1,32], index: 12, kind: input, shape index: {}]   ;;  %s5682_s13 = inlined_call_operand.vmem [shape: f32[1,32,32], index: 13, kind: input, shape index: {}]   ;;  %s5683_s14 = inlined_call_operand.vmem [shape: f32[1,32], index: 14, kind: input, shape index: {}]   ;;  %s5684_s15 = inlined_call_operand.vmem [shape: f32[32,128], index: 15, kind: input, shape index: {}]   ;;  %s5685_s16 = inlined_call_operand.vmem [shape: f32[1,128], index: 16, kind: input, shape index: {}]   ;;  %s5686_s17 = inlined_call_operand.hbm [shape: f32[2,128], index: 17, kind: output, shape index: {}]  }
   0x1   :  { %5704 = sst [smem:[#allocation14_spill]] %s5669_s0 }
   0x2   :  { %5705 = sst [smem:[#allocation15_spill]] %s5670_s1 }
   0x3   :  { %v185_v0 = vld [vmem:[%s5676_s7 + $0x8] sm:$0xff]  ;;  %v184_v1 = vld [vmem:[%s5676_s7] sm:$0xff]  ;;  %s5706_s0 = sld [smem:[#allocation15_spill]]  ;;  %vm190_vm0 = vcmask 130048  }
   0x4   :  { %v223_v3 = vand.u32 4294901760, %v185_v0  ;;  %v225_v4 = vand.u32 4294901760, %v184_v1 }
   0x6   :  { %v291_v10 = vsub.f32 %v185_v0, %v223_v3  ;;  %224 = vmatpush.msra.mxu0 %v223_v3  ;;  %v297_v11 = vsub.f32 %v184_v1, %v225_v4  ;;  %393 = vmatpush.msra.mxu3 %v223_v3 }
   0x8   :  { %343 = vmatpush.msra.mxu2 %v291_v10  ;;  %226 = vmatpush.msra.mxu0 %v225_v4  ;;  %v292_v15 = vand.u32 4294901760, %v291_v10  ;;  %v298_v16 = vand.u32 4294901760, %v297_v11 }
   0x9   :  { %v59_v2 = vld [vmem:[%s5706_s0] sm:$0xff]  ;;  %v60_v6 = vld [vmem:[%s5706_s0 + $0x8] sm:$0xff]  ;;  %v61_v7 = vld [vmem:[%s5706_s0 + $0x10] sm:$0xff]  ;;  %395 = vmatpush.msra.mxu3 %v225_v4 }
   0xa   :  { %v192_v5 = vsel %vm190_vm0, %v59_v2, 0  ;;  %v195_v9 = vsel %vm190_vm0, %v60_v6, 0  ;;  %v198_v14 = vsel %vm190_vm0, %v61_v7, 0  ;;  %346 = vmatpush.msra.mxu2 %v297_v11  ;;  %v293_v19 = vsub.f32 %v291_v10, %v292_v15  ;;  %450 = vmatpush.msrb.mxu0 %v292_v15 }
   0xb   :  { %v4776_v8 = vand.u32 4294901760, %v192_v5  ;;  %v4779_v12 = vand.u32 4294901760, %v195_v9  ;;  %v299_v20 = vsub.f32 %v297_v11, %v298_v16  ;;  %v4784_v23 = vand.u32 4294901760, %v198_v14 }
   0xd   :  { %v228_v13 = vsub.f32 %v192_v5, %v4776_v8  ;;  %v236_v17 = vsub.f32 %v195_v9, %v4779_v12 }
   0xf   :  { %v229_v18 = vand.u32 4294901760, %v228_v13  ;;  %349 = vmatmul.f32.vlgmr.msra.gmra.mxu2 %v228_v13  ;;  %v237_v22 = vand.u32 4294901760, %v236_v17 }
  0x11   :  { %v230_v21 = vsub.f32 %v228_v13, %v229_v18  ;;  %399 = vmatmul.f32.vlgmr.msra.gmra.mxu3 %v229_v18 }
  0x12   :  { %22 = vsyncpa [#allocation3], 0  ;;  %v294_v24 = vand.u32 4294901760, %v293_v19  ;;  %v300_v25 = vand.u32 4294901760, %v299_v20  ;;  %454 = vmatpush.msrb.mxu0 %v298_v16  ;;  %v62_v27 = vld [vmem:[%s5706_s0 + $0x18] sm:$0xff]  ;;  %v238_v28 = vsub.f32 %v236_v17, %v237_v22  ;;  %v244_v29 = vsub.f32 %v198_v14, %v4784_v23  ;;  %v63_v34 = vld [vmem:[%s5706_s0 + $0x20] sm:$0xff] }
  0x13   :  { %v231_v26 = vand.u32 4294901760, %v230_v21  ;;  %v201_v30 = vsel %vm190_vm0, %v62_v27, 0  ;;  %v204_v37 = vsel %vm190_vm0, %v63_v34, 0  ;;  %v64_v41 = vld [vmem:[%s5706_s0 + $0x28] sm:$0xff]  ;;  %v590_v62 = vld [vmem:[%s5678_s9 + $0x38] sm:$0xff]  ;;  %v589_v0 = vld [vmem:[%s5678_s9 + $0x30] sm:$0xff] }
  0x14   :  { %295 = vmatpush.msra.mxu1 %v294_v24  ;;  %v239_v31 = vand.u32 4294901760, %v238_v28  ;;  %v245_v32 = vand.u32 4294901760, %v244_v29  ;;  %v251_v33 = vand.u32 4294901760, %v201_v30  ;;  %v259_v40 = vand.u32 4294901760, %v204_v37  ;;  %v588_v5 = vld [vmem:[%s5678_s9 + $0x28] sm:$0xff]  ;;  %v587_v10 = vld [vmem:[%s5678_s9 + $0x20] sm:$0xff] }
  0x15   :  { %232 = vmatmul.f32.vlgmr.msra.gmra.mxu0 %v231_v26  ;;  %v207_v44 = vsel %vm190_vm0, %v64_v41, 0  ;;  %v4823_v63 = vand.u32 4294901760, %v590_v62  ;;  %v586_v18 = vld [vmem:[%s5678_s9 + $0x18] sm:$0xff]  ;;  %v585_v24 = vld [vmem:[%s5678_s9 + $0x10] sm:$0xff]  ;;  %vm595_vm1 = vcmask 523264   ;;  %s5707_s1 = sld [smem:[#allocation14_spill]] }
  0x16   :  { %301 = vmatpush.msra.mxu1 %v300_v25  ;;  %v246_v35 = vsub.f32 %v244_v29, %v245_v32  ;;  %v252_v36 = vsub.f32 %v201_v30, %v251_v33  ;;  %v260_v43 = vsub.f32 %v204_v37, %v259_v40  ;;  %v267_v47 = vand.u32 4294901760, %v207_v44  ;;  %s4435_s30 = sshll.u32 %s5686_s17, 4  ;;  %s4436_s30 = int_to_ptr.hbm [resolvable:$true] %s4435_s30 }
  0x17   :  { %303 = vmatmul.f32.vlgmr.msra.gmra.mxu1 %v4776_v8  ;;  %354 = vmatmul.f32.gmra.mxu2 %v236_v17  ;;  %v4829_v2 = vsub.f32 %v590_v62, %v4823_v63  ;;  %v4871_v17 = vand.u32 4294901760, %v587_v10  ;;  %v4895_v27 = vand.u32 4294901760, %v585_v24  ;;  %vm1082_vm2 = vcmask 261120  }
  0x18   :  { %495 = vmatpush.msrb.mxu1 %v223_v3  ;;  %v247_v38 = vand.u32 4294901760, %v246_v35  ;;  %v253_v39 = vand.u32 4294901760, %v252_v36  ;;  %v261_v46 = vand.u32 4294901760, %v260_v43  ;;  %v268_v49 = vsub.f32 %v207_v44, %v267_v47  ;;  %623 = vmatpush.msrb.mxu2 %v4823_v63 }
  0x19   :  { %405 = vmatmul.f32.gmra.mxu3 %v237_v22  ;;  %v4831_v3 = vand.u32 4294901760, %v589_v0  ;;  %v697_v6 = vand.u32 4294901760, %v4829_v2  ;;  %778 = vmatpush.msra.mxu0 %v4829_v2  ;;  %v4883_v22 = vsub.f32 %v587_v10, %v4871_v17  ;;  %v4907_v34 = vsub.f32 %v585_v24, %v4895_v27 }
  0x1a   :  { %497 = vmatpush.msrb.mxu1 %v225_v4  ;;  %v254_v42 = vsub.f32 %v252_v36, %v253_v39  ;;  %v262_v48 = vsub.f32 %v260_v43, %v261_v46  ;;  %v269_v51 = vand.u32 4294901760, %v268_v49  ;;  %v4838_v4 = vld [vmem:[%s5677_s8] ss:$0 sm:$0xff]  ;;  %vm125_vm10 = vcmask 392192  }
  0x1b   :  { %v4845_v7 = vsub.f32 %v589_v0, %v4831_v3  ;;  %625 = vmatpush.msrb.mxu2 %v4831_v3  ;;  %v698_v11 = vsub.f32 %v4829_v2, %v697_v6 }
  0x1c   :  { %v255_v45 = vand.u32 4294901760, %v254_v42  ;;  %v263_v50 = vand.u32 4294901760, %v262_v48  ;;  %v270_v52 = vsub.f32 %v268_v49, %v269_v51  ;;  %840 = vmatpush.msra.mxu1 %v4823_v63 }
  0x1d   :  { %240 = vmatmul.f32.gmra.mxu0 %v239_v31  ;;  %v699_v19 = vand.u32 4294901760, %v698_v11  ;;  %v584_v31 = vld [vmem:[%s5678_s9 + $0x8] sm:$0xff] }
  0x1e   :  { %v271_v53 = vand.u32 4294901760, %v270_v52  ;;  %842 = vmatpush.msra.mxu1 %v4831_v3  ;;  %781 = vmatpush.msra.mxu0 %v4845_v7  ;;  %v4909_v35 = vand.u32 4294901760, %v584_v31 }
  0x1f   :  { %307 = vmatmul.f32.gmra.mxu1 %v4779_v12  ;;  %359 = vmatmul.f32.gmra.mxu2 %v244_v29  ;;  %v715_v29 = vand.u32 4294901760, %v4883_v22 }
  0x20   :  { %700 = vmatpush.msrb.mxu3 %v699_v19  ;;  %v4925_v41 = vsub.f32 %v584_v31, %v4909_v35 }
  0x21   :  { %411 = vmatmul.f32.gmra.mxu3 %v245_v32  ;;  %v716_v37 = vsub.f32 %v4883_v22, %v715_v29 }
  0x25   :  { %248 = vmatmul.f32.gmra.mxu0 %v247_v38 }
  0x27   :  { %311 = vmatmul.f32.gmra.mxu1 %v4784_v23  ;;  %364 = vmatmul.f32.gmra.mxu2 %v252_v36 }
  0x29   :  { %417 = vmatmul.f32.gmra.mxu3 %v253_v39  ;;  %v583_v39 = vld [vmem:[%s5678_s9] sm:$0xff] }
  0x2a   :  { %v4927_v42 = vand.u32 4294901760, %v583_v39 }
  0x2d   :  { %256 = vmatmul.f32.gmra.mxu0 %v255_v45  ;;  %v717_v45 = vand.u32 4294901760, %v716_v37 }
  0x2f   :  { %315 = vmatmul.f32.gmra.mxu1 %v251_v33  ;;  %369 = vmatmul.f32.gmra.mxu2 %v260_v43 }
  0x31   :  { %423 = vmatmul.f32.gmra.mxu3 %v261_v46 }
  0x35   :  { %264 = vmatmul.f32.gmra.mxu0 %v263_v50  ;;  %v738_v50 = vsub.f32 %v583_v39, %v4927_v42 }
  0x37   :  { %319 = vmatmul.f32.gmra.mxu1 %v259_v40  ;;  %374 = vmatmul.f32.gmra.mxu2 %v268_v49  ;;  %v733_v49 = vand.u32 4294901760, %v4925_v41 }
  0x39   :  { %429 = vmatmul.f32.gmra.mxu3 %v269_v51 }
  0x3d   :  { %272 = vmatmul.f32.gmra.mxu0 %v271_v53 }
  0x3f   :  { %323 = vmatmul.f32.gmra.mxu1 %v267_v47 }
  0x45   :  { %456 = vmatmul.f32.vlgmr.msrb.gmra.mxu0 %v4776_v8 }
  0x47   :  { %499 = vmatmul.f32.vlgmr.msrb.gmra.mxu1 %v4776_v8  ;;  %v4848_v8 = vand.u32 4294901760, %v588_v5 }
  0x49   :  { %v4862_v13 = vsub.f32 %v588_v5, %v4848_v8  ;;  %844 = vmatpush.msra.mxu1 %v4848_v8  ;;  %627 = vmatpush.msrb.mxu2 %v4848_v8 }
  0x4b   :  { %v709_v21 = vand.u32 4294901760, %v4862_v13  ;;  %784 = vmatpush.msra.mxu0 %v4862_v13  ;;  %846 = vmatpush.msra.mxu1 %v4871_v17 }
  0x4c   :  { %629 = vmatpush.msrb.mxu2 %v4871_v17 }
  0x4d   :  { %460 = vmatmul.f32.gmra.mxu0 %v4779_v12  ;;  %v710_v26 = vsub.f32 %v4862_v13, %v709_v21 }
  0x4e   :  { %787 = vmatpush.msra.mxu0 %v4883_v22 }
  0x4f   :  { %503 = vmatmul.f32.gmra.mxu1 %v4779_v12  ;;  %v703_v12 = vand.u32 4294901760, %v4845_v7 }
  0x51   :  { %v704_v20 = vsub.f32 %v4845_v7, %v703_v12 }
  0x53   :  { %v705_v25 = vand.u32 4294901760, %v704_v20 }
  0x55   :  { %464 = vmatmul.f32.gmra.mxu0 %v4784_v23  ;;  %706 = vmatpush.msrb.mxu3 %v705_v25 }
  0x57   :  { %507 = vmatmul.f32.gmra.mxu1 %v4784_v23  ;;  %v4885_v23 = vand.u32 4294901760, %v586_v18 }
  0x59   :  { %v4899_v30 = vsub.f32 %v586_v18, %v4885_v23  ;;  %848 = vmatpush.msra.mxu1 %v4885_v23  ;;  %631 = vmatpush.msrb.mxu2 %v4885_v23 }
  0x5b   :  { %v721_v38 = vand.u32 4294901760, %v4899_v30  ;;  %790 = vmatpush.msra.mxu0 %v4899_v30  ;;  %850 = vmatpush.msra.mxu1 %v4895_v27 }
  0x5c   :  { %633 = vmatpush.msrb.mxu2 %v4895_v27 }
  0x5d   :  { %468 = vmatmul.f32.gmra.mxu0 %v251_v33  ;;  %v722_v46 = vsub.f32 %v4899_v30, %v721_v38  ;;  %852 = vmatpush.msra.mxu1 %v4909_v35 }
  0x5e   :  { %793 = vmatpush.msra.mxu0 %v4907_v34  ;;  %635 = vmatpush.msrb.mxu2 %v4909_v35 }
  0x5f   :  { %511 = vmatmul.f32.gmra.mxu1 %v251_v33  ;;  %v711_v33 = vand.u32 4294901760, %v710_v26  ;;  %v723_v52 = vand.u32 4294901760, %v722_v46 }
  0x60   :  { %796 = vmatpush.msra.mxu0 %v4925_v41  ;;  %854 = vmatpush.msra.mxu1 %v4927_v42 }
  0x61   :  { %712 = vmatpush.msrb.mxu3 %v711_v33  ;;  %637 = vmatpush.msrb.mxu2 %v4927_v42 }
  0x62   :  { %799 = vmatpush.msra.mxu0 %v738_v50 }
  0x63   :  { %718 = vmatpush.msrb.mxu3 %v717_v45  ;;  %903 = vmatpush.msra.mxu2 %v697_v6 }
  0x65   :  { %472 = vmatmul.f32.gmra.mxu0 %v259_v40  ;;  %724 = vmatpush.msrb.mxu3 %v723_v52 }
  0x66   :  { %907 = vmatpush.msra.mxu2 %v703_v12 }
  0x67   :  { %515 = vmatmul.f32.gmra.mxu1 %v259_v40  ;;  %v727_v40 = vand.u32 4294901760, %v4907_v34 }
  0x68   :  { %911 = vmatpush.msra.mxu2 %v709_v21 }
  0x69   :  { %v728_v48 = vsub.f32 %v4907_v34, %v727_v40 }
  0x6a   :  { %915 = vmatpush.msra.mxu2 %v715_v29 }
  0x6b   :  { %v729_v53 = vand.u32 4294901760, %v728_v48 }
  0x6c   :  { %919 = vmatpush.msra.mxu2 %v721_v38 }
  0x6d   :  { %476 = vmatmul.f32.gmra.mxu0 %v267_v47  ;;  %730 = vmatpush.msrb.mxu3 %v729_v53 }
  0x6e   :  { %923 = vmatpush.msra.mxu2 %v727_v40 }
  0x6f   :  { %519 = vmatmul.f32.gmra.mxu1 %v267_v47 }
  0x70   :  { %927 = vmatpush.msra.mxu2 %v733_v49 }
  0x92   :  { %v233_v54 = vpop.f32.mrf.mxu0  ;;  %v350_v1 = vpop.f32.mrf.mxu2 }
  0x93   :  { %v234_v14 = vadd.f32 %v4838_v4, %v233_v54  ;;  %v734_v54 = vsub.f32 %v4925_v41, %v733_v49 }
  0x94   :  { %v304_v55 = vpop.f32.mrf.mxu1  ;;  %v4867_v15 = vpop.f32.mrf.mxu3 }
  0x95   :  { %v305_v28 = vadd.f32 %v304_v55, %v234_v14  ;;  %v739_v55 = vand.u32 4294901760, %v738_v50  ;;  %v735_v0 = vand.u32 4294901760, %v734_v54 }
  0x97   :  { %v351_v43 = vadd.f32 %v350_v1, %v305_v28  ;;  %v740_v1 = vsub.f32 %v738_v50, %v739_v55  ;;  %736 = vmatpush.msrb.mxu3 %v735_v0  ;;  %931 = vmatpush.msra.mxu2 %v739_v55 }
  0x99   :  { %v741_v14 = vand.u32 4294901760, %v740_v1 }
  0x9a   :  { %v4808_v56 = vpop.f32.mrf.mxu0  ;;  %v355_v32 = vpop.f32.mrf.mxu2 }
  0x9b   :  { %v242_v47 = vadd.f32 %v4838_v4, %v4808_v56  ;;  %v401_v56 = vadd.f32 %v4867_v15, %v351_v43  ;;  %742 = vmatpush.msrb.mxu3 %v741_v14 }
  0x9c   :  { %v4810_v57 = vpop.f32.mrf.mxu1  ;;  %v406_v51 = vpop.f32.mrf.mxu3 }
  0x9d   :  { %v309_v62 = vadd.f32 %v4810_v57, %v242_v47  ;;  %966 = vmatpush.msra.mxu3 %v4823_v63 }
  0x9f   :  { %v356_v19 = vadd.f32 %v355_v32, %v309_v62  ;;  %968 = vmatpush.msra.mxu3 %v4831_v3 }
  0xa1   :  { %v407_v7 = vadd.f32 %v406_v51, %v356_v19  ;;  %970 = vmatpush.msra.mxu3 %v4848_v8 }
  0xa2   :  { %v4812_v58 = vpop.f32.mrf.mxu0  ;;  %v360_v10 = vpop.f32.mrf.mxu2 }
  0xa3   :  { %v250_v15 = vadd.f32 %v4838_v4, %v4812_v58  ;;  %972 = vmatpush.msra.mxu3 %v4871_v17 }
  0xa4   :  { %v4814_v59 = vpop.f32.mrf.mxu1  ;;  %v412_v6 = vpop.f32.mrf.mxu3 }
  0xa5   :  { %v313_v12 = vadd.f32 %v4814_v59, %v250_v15  ;;  %974 = vmatpush.msra.mxu3 %v4885_v23 }
  0xa7   :  { %v361_v25 = vadd.f32 %v360_v10, %v313_v12  ;;  %976 = vmatpush.msra.mxu3 %v4895_v27 }
  0xa9   :  { %v413_v3 = vadd.f32 %v412_v6, %v361_v25  ;;  %978 = vmatpush.msra.mxu3 %v4909_v35 }
  0xaa   :  { %v4816_v60 = vpop.f32.mrf.mxu0  ;;  %v365_v22 = vpop.f32.mrf.mxu2 }
  0xab   :  { %v258_v63 = vadd.f32 %v4838_v4, %v4816_v60  ;;  %980 = vmatpush.msra.mxu3 %v4927_v42 }
  0xac   :  { %v4818_v61 = vpop.f32.mrf.mxu1  ;;  %v418_v29 = vpop.f32.mrf.mxu3 }
  0xad   :  { %v317_v8 = vadd.f32 %v4818_v61, %v258_v63 }
  0xaf   :  { %v366_v23 = vadd.f32 %v365_v22, %v317_v8 }
  0xb1   :  { %v419_v39 = vadd.f32 %v418_v29, %v366_v23 }
  0xb2   :  { %v4851_v9 = vpop.f32.mrf.mxu0  ;;  %v370_v61 = vpop.f32.mrf.mxu2 }
  0xb3   :  { %v266_v17 = vadd.f32 %v4838_v4, %v4851_v9 }
  0xb4   :  { %v4869_v16 = vpop.f32.mrf.mxu1  ;;  %v424_v47 = vpop.f32.mrf.mxu3 }
  0xb5   :  { %v321_v38 = vadd.f32 %v4869_v16, %v266_v17 }
  0xb7   :  { %v371_v46 = vadd.f32 %v370_v61, %v321_v38 }
  0xb9   :  { %v425_v55 = vadd.f32 %v424_v47, %v371_v46 }
  0xba   :  { %v4912_v36 = vpop.f32.mrf.mxu0 }
  0xbb   :  { %v274_v48 = vadd.f32 %v4838_v4, %v4912_v36 }
  0xbc   :  { %v4930_v44 = vpop.f32.mrf.mxu1  ;;  %v430_v6 = vpop.f32.mrf.mxu3 }
  0xbd   :  { %v325_v54 = vadd.f32 %v4930_v44, %v274_v48 }
  0xc2   :  { %v457_v5 = vpop.f32.mrf.mxu0 }
  0xc3   :  { %v458_v11 = vadd.f32 %v457_v5, %v401_v56  ;;  %v375_v56 = vpop.f32.mrf.mxu2 }
  0xc4   :  { %v500_v18 = vpop.f32.mrf.mxu1  ;;  %v376_v14 = vadd.f32 %v375_v56, %v325_v54 }
  0xc5   :  { %v4953_v57 = vadd.f32 %v500_v18, %v458_v11 }
  0xc7   :  { %v529_v2 = vand.u32 2147483647, %v4953_v57  ;;  %v523_v50 = vmax.f32 %v4953_v57, 0.0 }
  0xc9   :  { %v535_v20 = vsub.f32 0.0, %v529_v2 }
  0xca   :  { %v461_v58 = vpop.f32.mrf.mxu0 }
  0xcb   :  { %v541_v24 = vmul.f32 1.442695, %v535_v20  ;;  %v462_v13 = vadd.f32 %v461_v58, %v407_v7 }
  0xcc   :  { %v504_v21 = vpop.f32.mrf.mxu1 }
  0xcd   :  { %4560 = vpow2.f32 %v541_v24  ;;  %v4966_v26 = vadd.f32 %v504_v21, %v462_v13  ;;  %v431_v24 = vadd.f32 %v430_v6, %v376_v14 }
  0xcf   :  { %v530_v59 = vand.u32 2147483647, %v4966_v26  ;;  %v524_v57 = vmax.f32 %v4966_v26, 0.0 }
  0xd1   :  { %v536_v28 = vsub.f32 0.0, %v530_v59 }
  0xd2   :  { %v465_v60 = vpop.f32.mrf.mxu0 }
  0xd3   :  { %v4561_v30 = vpop.eup %4560  ;;  %v543_v31 = vmul.f32 1.442695, %v536_v28  ;;  %v466_v32 = vadd.f32 %v465_v60, %v413_v3 }
  0xd4   :  { %v553_v33 = vadd.f32 1.0, %v4561_v30  ;;  %v508_v34 = vpop.f32.mrf.mxu1 }
  0xd5   :  { %4562 = vpow2.f32 %v543_v31  ;;  %v4976_v37 = vadd.f32 %v508_v34, %v466_v32 }
  0xd6   :  { %4564 = vlog2.f32 %v553_v33 }
  0xd7   :  { %v531_v27 = vand.u32 2147483647, %v4976_v37  ;;  %v525_v31 = vmax.f32 %v4976_v37, 0.0 }
  0xd9   :  { %v537_v40 = vsub.f32 0.0, %v531_v27 }
  0xda   :  { %v469_v35 = vpop.f32.mrf.mxu0 }
  0xdb   :  { %v4563_v41 = vpop.eup %4562  ;;  %v545_v43 = vmul.f32 1.442695, %v537_v40  ;;  %v470_v9 = vadd.f32 %v469_v35, %v419_v39 }
  0xdc   :  { %v4565_v45 = vpop.eup %4564  ;;  %v554_v49 = vadd.f32 1.0, %v4563_v41  ;;  %v512_v42 = vpop.f32.mrf.mxu1 }
  0xdd   :  { %v560_v51 = vmul.f32 0.6931472, %v4565_v45  ;;  %4566 = vpow2.f32 %v545_v43  ;;  %v4984_v52 = vadd.f32 %v512_v42, %v470_v9 }
  0xde   :  { %4568 = vlog2.f32 %v554_v49 }
  0xdf   :  { %v571_v16 = vadd.f32 %v560_v51, %v523_v50  ;;  %v532_v53 = vand.u32 2147483647, %v4984_v52  ;;  %v526_v46 = vmax.f32 %v4984_v52, 0.0 }
  0xe1   :  { %v4453_v62 = vadd.f32 -0.6931472, %v571_v16  ;;  %v538_v0 = vsub.f32 0.0, %v532_v53 }
  0xe2   :  { %v473_v4 = vpop.f32.mrf.mxu0 }
  0xe3   :  { %v4567_v36 = vpop.eup %4566  ;;  %v597_v1 = vsel %vm595_vm1, %v4453_v62, 0  ;;  %v547_v5 = vmul.f32 1.442695, %v538_v0  ;;  %v474_v10 = vadd.f32 %v473_v4, %v425_v55 }
  0xe4   :  { %v4569_v11 = vpop.eup %4568  ;;  %v555_v18 = vadd.f32 1.0, %v4567_v36  ;;  %v516_v19 = vpop.f32.mrf.mxu1  ;;  %v4989_v15 = vand.u32 4294901760, %v597_v1 }
  0xe5   :  { %v562_v44 = vmul.f32 0.6931472, %v4569_v11  ;;  %4570 = vpow2.f32 %v547_v5  ;;  %v4992_v2 = vadd.f32 %v516_v19, %v474_v10 }
  0xe6   :  { %4572 = vlog2.f32 %v555_v18  ;;  %744 = vmatmul.f32.vlgmr.msrb.gmra.mxu3 %v4989_v15  ;;  %v639_v7 = vsub.f32 %v597_v1, %v4989_v15 }
  0xe7   :  { %v572_v12 = vadd.f32 %v562_v44, %v524_v57  ;;  %v533_v20 = vand.u32 2147483647, %v4992_v2  ;;  %v527_v62 = vmax.f32 %v4992_v2, 0.0 }
  0xe8   :  { %802 = vmatmul.f32.vlgmr.msra.gmra.mxu0 %v639_v7  ;;  %v640_v58 = vand.u32 4294901760, %v639_v7 }
  0xe9   :  { %v4454_v13 = vadd.f32 -0.6931472, %v572_v12  ;;  %v539_v21 = vsub.f32 0.0, %v533_v20 }
  0xea   :  { %v477_v25 = vpop.f32.mrf.mxu0  ;;  %858 = vmatmul.f32.vlgmr.msra.gmra.mxu1 %v640_v58  ;;  %v641_v63 = vsub.f32 %v639_v7, %v640_v58 }
  0xeb   :  { %v4571_v22 = vpop.eup %4570  ;;  %v600_v26 = vsel %vm595_vm1, %v4454_v13, 0  ;;  %v549_v59 = vmul.f32 1.442695, %v539_v21  ;;  %v478_v3 = vadd.f32 %v477_v25, %v431_v24 }
  0xec   :  { %v4573_v8 = vpop.eup %4572  ;;  %v556_v28 = vadd.f32 1.0, %v4571_v22  ;;  %v520_v29 = vpop.f32.mrf.mxu1  ;;  %v642_v60 = vand.u32 4294901760, %v641_v63  ;;  %v4998_v30 = vand.u32 4294901760, %v600_v26 }
  0xed   :  { %v564_v32 = vmul.f32 0.6931472, %v4573_v8  ;;  %4574 = vpow2.f32 %v549_v59  ;;  %v521_v17 = vadd.f32 %v520_v29, %v478_v3  ;;  %v1068_v3 = vld [vmem:[%s5674_s5 + $0x10] sm:$0xff]  ;;  %v1067_v29 = vld [vmem:[%s5674_s5 + $0x8] sm:$0xff] }
  0xee   :  { %4576 = vlog2.f32 %v556_v28  ;;  %643 = vmatmul.f32.vlgmr.msrb.gmra.mxu2 %v642_v60  ;;  %748 = vmatmul.f32.gmra.mxu3 %v4998_v30  ;;  %v647_v33 = vsub.f32 %v600_v26, %v4998_v30  ;;  %v1069_v26 = vld [vmem:[%s5674_s5 + $0x18] sm:$0xff]  ;;  %v1103_v28 = vand.u32 4294901760, %v1068_v3 }
  0xef   :  { %v573_v34 = vadd.f32 %v564_v32, %v525_v31  ;;  %v534_v23 = vand.u32 2147483647, %v521_v17  ;;  %v528_v57 = vmax.f32 %v521_v17, 0.0  ;;  %v1101_v59 = vand.u32 4294901760, %v1069_v26  ;;  %v1066_v17 = vld [vmem:[%s5674_s5] sm:$0xff] }
  0xf0   :  { %807 = vmatmul.f32.gmra.mxu0 %v647_v33  ;;  %v648_v61 = vand.u32 4294901760, %v647_v33  ;;  %v1145_v31 = vsub.f32 %v1068_v3, %v1103_v28  ;;  %v1105_v32 = vand.u32 4294901760, %v1067_v29 }
  0xf1   :  { %v4455_v27 = vadd.f32 -0.6931472, %v573_v34  ;;  %v540_v38 = vsub.f32 0.0, %v534_v23  ;;  %1102 = vmatpush.msrb.mxu0 %v1101_v59  ;;  %v1139_v8 = vsub.f32 %v1069_v26, %v1101_v59  ;;  %1219 = vmatpush.msrb.mxu3 %v1101_v59 }
  0xf2   :  { %864 = vmatmul.f32.gmra.mxu1 %v648_v61  ;;  %v649_v39 = vsub.f32 %v647_v33, %v648_v61  ;;  %v57_v33 = vld [vmem:[%s5707_s1] sm:$0xff]  ;;  %v1146_v23 = vand.u32 4294901760, %v1145_v31  ;;  %v1151_v61 = vsub.f32 %v1067_v29, %v1105_v32 }
  0xf3   :  { %v4575_v40 = vpop.eup %4574  ;;  %v603_v37 = vsel %vm595_vm1, %v4455_v27, 0  ;;  %v551_v35 = vmul.f32 1.442695, %v540_v38  ;;  %v1140_v60 = vand.u32 4294901760, %v1139_v8  ;;  %1104 = vmatpush.msrb.mxu0 %v1103_v28  ;;  %1185 = vmatpush.msrb.mxu2 %v1139_v8  ;;  %v1107_v27 = vand.u32 4294901760, %v1066_v17 }
  0xf4   :  { %v4577_v41 = vpop.eup %4576  ;;  %v557_v43 = vadd.f32 1.0, %v4575_v40  ;;  %v650_v9 = vand.u32 4294901760, %v649_v39  ;;  %v5004_v45 = vand.u32 4294901760, %v603_v37  ;;  %1221 = vmatpush.msrb.mxu3 %v1103_v28  ;;  %v1084_v38 = vsel %vm1082_vm2, %v57_v33, 0 }
  0xf5   :  { %v566_v47 = vmul.f32 0.6931472, %v4577_v41  ;;  %4578 = vpow2.f32 %v551_v35  ;;  %v1141_v34 = vsub.f32 %v1139_v8, %v1140_v60  ;;  %1106 = vmatpush.msrb.mxu0 %v1105_v32  ;;  %1188 = vmatpush.msrb.mxu2 %v1145_v31  ;;  %v1147_v40 = vsub.f32 %v1145_v31, %v1146_v23  ;;  %v4550_v8 = vld [vmem:[%s5679_s10] ss:$0 sm:$0xff] }
  0xf6   :  { %4580 = vlog2.f32 %v557_v43  ;;  %651 = vmatmul.f32.gmra.mxu2 %v650_v9  ;;  %752 = vmatmul.f32.gmra.mxu3 %v5004_v45  ;;  %v655_v48 = vsub.f32 %v603_v37, %v5004_v45  ;;  %v1152_v37 = vand.u32 4294901760, %v1151_v61  ;;  %v1157_v35 = vsub.f32 %v1066_v17, %v1107_v27 }
  0xf7   :  { %v574_v49 = vadd.f32 %v566_v47, %v526_v46  ;;  %v1142_v39 = vand.u32 4294901760, %v1141_v34  ;;  %1108 = vmatpush.msrb.mxu0 %v1107_v27  ;;  %1191 = vmatpush.msrb.mxu2 %v1151_v61  ;;  %v1109_v41 = vand.u32 4294901760, %v1084_v38  ;;  %v1148_v43 = vand.u32 4294901760, %v1147_v40 }
  0xf8   :  { %812 = vmatmul.f32.gmra.mxu0 %v655_v48  ;;  %v656_v42 = vand.u32 4294901760, %v655_v48  ;;  %1223 = vmatpush.msrb.mxu3 %v1105_v32  ;;  %v1153_v9 = vsub.f32 %v1151_v61, %v1152_v37  ;;  %v1158_v46 = vand.u32 4294901760, %v1157_v35 }
  0xf9   :  { %v4456_v50 = vadd.f32 -0.6931472, %v574_v49  ;;  %1254 = vmatpush.msra.mxu0 %v1140_v60  ;;  %1143 = vmatpush.msrb.mxu1 %v1142_v39  ;;  %v1110_v47 = vsub.f32 %v1084_v38, %v1109_v41 }
  0xfa   :  { %870 = vmatmul.f32.gmra.mxu1 %v656_v42  ;;  %v657_v51 = vsub.f32 %v655_v48, %v656_v42  ;;  %1194 = vmatpush.msrb.mxu2 %v1157_v35  ;;  %v1159_v48 = vsub.f32 %v1157_v35, %v1158_v46  ;;  %v58_v42 = vld [vmem:[%s5707_s1 + $0x8] sm:$0xff] }
  0xfb   :  { %v4579_v16 = vpop.eup %4578  ;;  %v606_v53 = vsel %vm595_vm1, %v4456_v50, 0  ;;  %1225 = vmatpush.msrb.mxu3 %v1107_v27  ;;  %1258 = vmatpush.msra.mxu0 %v1146_v23  ;;  %v1111_v49 = vand.u32 4294901760, %v1110_v47 }
  0xfc   :  { %v4581_v54 = vpop.eup %4580  ;;  %v558_v55 = vadd.f32 1.0, %v4579_v16  ;;  %v658_v52 = vand.u32 4294901760, %v657_v51  ;;  %v5010_v56 = vand.u32 4294901760, %v606_v53  ;;  %1149 = vmatpush.msrb.mxu1 %v1148_v43  ;;  %v1160_v50 = vand.u32 4294901760, %v1159_v48 }
  0xfd   :  { %v568_v0 = vmul.f32 0.6931472, %v4581_v54  ;;  %1262 = vmatpush.msra.mxu0 %v1152_v37  ;;  %v1087_v51 = vsel %vm1082_vm2, %v58_v42, 0  ;;  %v1112_v16 = vsub.f32 %v1110_v47, %v1111_v49 }
  0xfe   :  { %4582 = vlog2.f32 %v558_v55  ;;  %659 = vmatmul.f32.gmra.mxu2 %v658_v52  ;;  %756 = vmatmul.f32.gmra.mxu3 %v5010_v56  ;;  %v663_v4 = vsub.f32 %v606_v53, %v5010_v56  ;;  %v1117_v53 = vand.u32 4294901760, %v1087_v51 }
  0xff   :  { %v575_v36 = vadd.f32 %v568_v0, %v527_v62  ;;  %1266 = vmatpush.msra.mxu0 %v1158_v46  ;;  %v1113_v54 = vand.u32 4294901760, %v1112_v16  ;;  %v67_v0 = vld [vmem:[%s5671_s2] sm:$0xff] }
 0x100   :  { %817 = vmatmul.f32.gmra.mxu0 %v663_v4  ;;  %v664_v1 = vand.u32 4294901760, %v663_v4  ;;  %v1118_v55 = vsub.f32 %v1087_v51, %v1117_v53 }
 0x101   :  { %v4457_v5 = vadd.f32 -0.6931472, %v575_v36  ;;  %v70_v36 = vld [vmem:[%s5671_s2 + $0x18] sm:$0xff] }
 0x102   :  { %876 = vmatmul.f32.gmra.mxu1 %v664_v1  ;;  %v665_v10 = vsub.f32 %v663_v4, %v664_v1  ;;  %v1119_v52 = vand.u32 4294901760, %v1118_v55  ;;  %v4666_v4 = vmov 0  }
 0x103   :  { %v609_v11 = vsel %vm595_vm1, %v4457_v5, 0  ;;  %4546 = vset.pattern.permute.xlu0 %v4666_v4  ;;  %4547 = vset.pattern.permute.xlu1 %v4666_v4 }
 0x104   :  { %v4583_v14 = vpop.eup %4582  ;;  %v666_v18 = vand.u32 4294901760, %v665_v10  ;;  %v5016_v19 = vand.u32 4294901760, %v609_v11  ;;  %v1120_v62 = vsub.f32 %v1118_v55, %v1119_v52  ;;  %74 = vperm.xlu0 %4546, %v67_v0   ;;  %4548 = vset.pattern.permute.xlu2 %v4666_v4 }
 0x105   :  { %v570_v44 = vmul.f32 0.6931472, %v4583_v14 }
 0x106   :  { %667 = vmatmul.f32.gmra.mxu2 %v666_v18  ;;  %760 = vmatmul.f32.gmra.mxu3 %v5016_v19  ;;  %v671_v2 = vsub.f32 %v609_v11, %v5016_v19  ;;  %v71_v18 = vld [vmem:[%s5671_s2 + $0x20] sm:$0xff] }
 0x107   :  { %v576_v6 = vadd.f32 %v570_v44, %v528_v57  ;;  %86 = vperm.xlu2 %4548, %v71_v18  }
 0x108   :  { %822 = vmatmul.f32.gmra.mxu0 %v671_v2  ;;  %v672_v7 = vand.u32 4294901760, %v671_v2 }
 0x109   :  { %v4458_v12 = vadd.f32 -0.6931472, %v576_v6 }
 0x10a   :  { %882 = vmatmul.f32.gmra.mxu1 %v672_v7  ;;  %v673_v20 = vsub.f32 %v671_v2, %v672_v7  ;;  %v72_v2 = vld [vmem:[%s5671_s2 + $0x28] sm:$0xff] }
 0x10b   :  { %v612_v58 = vsel %vm595_vm1, %v4458_v12, 0 }
 0x10c   :  { %v674_v24 = vand.u32 4294901760, %v673_v20  ;;  %v5021_v13 = vand.u32 4294901760, %v612_v58 }
 0x10e   :  { %675 = vmatmul.f32.gmra.mxu2 %v674_v24  ;;  %764 = vmatmul.f32.gmra.mxu3 %v5021_v13  ;;  %v679_v21 = vsub.f32 %v612_v58, %v5021_v13 }
 0x10f   :  { %89 = vperm.xlu2 %4548, %v72_v2  }
 0x110   :  { %827 = vmatmul.f32.gmra.mxu0 %v679_v21  ;;  %v680_v25 = vand.u32 4294901760, %v679_v21 }
 0x112   :  { %888 = vmatmul.f32.gmra.mxu1 %v680_v25  ;;  %v681_v63 = vsub.f32 %v679_v21, %v680_v25 }
 0x114   :  { %v682_v22 = vand.u32 4294901760, %v681_v63 }
 0x116   :  { %683 = vmatmul.f32.gmra.mxu2 %v682_v22  ;;  %982 = vmatmul.f32.vlgmr.msra.gmra.mxu3 %v4989_v15 }
 0x118   :  { %1114 = vmatmul.f32.vlgmr.msrb.gmra.mxu0 %v1113_v54 }
 0x11e   :  { %933 = vmatmul.f32.vlgmr.msra.gmra.mxu2 %v4989_v15  ;;  %986 = vmatmul.f32.gmra.mxu3 %v4998_v30  ;;  %v1154_v15 = vand.u32 4294901760, %v1153_v9 }
 0x120   :  { %1155 = vmatpush.msrb.mxu1 %v1154_v15 }
 0x122   :  { %1161 = vmatpush.msrb.mxu1 %v1160_v50 }
 0x123   :  { %1163 = vmatmul.f32.vlgmr.msrb.gmra.mxu1 %v1109_v41 }
 0x124   :  { %1289 = vmatpush.msra.mxu1 %v1101_v59 }
 0x126   :  { %937 = vmatmul.f32.gmra.mxu2 %v4998_v30  ;;  %990 = vmatmul.f32.gmra.mxu3 %v5004_v45  ;;  %v1121_v30 = vand.u32 4294901760, %v1120_v62 }
 0x127   :  { %1291 = vmatpush.msra.mxu1 %v1103_v28 }
 0x128   :  { %1122 = vmatmul.f32.gmra.mxu0 %v1121_v30 }
 0x129   :  { %1293 = vmatpush.msra.mxu1 %v1105_v32 }
 0x12b   :  { %1295 = vmatpush.msra.mxu1 %v1107_v27 }
 0x12c   :  { %1167 = vmatmul.f32.gmra.mxu1 %v1117_v53 }
 0x12e   :  { %941 = vmatmul.f32.gmra.mxu2 %v5004_v45  ;;  %994 = vmatmul.f32.gmra.mxu3 %v5010_v56  ;;  %v68_v45 = vld [vmem:[%s5671_s2 + $0x8] sm:$0xff] }
 0x12f   :  { %77 = vperm.xlu0 %4546, %v68_v45  }
 0x130   :  { %1268 = vmatmul.f32.vlgmr.msra.gmra.mxu0 %v1109_v41 }
 0x134   :  { %1297 = vmatmul.f32.vlgmr.msra.gmra.mxu1 %v1109_v41 }
 0x136   :  { %945 = vmatmul.f32.gmra.mxu2 %v5010_v56  ;;  %998 = vmatmul.f32.gmra.mxu3 %v5016_v19  ;;  %v69_v56 = vld [vmem:[%s5671_s2 + $0x10] sm:$0xff]  ;;  %s4668_s2 = smov 96  }
 0x137   :  { %80 = vperm.xlu1 %4547, %v69_v56  }
 0x138   :  { %1272 = vmatmul.f32.gmra.mxu0 %v1117_v53 }
 0x13c   :  { %1301 = vmatmul.f32.gmra.mxu1 %v1117_v53 }
 0x13e   :  { %949 = vmatmul.f32.gmra.mxu2 %v5016_v19  ;;  %1002 = vmatmul.f32.gmra.mxu3 %v5021_v13 }
 0x13f   :  { %83 = vperm.xlu1 %4547, %v70_v36  }
 0x146   :  { %953 = vmatmul.f32.gmra.mxu2 %v5021_v13  ;;  %1229 = vmatmul.f32.vlgmr.msrb.gmra.mxu3 %v1111_v49 }
 0x14e   :  { %1197 = vmatmul.f32.vlgmr.msrb.gmra.mxu2 %v1110_v47  ;;  %1235 = vmatmul.f32.gmra.mxu3 %v1119_v52 }
 0x156   :  { %1202 = vmatmul.f32.gmra.mxu2 %v1118_v55 }
 0x165   :  { %v803_v44 = vpop.f32.mrf.mxu0 }
 0x167   :  { %v5075_v6 = vpop.f32.mrf.mxu1 }
 0x169   :  { %v745_v1 = vpop.f32.mrf.mxu3 }
 0x16d   :  { %v808_v20 = vpop.f32.mrf.mxu0 }
 0x16f   :  { %v865_v58 = vpop.f32.mrf.mxu1 }
 0x171   :  { %v644_v5 = vpop.f32.mrf.mxu2  ;;  %v749_v10 = vpop.f32.mrf.mxu3 }
 0x172   :  { %v645_v48 = vadd.f32 %v4550_v8, %v644_v5 }
 0x174   :  { %v746_v62 = vadd.f32 %v745_v1, %v645_v48 }
 0x175   :  { %v813_v21 = vpop.f32.mrf.mxu0 }
 0x177   :  { %v871_v22 = vpop.f32.mrf.mxu1 }
 0x179   :  { %v652_v11 = vpop.f32.mrf.mxu2  ;;  %v753_v14 = vpop.f32.mrf.mxu3 }
 0x17a   :  { %v653_v33 = vadd.f32 %v4550_v8, %v652_v11  ;;  %v804_v11 = vadd.f32 %v803_v44, %v746_v62 }
 0x17c   :  { %v750_v27 = vadd.f32 %v749_v10, %v653_v33 }
 0x17d   :  { %v818_v26 = vpop.f32.mrf.mxu0 }
 0x17e   :  { %v809_v43 = vadd.f32 %v808_v20, %v750_v27 }
 0x17f   :  { %v877_v29 = vpop.f32.mrf.mxu1 }
 0x180   :  { %v866_v42 = vadd.f32 %v865_v58, %v809_v43  ;;  %v860_v58 = vadd.f32 %v5075_v6, %v804_v11 }
 0x181   :  { %v660_v19 = vpop.f32.mrf.mxu2  ;;  %v757_v57 = vpop.f32.mrf.mxu3 }
 0x182   :  { %v661_v28 = vadd.f32 %v4550_v8, %v660_v19 }
 0x184   :  { %v754_v60 = vadd.f32 %v753_v14, %v661_v28 }
 0x185   :  { %v823_v17 = vpop.f32.mrf.mxu0 }
 0x186   :  { %v814_v23 = vadd.f32 %v813_v21, %v754_v60 }
 0x187   :  { %v883_v61 = vpop.f32.mrf.mxu1 }
 0x188   :  { %v872_v39 = vadd.f32 %v871_v22, %v814_v23  ;;  %v75_v23 = vpop.permute.xlu0 %74 }
 0x189   :  { %v668_v7 = vpop.f32.mrf.mxu2  ;;  %v761_v12 = vpop.f32.mrf.mxu3 }
 0x18a   :  { %v669_v34 = vadd.f32 %v4550_v8, %v668_v7 }
 0x18c   :  { %v758_v38 = vadd.f32 %v757_v57, %v669_v34 }
 0x18d   :  { %v828_v47 = vpop.f32.mrf.mxu0 }
 0x18e   :  { %v819_v46 = vadd.f32 %v818_v26, %v758_v38 }
 0x18f   :  { %v889_v16 = vpop.f32.mrf.mxu1 }
 0x190   :  { %v878_v51 = vadd.f32 %v877_v29, %v819_v46 }
 0x191   :  { %v676_v24 = vpop.f32.mrf.mxu2  ;;  %v765_v13 = vpop.f32.mrf.mxu3 }
 0x192   :  { %v677_v41 = vadd.f32 %v4550_v8, %v676_v24 }
 0x194   :  { %v762_v49 = vadd.f32 %v761_v12, %v677_v41 }
 0x195   :  { %v1115_v56 = vpop.f32.mrf.mxu0 }
 0x196   :  { %v824_v4 = vadd.f32 %v823_v17, %v762_v49 }
 0x198   :  { %v884_v18 = vadd.f32 %v883_v61, %v824_v4 }
 0x199   :  { %v684_v25 = vpop.f32.mrf.mxu2  ;;  %v5077_v63 = vpop.f32.mrf.mxu3 }
 0x19a   :  { %v685_v30 = vadd.f32 %v4550_v8, %v684_v25  ;;  %v5691_v25 = vlaneseq }
 0x19c   :  { %v766_v10 = vadd.f32 %v765_v13, %v685_v30  ;;  %v5096_v60 = vand.u32 127, %v5691_v25 }
 0x19e   :  { %v829_v21 = vadd.f32 %v828_v47, %v766_v10  ;;  %vm91_vm3 = vcmp.eq.s32.totalorder %v5096_v60, %v75_v23  ;;  %v5689_v47 = vmov 0.0  }
 0x1a0   :  { %v1164_v57 = vpop.f32.mrf.mxu1  ;;  %v890_v28 = vadd.f32 %v889_v16, %v829_v21 }
 0x1a1   :  { %v934_v59 = vpop.f32.mrf.mxu2  ;;  %v987_v3 = vpop.f32.mrf.mxu3  ;;  %v1165_v41 = vadd.f32 %v1164_v57, %v1115_v56 }
 0x1a2   :  { %v935_v13 = vadd.f32 %v934_v59, %v860_v58 }
 0x1a4   :  { %v5099_v6 = vadd.f32 %v5077_v63, %v935_v13 }
 0x1a9   :  { %v938_v31 = vpop.f32.mrf.mxu2  ;;  %v991_v32 = vpop.f32.mrf.mxu3 }
 0x1aa   :  { %v939_v54 = vadd.f32 %v938_v31, %v866_v42  ;;  %v1168_v59 = vpop.f32.mrf.mxu1  ;;  %v81_v21 = vpop.permute.xlu1 %80 }
 0x1ab   :  { %vm93_vm5 = vcmp.eq.s32.totalorder %v5096_v60, %v81_v21 }
 0x1ac   :  { %v5087_v36 = vadd.f32 %v987_v3, %v939_v54  ;;  %v1123_v3 = vpop.f32.mrf.mxu0 }
 0x1ae   :  { %v1013_v1 = vand.u32 2147483647, %v5087_v36 }
 0x1b0   :  { %v1019_v44 = vsub.f32 0.0, %v1013_v1 }
 0x1b1   :  { %v942_v40 = vpop.f32.mrf.mxu2  ;;  %v995_v35 = vpop.f32.mrf.mxu3 }
 0x1b2   :  { %v943_v37 = vadd.f32 %v942_v40, %v872_v39  ;;  %v1012_v40 = vand.u32 2147483647, %v5099_v6  ;;  %v1298_v54 = vpop.f32.mrf.mxu1 }
 0x1b4   :  { %v5082_v9 = vadd.f32 %v991_v32, %v943_v37  ;;  %v1026_v32 = vmul.f32 1.442695, %v1019_v44  ;;  %v1269_v48 = vpop.f32.mrf.mxu0  ;;  %v1018_v42 = vsub.f32 0.0, %v1012_v40 }
 0x1b6   :  { %v1014_v15 = vand.u32 2147483647, %v5082_v9  ;;  %v1008_v27 = vmax.f32 %v5082_v9, 0.0  ;;  %v5110_v9 = vsel %vm91_vm3, 1.0, %v5689_v47  ;;  %v1024_v56 = vmul.f32 1.442695, %v1018_v42 }
 0x1b8   :  { %v1020_v50 = vsub.f32 0.0, %v1014_v15 }
 0x1b9   :  { %v946_v53 = vpop.f32.mrf.mxu2  ;;  %v999_v45 = vpop.f32.mrf.mxu3 }
 0x1ba   :  { %v1028_v55 = vmul.f32 1.442695, %v1020_v50  ;;  %v947_v52 = vadd.f32 %v946_v53, %v878_v51  ;;  %v1306_v53 = vsel %vm190_vm0, %v5110_v9, 0 }
 0x1bb   :  { %v5117_v11 = vsub.f32 %v1306_v53, %v1306_v53 }
 0x1bc   :  { %4584 = vpow2.f32 %v1028_v55  ;;  %v5085_v0 = vadd.f32 %v995_v35, %v947_v52 }
 0x1bd   :  { %v5128_v13 = vand.u32 4294901760, %v5117_v11 }
 0x1be   :  { %v1015_v5 = vand.u32 2147483647, %v5085_v0  ;;  %v1009_v62 = vmax.f32 %v5085_v0, 0.0 }
 0x1c0   :  { %v1021_v14 = vsub.f32 0.0, %v1015_v5 }
 0x1c1   :  { %v950_v19 = vpop.f32.mrf.mxu2  ;;  %v1003_v26 = vpop.f32.mrf.mxu3 }
 0x1c2   :  { %v4585_v2 = vpop.eup %4584  ;;  %v1030_v7 = vmul.f32 1.442695, %v1021_v14  ;;  %v951_v12 = vadd.f32 %v950_v19, %v884_v18  ;;  %v1169_v18 = vadd.f32 %v1168_v59, %v1123_v3 }
 0x1c3   :  { %v1038_v20 = vadd.f32 1.0, %v4585_v2 }
 0x1c4   :  { %4586 = vpow2.f32 %v1030_v7  ;;  %v5092_v24 = vadd.f32 %v999_v45, %v951_v12  ;;  %v78_v45 = vpop.permute.xlu0 %77 }
 0x1c5   :  { %4588 = vlog2.f32 %v1038_v20  ;;  %vm92_vm4 = vcmp.eq.s32.totalorder %v5096_v60, %v78_v45  ;;  %v1273_v20 = vpop.f32.mrf.mxu0  ;;  %v87_v45 = vpop.permute.xlu2 %86 }
 0x1c6   :  { %v1016_v22 = vand.u32 2147483647, %v5092_v24  ;;  %v5125_v58 = vsel %vm92_vm4, 1.0, %v5689_v47  ;;  %vm95_vm7 = vcmp.eq.s32.totalorder %v5096_v60, %v87_v45 }
 0x1c8   :  { %v1022_v8 = vsub.f32 0.0, %v1016_v22  ;;  %v1010_v22 = vmax.f32 %v5092_v24, 0.0 }
 0x1c9   :  { %v954_v29 = vpop.f32.mrf.mxu2  ;;  %v1230_v35 = vpop.f32.mrf.mxu3 }
 0x1ca   :  { %v4587_v31 = vpop.eup %4586  ;;  %v1032_v17 = vmul.f32 1.442695, %v1022_v8  ;;  %v955_v33 = vadd.f32 %v954_v29, %v890_v28  ;;  %v1302_v28 = vpop.f32.mrf.mxu1 }
 0x1cb   :  { %v4589_v34 = vpop.eup %4588  ;;  %v1039_v61 = vadd.f32 1.0, %v4587_v31 }
 0x1cc   :  { %4590 = vpow2.f32 %v1032_v17  ;;  %v5102_v38 = vadd.f32 %v1003_v26, %v955_v33  ;;  %v1047_v39 = vmul.f32 0.6931472, %v4589_v34  ;;  %v1344_v17 = vsub.f32 %v5117_v11, %v5128_v13 }
 0x1cd   :  { %4592 = vlog2.f32 %v1039_v61  ;;  %v5142_v61 = vsel %vm93_vm5, 1.0, %v5689_v47 }
 0x1ce   :  { %4594 = vpow2.f32 %v1026_v32  ;;  %v1017_v63 = vand.u32 2147483647, %v5102_v38  ;;  %v1056_v37 = vadd.f32 %v1047_v39, %v1008_v27  ;;  %v1309_v32 = vsel %vm190_vm0, %v5125_v58, 0 }
 0x1cf   :  { %v5144_v27 = vsub.f32 %v1309_v32, %v1309_v32 }
 0x1d0   :  { %v1023_v43 = vsub.f32 0.0, %v1017_v63  ;;  %v5107_v46 = vadd.f32 -0.6931472, %v1056_v37  ;;  %v1011_v63 = vmax.f32 %v5102_v38, 0.0  ;;  %v5149_v37 = vand.u32 4294901760, %v1344_v17 }
 0x1d1   :  { %v1198_v15 = vpop.f32.mrf.mxu2  ;;  %v1236_v1 = vpop.f32.mrf.mxu3  ;;  %v5154_v42 = vand.u32 4294901760, %v5144_v27 }
 0x1d2   :  { %v4591_v49 = vpop.eup %4590  ;;  %v1034_v50 = vmul.f32 1.442695, %v1023_v43  ;;  %v1199_v51 = vadd.f32 %v1198_v15, %v1165_v41  ;;  %2924 = vrot.lane.b32.xlu2 %v5107_v46, %s4668_s2 }
 0x1d3   :  { %v4593_v16 = vpop.eup %4592  ;;  %v1040_v55 = vadd.f32 1.0, %v4591_v49  ;;  %v84_v49 = vpop.permute.xlu1 %83 }
 0x1d4   :  { %v4595_v52 = vpop.eup %4594  ;;  %4596 = vpow2.f32 %v1034_v50  ;;  %v1231_v30 = vadd.f32 %v1230_v35, %v1199_v51  ;;  %v1049_v4 = vmul.f32 0.6931472, %v4593_v16  ;;  %vm94_vm6 = vcmp.eq.s32.totalorder %v5096_v60, %v84_v49 }
 0x1d5   :  { %4598 = vlog2.f32 %v1040_v55  ;;  %v1037_v14 = vadd.f32 1.0, %v4595_v52  ;;  %v1352_v52 = vsub.f32 %v5144_v27, %v5154_v42 }
 0x1d6   :  { %v1270_v5 = vadd.f32 %v1269_v48, %v1231_v30  ;;  %v1057_v10 = vadd.f32 %v1049_v4, %v1009_v62  ;;  %4600 = vpow2.f32 %v1024_v56  ;;  %v1312_v48 = vsel %vm190_vm0, %v5142_v61, 0 }
 0x1d7   :  { %4602 = vlog2.f32 %v1037_v14  ;;  %v5159_v16 = vsub.f32 %v1312_v48, %v1312_v48  ;;  %v1007_v62 = vmax.f32 %v5087_v36, 0.0  ;;  %v5172_v4 = vsel %vm94_vm6, 1.0, %v5689_v47 }
 0x1d8   :  { %v1299_v19 = vadd.f32 %v1298_v54, %v1270_v5  ;;  %v5119_v57 = vadd.f32 -0.6931472, %v1057_v10  ;;  %5708 = vst [vmem:[#allocation5_spill] sm:$0xff] %v5172_v4  ;;  %v1315_v36 = vsel %vm190_vm0, %v5172_v4, 0 }
 0x1d9   :  { %v1203_v2 = vpop.f32.mrf.mxu2  ;;  %v5175_v56 = vand.u32 4294901760, %v5159_v16 }
 0x1da   :  { %v4597_v0 = vpop.eup %4596  ;;  %v1204_v7 = vadd.f32 %v1203_v2, %v1169_v18  ;;  %2926 = vrot.lane.b32.xlu2 %v5119_v57, %s4668_s2  ;;  %v5131_v26 = vand.u32 4294901760, %v1299_v19  ;;  %v5177_v18 = vand.u32 4294901760, %v1352_v52 }
 0x1db   :  { %v4599_v12 = vpop.eup %4598  ;;  %v1041_v44 = vadd.f32 1.0, %v4597_v0  ;;  %v5192_v0 = vsel %vm95_vm7, 1.0, %v5689_v47  ;;  %vm164_vm7 = vcmask 123904  }
 0x1dc   :  { %v1237_v3 = vadd.f32 %v1236_v1, %v1204_v7  ;;  %v1051_v8 = vmul.f32 0.6931472, %v4599_v12  ;;  %v4601_v33 = vpop.eup %4600  ;;  %v1411_v34 = vsub.f32 %v1299_v19, %v5131_v26  ;;  %v1360_v19 = vsub.f32 %v5159_v16, %v5175_v56  ;;  %5709 = vst [vmem:[#allocation6_spill] sm:$0xff] %v5192_v0 }
 0x1dd   :  { %4604 = vlog2.f32 %v1041_v44  ;;  %v4603_v23 = vpop.eup %4602  ;;  %v1036_v35 = vadd.f32 1.0, %v4601_v33  ;;  %v5194_v7 = vsub.f32 %v1315_v36, %v1315_v36  ;;  %v1006_v12 = vmax.f32 %v5099_v6, 0.0 }
 0x1de   :  { %v1274_v29 = vadd.f32 %v1273_v20, %v1237_v3  ;;  %v1058_v31 = vadd.f32 %v1051_v8, %v1010_v22  ;;  %v1412_v15 = vand.u32 4294901760, %v1411_v34  ;;  %v1045_v51 = vmul.f32 0.6931472, %v4603_v23  ;;  %v90_v22 = vpop.permute.xlu2 %89 }
 0x1df   :  { %4606 = vlog2.f32 %v1036_v35  ;;  %v5200_v20 = vand.u32 4294901760, %v1360_v19  ;;  %v1318_v44 = vsel %vm190_vm0, %v5192_v0, 0  ;;  %v5205_v3 = vand.u32 4294901760, %v5194_v7 }
 0x1e0   :  { %v1303_v24 = vadd.f32 %v1302_v28, %v1274_v29  ;;  %v5139_v59 = vadd.f32 -0.6931472, %v1058_v31  ;;  %v1413_v55 = vsub.f32 %v1411_v34, %v1412_v15  ;;  %v1055_v10 = vadd.f32 %v1045_v51, %v1007_v62 }
 0x1e1   :  { %v5210_v6 = vsub.f32 %v1318_v44, %v1318_v44  ;;  %vm96_vm8 = vcmp.eq.s32.totalorder %v5096_v60, %v90_v22  ;;  %v1368_v8 = vsub.f32 %v5194_v7, %v5205_v3 }
 0x1e2   :  { %v1337_v39 = vand.u32 4294901760, %v1303_v24  ;;  %2928 = vrot.lane.b32.xlu2 %v5139_v59, %s4668_s2  ;;  %v1414_v5 = vand.u32 4294901760, %v1413_v55  ;;  %v5188_v2 = vadd.f32 -0.6931472, %v1055_v10  ;;  %v5222_v28 = vsel %vm96_vm8, 1.0, %v5689_v47 }
 0x1e3   :  { %v4605_v40 = vpop.eup %4604  ;;  %5710 = vst [vmem:[#allocation7_spill] sm:$0xff] %v5210_v6  ;;  %v5225_v29 = vand.u32 4294901760, %v5210_v6  ;;  %v5227_v31 = vand.u32 4294901760, %v1368_v8  ;;  %v1321_v32 = vsel %vm190_vm0, %v5222_v28, 0 }
 0x1e4   :  { %v1405_v41 = vsub.f32 %v1303_v24, %v1337_v39  ;;  %1338 = vmatpush.msra.mxu2 %v1337_v39  ;;  %1507 = vmatpush.msrb.mxu1 %v1337_v39  ;;  %v1053_v43 = vmul.f32 0.6931472, %v4605_v40  ;;  %5711 = vst [vmem:[#allocation8_spill] sm:$0xff] %v5222_v28  ;;  %v5238_v17 = vsub.f32 %v1321_v32, %v1321_v32 }
 0x1e5   :  { %v4607_v14 = vpop.eup %4606  ;;  %5712 = vst [vmem:[#allocation9_spill] sm:$0xff] %v5225_v29  ;;  %v1376_v60 = vsub.f32 %v5210_v6, %v5225_v29 }
 0x1e6   :  { %1340 = vmatpush.msra.mxu2 %v5131_v26  ;;  %1457 = vmatpush.msrb.mxu0 %v1405_v41  ;;  %v1406_v50 = vand.u32 4294901760, %v1405_v41  ;;  %v1059_v38 = vadd.f32 %v1053_v43, %v1011_v63  ;;  %v1043_v1 = vmul.f32 0.6931472, %v4607_v14  ;;  %5713 = vst [vmem:[#allocation10_spill] sm:$0xff] %v5238_v17 }
 0x1e7   :  { %1509 = vmatpush.msrb.mxu1 %v5131_v26  ;;  %1346 = vmatmul.f32.vlgmr.msra.gmra.mxu2 %v5149_v37  ;;  %v5240_v33 = vand.u32 4294901760, %v1376_v60 }
 0x1e8   :  { %1513 = vmatmul.f32.vlgmr.msrb.gmra.mxu1 %v5128_v13  ;;  %1460 = vmatpush.msrb.mxu0 %v1411_v34  ;;  %v5162_v53 = vadd.f32 -0.6931472, %v1059_v38  ;;  %v1407_v54 = vsub.f32 %v1405_v41, %v1406_v50  ;;  %v1054_v21 = vadd.f32 %v1043_v1, %v1006_v12  ;;  %v5243_v34 = vand.u32 4294901760, %v5238_v17 }
 0x1e9   :  { %1564 = vmatpush.msrb.mxu2 %v1406_v50  ;;  %1463 = vmatmul.f32.vlgmr.msrb.gmra.mxu0 %v5117_v11  ;;  %5714 = vst [vmem:[#allocation11_spill] sm:$0xff] %v5240_v33 }
 0x1ea   :  { %2930 = vrot.lane.b32.xlu2 %v5162_v53, %s4668_s2  ;;  %v1408_v30 = vand.u32 4294901760, %v1407_v54  ;;  %5715 = vst [vmem:[#allocation12_spill] sm:$0xff] %v5243_v34  ;;  %v1384_v24 = vsub.f32 %v5238_v17, %v5243_v34 }
 0x1eb   :  { %1568 = vmatpush.msrb.mxu2 %v1412_v15 }
 0x1ec   :  { %1409 = vmatpush.msra.mxu3 %v1408_v30  ;;  %v5252_v23 = vand.u32 4294901760, %v1384_v24 }
 0x1ee   :  { %1415 = vmatpush.msra.mxu3 %v1414_v5  ;;  %5716 = vst [vmem:[#allocation13_spill] sm:$0xff] %v5252_v23 }
 0x1ef   :  { %1354 = vmatmul.f32.gmra.mxu2 %v5177_v18  ;;  %4473 = vmatmul.msk.f32.vlgmr.msra.gmra.mxu3 %vm190_vm0, %v5110_v9 }
 0x1f0   :  { %1519 = vmatmul.f32.gmra.mxu1 %v5154_v42  ;;  %1609 = vmatpush.msrb.mxu3 %v1337_v39 }
 0x1f1   :  { %1468 = vmatmul.f32.gmra.mxu0 %v5144_v27 }
 0x1f2   :  { %1611 = vmatpush.msrb.mxu3 %v5131_v26  ;;  %2922 = vrot.lane.b32.xlu2 %v5188_v2, %s4668_s2  ;;  %v5213_v26 = vadd.f32 -0.6931472, %v1054_v21 }
 0x1f7   :  { %1362 = vmatmul.f32.gmra.mxu2 %v5200_v20  ;;  %4474 = vmatmul.msk.f32.gmra.mxu3 %vm190_vm0, %v5125_v58 }
 0x1f8   :  { %1525 = vmatmul.f32.gmra.mxu1 %v5175_v56 }
 0x1f9   :  { %1473 = vmatmul.f32.gmra.mxu0 %v5159_v16 }
 0x1fa   :  { %2920 = vrot.lane.b32.xlu2 %v5213_v26, %s4668_s2 }
 0x1ff   :  { %1370 = vmatmul.f32.gmra.mxu2 %v5227_v31  ;;  %4475 = vmatmul.msk.f32.gmra.mxu3 %vm190_vm0, %v5142_v61 }
 0x200   :  { %1531 = vmatmul.f32.gmra.mxu1 %v5205_v3 }
 0x201   :  { %1478 = vmatmul.f32.gmra.mxu0 %v5194_v7 }
 0x207   :  { %1378 = vmatmul.f32.gmra.mxu2 %v5240_v33  ;;  %4476 = vmatmul.msk.f32.gmra.mxu3 %vm190_vm0, %v5172_v4 }
 0x208   :  { %1537 = vmatmul.f32.gmra.mxu1 %v5225_v29  ;;  %v5717_v29 = vlaneseq }
 0x209   :  { %1483 = vmatmul.f32.gmra.mxu0 %v5210_v6  ;;  %v4551_v6 = vld [vmem:[%s5672_s3] ss:$0 sm:$0xff] }
 0x20f   :  { %1386 = vmatmul.f32.gmra.mxu2 %v5252_v23  ;;  %4477 = vmatmul.msk.f32.gmra.mxu3 %vm190_vm0, %v5192_v0 }
 0x210   :  { %1543 = vmatmul.f32.gmra.mxu1 %v5243_v34 }
 0x211   :  { %1488 = vmatmul.f32.gmra.mxu0 %v5238_v17 }
 0x217   :  { %4478 = vmatmul.msk.f32.gmra.mxu3 %vm190_vm0, %v5222_v28  ;;  %4479 = vmatmul.msk.f32.vlgmr.msrb.gmra.mxu2 %vm190_vm0, %v5110_v9 }
 0x21f   :  { %4480 = vmatmul.msk.f32.gmra.mxu2 %vm190_vm0, %v5125_v58  ;;  %4485 = vmatmul.msk.f32.vlgmr.msrb.gmra.mxu3 %vm190_vm0, %v5110_v9 }
 0x227   :  { %4481 = vmatmul.msk.f32.gmra.mxu2 %vm190_vm0, %v5142_v61  ;;  %4486 = vmatmul.msk.f32.gmra.mxu3 %vm190_vm0, %v5125_v58 }
 0x22f   :  { %4482 = vmatmul.msk.f32.gmra.mxu2 %vm190_vm0, %v5172_v4  ;;  %4487 = vmatmul.msk.f32.gmra.mxu3 %vm190_vm0, %v5142_v61 }
 0x237   :  { %4483 = vmatmul.msk.f32.gmra.mxu2 %vm190_vm0, %v5192_v0  ;;  %4488 = vmatmul.msk.f32.gmra.mxu3 %vm190_vm0, %v5172_v4  ;;  %v5289_v4 = vshrl.u32 %v5717_v29, 7 }
 0x239   :  { %vm114_vm9 = vcmp.eq.s32.totalorder %v5289_v4, %v4551_v6 }
 0x23f   :  { %4484 = vmatmul.msk.f32.gmra.mxu2 %vm190_vm0, %v5222_v28  ;;  %4489 = vmatmul.msk.f32.gmra.mxu3 %vm190_vm0, %v5192_v0 }
 0x247   :  { %4490 = vmatmul.msk.f32.gmra.mxu3 %vm190_vm0, %v5222_v28 }
 0x265   :  { %v1514_v54 = vpop.f32.mrf.mxu1 }
 0x266   :  { %v1464_v50 = vpop.f32.mrf.mxu0 }
 0x26a   :  { %v1347_v39 = vpop.f32.mrf.mxu2 }
 0x26d   :  { %v1520_v30 = vpop.f32.mrf.mxu1 }
 0x26e   :  { %v1469_v55 = vpop.f32.mrf.mxu0 }
 0x272   :  { %v1355_v40 = vpop.f32.mrf.mxu2  ;;  %v1418_v63 = vpop.f32.mrf.mxu3 }
 0x273   :  { %v1419_v17 = vadd.f32 %v1418_v63, %v1347_v39 }
 0x275   :  { %v1526_v14 = vpop.f32.mrf.mxu1 }
 0x276   :  { %v1474_v10 = vpop.f32.mrf.mxu0 }
 0x27a   :  { %v1363_v35 = vpop.f32.mrf.mxu2  ;;  %v1422_v41 = vpop.f32.mrf.mxu3 }
 0x27b   :  { %v1423_v24 = vadd.f32 %v1422_v41, %v1355_v40 }
 0x27d   :  { %v1532_v12 = vpop.f32.mrf.mxu1  ;;  %v1470_v33 = vadd.f32 %v1469_v55, %v1423_v24 }
 0x27e   :  { %v1479_v1 = vpop.f32.mrf.mxu0 }
 0x27f   :  { %v1521_v63 = vadd.f32 %v1520_v30, %v1470_v33 }
 0x282   :  { %v1371_v43 = vpop.f32.mrf.mxu2  ;;  %v1426_v15 = vpop.f32.mrf.mxu3 }
 0x283   :  { %v1427_v60 = vadd.f32 %v1426_v15, %v1363_v35  ;;  %v1465_v35 = vadd.f32 %v1464_v50, %v1419_v17 }
 0x285   :  { %v1538_v34 = vpop.f32.mrf.mxu1  ;;  %v1475_v23 = vadd.f32 %v1474_v10, %v1427_v60 }
 0x286   :  { %v1484_v32 = vpop.f32.mrf.mxu0 }
 0x287   :  { %v1527_v40 = vadd.f32 %v1526_v14, %v1475_v23  ;;  %v111_v23 = vadd.s32 8, %v5289_v4 }
 0x289   :  { %vm115_vm11 = vcmp.eq.s32.totalorder %v111_v23, %v4551_v6 }
 0x28a   :  { %v1379_v48 = vpop.f32.mrf.mxu2  ;;  %v1430_v49 = vpop.f32.mrf.mxu3 }
 0x28b   :  { %v1431_v22 = vadd.f32 %v1430_v49, %v1371_v43 }
 0x28d   :  { %v1480_v25 = vadd.f32 %v1479_v1, %v1431_v22  ;;  %v1544_v17 = vpop.f32.mrf.mxu1 }
 0x28e   :  { %v1489_v39 = vpop.f32.mrf.mxu0 }
 0x292   :  { %v1387_v38 = vpop.f32.mrf.mxu2  ;;  %v1434_v51 = vpop.f32.mrf.mxu3 }
 0x293   :  { %v1435_v8 = vadd.f32 %v1434_v51, %v1379_v48  ;;  %v1533_v48 = vadd.f32 %v1532_v12, %v1480_v25  ;;  %v5718_v25 = vmov 0.0  }
 0x295   :  { %v1485_v28 = vadd.f32 %v1484_v32, %v1435_v8  ;;  %v1515_v32 = vadd.f32 %v1514_v54, %v1465_v35 }
 0x297   :  { %v1539_v49 = vadd.f32 %v1538_v34, %v1485_v28  ;;  %v5294_v28 = vsel %vm114_vm9, 1.0, %v5718_v25 }
 0x29a   :  { %v1438_v52 = vpop.f32.mrf.mxu3  ;;  %v1571_v62 = vpop.f32.mrf.mxu2 }
 0x29b   :  { %v1439_v43 = vadd.f32 %v1438_v52, %v1387_v38  ;;  %v1572_v34 = vadd.f32 %v1571_v62, %v1515_v32 }
 0x29d   :  { %v1490_v10 = vadd.f32 %v1489_v39, %v1439_v43  ;;  %v126_v43 = vsel %vm125_vm10, %v5294_v28, 0.0 }
 0x29e   :  { %127 = vadd.xlane.f32.xlu0 %v126_v43 }
 0x29f   :  { %v1545_v55 = vadd.f32 %v1544_v17, %v1490_v10 }
 0x2a2   :  { %v1575_v45 = vpop.f32.mrf.mxu2  ;;  %v1614_v5 = vpop.f32.mrf.mxu3 }
 0x2a3   :  { %v1576_v29 = vadd.f32 %v1575_v45, %v1521_v63 }
 0x2aa   :  { %v1579_v36 = vpop.f32.mrf.mxu2  ;;  %v1618_v19 = vpop.f32.mrf.mxu3 }
 0x2ab   :  { %v1580_v1 = vadd.f32 %v1579_v36, %v1527_v40  ;;  %v1619_v33 = vadd.f32 %v1618_v19, %v1576_v29 }
 0x2ad   :  { %v1638_v62 = vmul.f32 %v5188_v2, %v1619_v33 }
 0x2af   :  { %v5318_v6 = vand.u32 4294901760, %v1638_v62 }
 0x2b1   :  { %v1723_v40 = vsub.f32 %v1638_v62, %v5318_v6 }
 0x2b2   :  { %v1583_v21 = vpop.f32.mrf.mxu2  ;;  %v1622_v44 = vpop.f32.mrf.mxu3 }
 0x2b3   :  { %v1584_v41 = vadd.f32 %v1583_v21, %v1533_v48  ;;  %v1623_v60 = vadd.f32 %v1622_v44, %v1580_v1  ;;  %v5316_v21 = vsel %vm115_vm11, 1.0, %v5718_v25  ;;  %v1724_v29 = vand.u32 4294901760, %v1723_v40 }
 0x2b4   :  { %v1647_v35 = vsel %vm125_vm10, %v5316_v21, 0  ;;  %v129_v17 = vsel %vm125_vm10, %v5316_v21, 0.0 }
 0x2b5   :  { %v1639_v54 = vmul.f32 %v5107_v46, %v1623_v60  ;;  %v5345_v63 = vsub.f32 %v1647_v35, %v1647_v35  ;;  %130 = vadd.xlane.f32.xlu1 %v129_v17 }
 0x2ba   :  { %v1626_v47 = vpop.f32.mrf.mxu3  ;;  %v1587_v0 = vpop.f32.mrf.mxu2 }
 0x2bb   :  { %v1588_v15 = vadd.f32 %v1587_v0, %v1539_v49  ;;  %v1627_v22 = vadd.f32 %v1626_v47, %v1584_v41  ;;  %v1615_v47 = vadd.f32 %v1614_v5, %v1572_v34  ;;  %v5309_v5 = vand.u32 4294901760, %v1639_v54 }
 0x2bd   :  { %v1640_v50 = vmul.f32 %v5119_v57, %v1627_v22  ;;  %v1637_v19 = vmul.f32 %v5213_v26, %v1615_v47 }
 0x2bf   :  { %v5304_v14 = vand.u32 4294901760, %v1640_v50  ;;  %v5325_v26 = vand.u32 4294901760, %v1637_v19 }
 0x2c1   :  { %v5321_v2 = vsub.f32 %v1640_v50, %v5304_v14  ;;  %v1725_v50 = vsub.f32 %v1723_v40, %v1724_v29 }
 0x2c2   :  { %v1630_v51 = vpop.f32.mrf.mxu3  ;;  %v1591_v0 = vpop.f32.mrf.mxu2 }
 0x2c3   :  { %v1631_v8 = vadd.f32 %v1630_v51, %v1588_v15  ;;  %v1592_v52 = vadd.f32 %v1591_v0, %v1545_v55  ;;  %v1712_v15 = vand.u32 4294901760, %v5321_v2  ;;  %v1729_v51 = vsub.f32 %v1637_v19, %v5325_v26 }
 0x2c5   :  { %v1641_v38 = vmul.f32 %v5139_v59, %v1631_v8  ;;  %v1644_v59 = vsel %vm125_vm10, %v5294_v28, 0  ;;  %v1713_v32 = vsub.f32 %v5321_v2, %v1712_v15  ;;  %v1730_v23 = vand.u32 4294901760, %v1729_v51 }
 0x2c6   :  { %v5307_v57 = vsub.f32 %v1644_v59, %v1644_v59 }
 0x2c7   :  { %v5299_v30 = vand.u32 4294901760, %v1641_v38  ;;  %v1714_v33 = vand.u32 4294901760, %v1713_v32 }
 0x2c8   :  { %v5328_v24 = vand.u32 4294901760, %v5307_v57 }
 0x2c9   :  { %v5312_v46 = vsub.f32 %v1641_v38, %v5299_v30  ;;  %v5356_v38 = vand.u32 4294901760, %v5345_v63 }
 0x2ca   :  { %v1634_v45 = vpop.f32.mrf.mxu3  ;;  %v1674_v39 = vsub.f32 %v5307_v57, %v5328_v24 }
 0x2cb   :  { %v1635_v36 = vadd.f32 %v1634_v45, %v1592_v52  ;;  %v1706_v49 = vand.u32 4294901760, %v5312_v46  ;;  %v1682_v55 = vsub.f32 %v5345_v63, %v5356_v38  ;;  %v1726_v52 = vand.u32 4294901760, %v1725_v50 }
 0x2cc   :  { %v5353_v60 = vand.u32 4294901760, %v1674_v39 }
 0x2cd   :  { %v1642_v12 = vmul.f32 %v5162_v53, %v1635_v36  ;;  %v5333_v53 = vsub.f32 %v1639_v54, %v5309_v5  ;;  %v1707_v1 = vsub.f32 %v5312_v46, %v1706_v49  ;;  %v1731_v54 = vsub.f32 %v1729_v51, %v1730_v23  ;;  %v4467_v36 = vld [vmem:[%s5674_s5 + $0x30] sm:$0xff] }
 0x2ce   :  { %v5367_v59 = vand.u32 4294901760, %v1682_v55 }
 0x2cf   :  { %v5323_v44 = vand.u32 4294901760, %v1642_v12  ;;  %v1718_v22 = vand.u32 4294901760, %v5333_v53  ;;  %v1708_v34 = vand.u32 4294901760, %v1707_v1  ;;  %v1732_v45 = vand.u32 4294901760, %v1731_v54 }
 0x2d1   :  { %v1699_v48 = vsub.f32 %v1642_v12, %v5323_v44  ;;  %1660 = vmatpush.msra.mxu0 %v5323_v44  ;;  %v1719_v0 = vsub.f32 %v5333_v53, %v1718_v22 }
 0x2d3   :  { %1662 = vmatpush.msra.mxu0 %v5299_v30  ;;  %v1700_v41 = vand.u32 4294901760, %v1699_v48  ;;  %v1720_v47 = vand.u32 4294901760, %v1719_v0 }
 0x2d5   :  { %1664 = vmatpush.msra.mxu0 %v5304_v14  ;;  %v1701_v10 = vsub.f32 %v1699_v48, %v1700_v41 }
 0x2d7   :  { %1666 = vmatpush.msra.mxu0 %v5309_v5  ;;  %v1702_v8 = vand.u32 4294901760, %v1701_v10 }
 0x2d9   :  { %1668 = vmatpush.msra.mxu0 %v5318_v6  ;;  %1703 = vmatpush.msra.mxu1 %v1702_v8 }
 0x2db   :  { %1670 = vmatpush.msra.mxu0 %v5325_v26  ;;  %1709 = vmatpush.msra.mxu1 %v1708_v34 }
 0x2dc   :  { %1676 = vmatmul.f32.vlgmr.msra.gmra.mxu0 %v5353_v60 }
 0x2dd   :  { %1755 = vmatpush.msrb.mxu0 %v1699_v48  ;;  %1715 = vmatpush.msra.mxu1 %v1714_v33 }
 0x2df   :  { %1758 = vmatpush.msrb.mxu0 %v5312_v46  ;;  %1721 = vmatpush.msra.mxu1 %v1720_v47  ;;  %v4466_v46 = vld [vmem:[%s5674_s5 + $0x28] sm:$0xff] }
 0x2e1   :  { %1761 = vmatpush.msrb.mxu0 %v5321_v2  ;;  %1727 = vmatpush.msra.mxu1 %v1726_v52  ;;  %v1916_v2 = vand.u32 4294901760, %v4466_v46 }
 0x2e3   :  { %1764 = vmatpush.msrb.mxu0 %v5333_v53  ;;  %1733 = vmatpush.msra.mxu1 %v1732_v45  ;;  %v1962_v53 = vsub.f32 %v4466_v46, %v1916_v2 }
 0x2e4   :  { %1684 = vmatmul.f32.gmra.mxu0 %v5367_v59  ;;  %4491 = vmatmul.msk.f32.vlgmr.msra.gmra.mxu1 %vm125_vm10, %v5294_v28 }
 0x2e5   :  { %1767 = vmatpush.msrb.mxu0 %v1723_v40  ;;  %1793 = vmatpush.msrb.mxu1 %v5323_v44  ;;  %v1963_v39 = vand.u32 4294901760, %v1962_v53 }
 0x2e7   :  { %1770 = vmatpush.msrb.mxu0 %v1729_v51  ;;  %1795 = vmatpush.msrb.mxu1 %v5299_v30  ;;  %v1964_v1 = vsub.f32 %v1962_v53, %v1963_v39 }
 0x2e9   :  { %1830 = vmatpush.msra.mxu0 %v1700_v41  ;;  %1797 = vmatpush.msrb.mxu1 %v5304_v14  ;;  %v1965_v32 = vand.u32 4294901760, %v1964_v1 }
 0x2eb   :  { %1834 = vmatpush.msra.mxu0 %v1706_v49  ;;  %1799 = vmatpush.msrb.mxu1 %v5309_v5 }
 0x2ec   :  { %4492 = vmatmul.msk.f32.gmra.mxu1 %vm125_vm10, %v5316_v21  ;;  %1773 = vmatmul.f32.vlgmr.msrb.gmra.mxu0 %v5307_v57 }
 0x2ed   :  { %1838 = vmatpush.msra.mxu0 %v1712_v15  ;;  %1801 = vmatpush.msrb.mxu1 %v5318_v6 }
 0x2ef   :  { %1842 = vmatpush.msra.mxu0 %v1718_v22  ;;  %1803 = vmatpush.msrb.mxu1 %v5325_v26 }
 0x2f1   :  { %1846 = vmatpush.msra.mxu0 %v1724_v29  ;;  %1871 = vmatpush.msra.mxu1 %v5323_v44  ;;  %v4465_v44 = vld [vmem:[%s5674_s5 + $0x20] sm:$0xff] }
 0x2f2   :  { %v1918_v48 = vand.u32 4294901760, %v4465_v44 }
 0x2f3   :  { %1850 = vmatpush.msra.mxu0 %v1730_v23  ;;  %1873 = vmatpush.msra.mxu1 %v5299_v30  ;;  %v4468_v30 = vld [vmem:[%s5674_s5 + $0x38] sm:$0xff] }
 0x2f4   :  { %1778 = vmatmul.f32.gmra.mxu0 %v5345_v63  ;;  %1807 = vmatmul.f32.vlgmr.msrb.gmra.mxu1 %v5328_v24  ;;  %v1968_v51 = vsub.f32 %v4465_v44, %v1918_v48 }
 0x2f5   :  { %1875 = vmatpush.msra.mxu1 %v5304_v14  ;;  %v1912_v14 = vand.u32 4294901760, %v4468_v30 }
 0x2f6   :  { %v1969_v22 = vand.u32 4294901760, %v1968_v51 }
 0x2f7   :  { %1877 = vmatpush.msra.mxu1 %v5309_v5  ;;  %v1950_v19 = vsub.f32 %v4468_v30, %v1912_v14  ;;  %v1914_v5 = vand.u32 4294901760, %v4467_v36  ;;  %1913 = vmatpush.msra.mxu2 %v1912_v14 }
 0x2f8   :  { %v1970_v29 = vsub.f32 %v1968_v51, %v1969_v22 }
 0x2f9   :  { %1879 = vmatpush.msra.mxu1 %v5318_v6  ;;  %v1951_v12 = vand.u32 4294901760, %v1950_v19  ;;  %v1956_v6 = vsub.f32 %v4467_v36, %v1914_v5  ;;  %1996 = vmatpush.msrb.mxu0 %v1950_v19 }
 0x2fa   :  { %1915 = vmatpush.msra.mxu2 %v1914_v5  ;;  %v1971_v17 = vand.u32 4294901760, %v1970_v29 }
 0x2fb   :  { %1881 = vmatpush.msra.mxu1 %v5325_v26  ;;  %v1952_v26 = vsub.f32 %v1950_v19, %v1951_v12  ;;  %v1957_v43 = vand.u32 4294901760, %v1956_v6  ;;  %1999 = vmatpush.msrb.mxu0 %v1956_v6 }
 0x2fc   :  { %1813 = vmatmul.f32.gmra.mxu1 %v5356_v38  ;;  %4493 = vmatmul.msk.f32.vlgmr.msra.gmra.mxu0 %vm125_vm10, %v5294_v28 }
 0x2fd   :  { %2030 = vmatpush.msrb.mxu1 %v1912_v14  ;;  %1917 = vmatpush.msra.mxu2 %v1916_v2  ;;  %v1953_v41 = vand.u32 4294901760, %v1952_v26  ;;  %v1958_v15 = vsub.f32 %v1956_v6, %v1957_v43 }
 0x2fe   :  { %2002 = vmatpush.msrb.mxu0 %v1962_v53 }
 0x2ff   :  { %2032 = vmatpush.msrb.mxu1 %v1914_v5  ;;  %1919 = vmatpush.msra.mxu2 %v1918_v48  ;;  %v1959_v10 = vand.u32 4294901760, %v1958_v15 }
 0x300   :  { %1954 = vmatpush.msra.mxu3 %v1953_v41  ;;  %2005 = vmatpush.msrb.mxu0 %v1968_v51 }
 0x301   :  { %2034 = vmatpush.msrb.mxu1 %v1916_v2  ;;  %2065 = vmatpush.msrb.mxu2 %v1951_v12 }
 0x302   :  { %1960 = vmatpush.msra.mxu3 %v1959_v10 }
 0x303   :  { %2036 = vmatpush.msrb.mxu1 %v1918_v48  ;;  %2069 = vmatpush.msrb.mxu2 %v1957_v43 }
 0x304   :  { %4494 = vmatmul.msk.f32.gmra.mxu0 %vm125_vm10, %v5316_v21  ;;  %4495 = vmatmul.msk.f32.vlgmr.msra.gmra.mxu1 %vm125_vm10, %v5294_v28 }
 0x305   :  { %1966 = vmatpush.msra.mxu3 %v1965_v32  ;;  %2073 = vmatpush.msrb.mxu2 %v1963_v39 }
 0x307   :  { %1972 = vmatpush.msra.mxu3 %v1971_v17  ;;  %2077 = vmatpush.msrb.mxu2 %v1969_v22 }
 0x309   :  { %2100 = vmatpush.msrb.mxu3 %v1912_v14 }
 0x30b   :  { %2102 = vmatpush.msrb.mxu3 %v1914_v5 }
 0x30c   :  { %4496 = vmatmul.msk.f32.gmra.mxu1 %vm125_vm10, %v5316_v21 }
 0x30d   :  { %2104 = vmatpush.msrb.mxu3 %v1916_v2 }
 0x30f   :  { %2106 = vmatpush.msrb.mxu3 %v1918_v48 }
 0x311   :  { %v128_v49 = vpop.xlane.xlu0 %127 }
 0x312   :  { %v132_v8 = vmax.f32 %v128_v49, 1.0 }
 0x314   :  { %4608 = vrcp.f32 %v132_v8  ;;  %vm139_vm12 = vweird.f32 %v132_v8  ;;  %v145_v12 = vand.u32 2147483648, %v132_v8  ;;  %v143_v2 = vand.u32 2147483647, %v132_v8 }
 0x316   :  { %v146_v43 = vor.u32 1.1754944e-38, %v145_v12  ;;  %vm144_vm15 = vcmp.eq.f32.partialorder %v143_v2, 8.507059e+37 }
 0x31a   :  { %v4609_v50 = vpop.eup %4608 }
 0x31b   :  { %v135_v55 = vmul.f32 %v4609_v50, %v132_v8  ;;  %vm140_vm13 = vweird.f32 %v4609_v50 }
 0x31c   :  { %vm141_vm14 = vmor %vm139_vm12, %vm140_vm13 }
 0x31d   :  { %v136_v52 = vsub.f32 1.0, %v135_v55 }
 0x31f   :  { %v137_v36 = vmul.f32 %v4609_v50, %v136_v52 }
 0x321   :  { %v138_v44 = vadd.f32 %v4609_v50, %v137_v36 }
 0x323   :  { %v142_v48 = vsel %vm141_vm14, %v4609_v50, %v138_v44 }
 0x328   :  { %v131_v0 = vpop.xlane.xlu1 %130 }
 0x329   :  { %v133_v33 = vmax.f32 %v131_v0, 1.0 }
 0x32b   :  { %4610 = vrcp.f32 %v133_v33  ;;  %vm154_vm1 = vweird.f32 %v133_v33  ;;  %v158_v22 = vand.u32 2147483647, %v133_v33 }
 0x32d   :  { %vm159_vm5 = vcmp.eq.f32.partialorder %v158_v22, 8.507059e+37 }
 0x331   :  { %v4611_v45 = vpop.eup %4610 }
 0x332   :  { %v150_v30 = vmul.f32 %v4611_v45, %v133_v33  ;;  %vm155_vm3 = vweird.f32 %v4611_v45 }
 0x333   :  { %vm156_vm4 = vmor %vm154_vm1, %vm155_vm3 }
 0x334   :  { %v151_v5 = vsub.f32 1.0, %v150_v30 }
 0x336   :  { %v152_v49 = vmul.f32 %v4611_v45, %v151_v5  ;;  %v4552_v5 = vld [vmem:[%s5675_s6] ss:$0 sm:$0xff] }
 0x338   :  { %v153_v1 = vadd.f32 %v4611_v45, %v152_v49 }
 0x359   :  { %v5403_v62 = vpop.f32.mrf.mxu0 }
 0x361   :  { %v1685_v35 = vpop.f32.mrf.mxu0  ;;  %v1736_v40 = vpop.f32.mrf.mxu1 }
 0x362   :  { %v1737_v46 = vadd.f32 %v1736_v40, %v5403_v62  ;;  %v5415_v62 = vsel %vm144_vm15, %v146_v43, %v142_v48  ;;  %v160_v40 = vand.u32 2147483648, %v133_v33 }
 0x364   :  { %v161_v0 = vor.u32 1.1754944e-38, %v160_v40 }
 0x369   :  { %v1740_v34 = vpop.f32.mrf.mxu1  ;;  %v1774_v23 = vpop.f32.mrf.mxu0 }
 0x36a   :  { %v1775_v6 = vadd.f32 %v1774_v23, %v1737_v46  ;;  %v1741_v15 = vadd.f32 %v1740_v34, %v1685_v35  ;;  %v157_v35 = vsel %vm156_vm4, %v4611_v45, %v153_v1 }
 0x371   :  { %v1779_v47 = vpop.f32.mrf.mxu0  ;;  %v1808_v54 = vpop.f32.mrf.mxu1 }
 0x372   :  { %v1809_v26 = vadd.f32 %v1808_v54, %v1775_v6  ;;  %v1780_v51 = vadd.f32 %v1779_v47, %v1741_v15  ;;  %v5419_v47 = vsel %vm159_vm5, %v161_v0, %v157_v35 }
 0x379   :  { %v1814_v19 = vpop.f32.mrf.mxu1  ;;  %v1853_v14 = vpop.f32.mrf.mxu0 }
 0x37a   :  { %v1854_v53 = vadd.f32 %v1853_v14, %v1809_v26  ;;  %v1815_v32 = vadd.f32 %v1814_v19, %v1780_v51  ;;  %v4472_v26 = vld [vmem:[%s5674_s5 + $0x58] sm:$0xff] }
 0x37b   :  { %v2155_v43 = vand.u32 4294901760, %v4472_v26 }
 0x37d   :  { %v2193_v48 = vsub.f32 %v4472_v26, %v2155_v43  ;;  %2156 = vmatpush.msra.mxu0 %v2155_v43 }
 0x37f   :  { %v2194_v40 = vand.u32 4294901760, %v2193_v48 }
 0x381   :  { %v1884_v41 = vpop.f32.mrf.mxu1  ;;  %v1857_v8 = vpop.f32.mrf.mxu0 }
 0x382   :  { %v1885_v39 = vadd.f32 %v1884_v41, %v1854_v53  ;;  %v1858_v23 = vadd.f32 %v1857_v8, %v1815_v32  ;;  %v4471_v53 = vld [vmem:[%s5674_s5 + $0x50] sm:$0xff]  ;;  %v4469_v8 = vld [vmem:[%s5674_s5 + $0x40] sm:$0xff]  ;;  %v2195_v32 = vsub.f32 %v2193_v48, %v2194_v40 }
 0x383   :  { %v2157_v49 = vand.u32 4294901760, %v4471_v53 }
 0x384   :  { %v1891_v10 = vmul.f32 %v1885_v39, %v5415_v62  ;;  %v4470_v39 = vld [vmem:[%s5674_s5 + $0x48] sm:$0xff] }
 0x385   :  { %v2199_v51 = vsub.f32 %v4471_v53, %v2157_v49  ;;  %2158 = vmatpush.msra.mxu0 %v2157_v49 }
 0x386   :  { %v1895_v29 = vsel %vm1082_vm2, %v1891_v10, 0  ;;  %v2159_v10 = vand.u32 4294901760, %v4470_v39 }
 0x387   :  { %v1920_v17 = vand.u32 4294901760, %v1895_v29 }
 0x388   :  { %2160 = vmatpush.msra.mxu0 %v2159_v10 }
 0x389   :  { %v1921_v34 = vsub.f32 %v1895_v29, %v1920_v17  ;;  %v1888_v50 = vpop.f32.mrf.mxu1  ;;  %1974 = vmatmul.f32.vlgmr.msra.gmra.mxu3 %v1920_v17  ;;  %v2200_v29 = vand.u32 4294901760, %v2199_v51 }
 0x38a   :  { %v1889_v55 = vadd.f32 %v1888_v50, %v1858_v23  ;;  %2273 = vmatpush.msra.mxu3 %v2155_v43  ;;  %v2161_v23 = vand.u32 4294901760, %v4469_v8 }
 0x38b   :  { %v1922_v54 = vand.u32 4294901760, %v1921_v34  ;;  %2008 = vmatmul.f32.vlgmr.msrb.gmra.mxu0 %v1921_v34  ;;  %v2201_v50 = vsub.f32 %v2199_v51, %v2200_v29 }
 0x38c   :  { %v1892_v33 = vmul.f32 %v1889_v55, %v5419_v47  ;;  %2275 = vmatpush.msra.mxu3 %v2157_v49  ;;  %2162 = vmatpush.msra.mxu0 %v2161_v23 }
 0x38d   :  { %v1923_v52 = vsub.f32 %v1921_v34, %v1922_v54  ;;  %2040 = vmatmul.f32.vlgmr.msrb.gmra.mxu1 %v1922_v54  ;;  %v2196_v34 = vand.u32 4294901760, %v2195_v32 }
 0x38e   :  { %v1898_v30 = vsel %vm1082_vm2, %v1892_v33, 0  ;;  %2277 = vmatpush.msra.mxu3 %v2159_v10  ;;  %v2211_v33 = vsub.f32 %v4469_v8, %v2161_v23  ;;  %2308 = vmatpush.msrb.mxu0 %v2194_v40 }
 0x38f   :  { %v1924_v36 = vand.u32 4294901760, %v1923_v52  ;;  %v1928_v19 = vand.u32 4294901760, %v1898_v30  ;;  %2197 = vmatpush.msra.mxu1 %v2196_v34  ;;  %v2202_v52 = vand.u32 4294901760, %v2201_v50 }
 0x390   :  { %2279 = vmatpush.msra.mxu3 %v2161_v23  ;;  %2312 = vmatpush.msrb.mxu0 %v2200_v29 }
 0x391   :  { %1925 = vmatmul.f32.vlgmr.msra.gmra.mxu2 %v1924_v36  ;;  %1978 = vmatmul.f32.gmra.mxu3 %v1928_v19  ;;  %v1929_v45 = vsub.f32 %v1898_v30, %v1928_v19  ;;  %v2212_v36 = vand.u32 4294901760, %v2211_v33 }
 0x392   :  { %2239 = vmatpush.msra.mxu2 %v2193_v48  ;;  %2203 = vmatpush.msra.mxu1 %v2202_v52 }
 0x393   :  { %2013 = vmatmul.f32.gmra.mxu0 %v1929_v45  ;;  %v1930_v46 = vand.u32 4294901760, %v1929_v45 }
 0x394   :  { %2242 = vmatpush.msra.mxu2 %v2199_v51 }
 0x395   :  { %2046 = vmatmul.f32.gmra.mxu1 %v1930_v46  ;;  %v1931_v14 = vsub.f32 %v1929_v45, %v1930_v46 }
 0x397   :  { %v1932_v12 = vand.u32 4294901760, %v1931_v14 }
 0x399   :  { %1933 = vmatmul.f32.gmra.mxu2 %v1932_v12  ;;  %2108 = vmatmul.f32.vlgmr.msrb.gmra.mxu3 %v1920_v17 }
 0x3a1   :  { %2079 = vmatmul.f32.vlgmr.msrb.gmra.mxu2 %v1920_v17  ;;  %2112 = vmatmul.f32.gmra.mxu3 %v1928_v19  ;;  %v2205_v17 = vsub.f32 %v4470_v39, %v2159_v10 }
 0x3a3   :  { %v2206_v55 = vand.u32 4294901760, %v2205_v17  ;;  %2245 = vmatpush.msra.mxu2 %v2205_v17 }
 0x3a5   :  { %v2207_v30 = vsub.f32 %v2205_v17, %v2206_v55  ;;  %2248 = vmatpush.msra.mxu2 %v2211_v33  ;;  %2316 = vmatpush.msrb.mxu0 %v2206_v55 }
 0x3a7   :  { %v2208_v46 = vand.u32 4294901760, %v2207_v30  ;;  %2320 = vmatpush.msrb.mxu0 %v2212_v36 }
 0x3a9   :  { %2083 = vmatmul.f32.gmra.mxu2 %v1928_v19  ;;  %2209 = vmatpush.msra.mxu1 %v2208_v46 }
 0x408   :  { %v2009_v1 = vpop.f32.mrf.mxu0 }
 0x40a   :  { %v2041_v54 = vpop.f32.mrf.mxu1 }
 0x40c   :  { %v1975_v6 = vpop.f32.mrf.mxu3 }
 0x414   :  { %v1926_v44 = vpop.f32.mrf.mxu2  ;;  %v1979_v15 = vpop.f32.mrf.mxu3 }
 0x415   :  { %v1927_v2 = vadd.f32 %v4552_v5, %v1926_v44  ;;  %v2014_v44 = vpop.f32.mrf.mxu0 }
 0x417   :  { %v1976_v41 = vadd.f32 %v1975_v6, %v1927_v2  ;;  %v2213_v6 = vsub.f32 %v2211_v33, %v2212_v36 }
 0x419   :  { %v2010_v0 = vadd.f32 %v2009_v1, %v1976_v41  ;;  %v2214_v2 = vand.u32 4294901760, %v2213_v6  ;;  %v2047_v41 = vpop.f32.mrf.mxu1 }
 0x41b   :  { %v2042_v45 = vadd.f32 %v2041_v54, %v2010_v0  ;;  %2215 = vmatpush.msra.mxu1 %v2214_v2 }
 0x41c   :  { %v1934_v22 = vpop.f32.mrf.mxu2  ;;  %v2109_v14 = vpop.f32.mrf.mxu3 }
 0x41d   :  { %v1935_v35 = vadd.f32 %v4552_v5, %v1934_v22  ;;  %2343 = vmatpush.msrb.mxu1 %v2155_v43 }
 0x41f   :  { %v1980_v19 = vadd.f32 %v1979_v15, %v1935_v35  ;;  %2345 = vmatpush.msrb.mxu1 %v2157_v49 }
 0x421   :  { %v2015_v53 = vadd.f32 %v2014_v44, %v1980_v19  ;;  %2347 = vmatpush.msrb.mxu1 %v2159_v10 }
 0x423   :  { %v2048_v39 = vadd.f32 %v2047_v41, %v2015_v53  ;;  %2349 = vmatpush.msrb.mxu1 %v2161_v23  ;;  %v4502_v41 = vld [vmem:[%s5674_s5 + $0x78] sm:$0xff] }
 0x424   :  { %v2080_v12 = vpop.f32.mrf.mxu2  ;;  %v2113_v22 = vpop.f32.mrf.mxu3 }
 0x425   :  { %v2081_v5 = vadd.f32 %v2080_v12, %v2042_v45 }
 0x427   :  { %v2110_v26 = vadd.f32 %v2109_v14, %v2081_v5 }
 0x429   :  { %v2118_v48 = vand.u32 2147483647, %v2110_v26  ;;  %v2116_v55 = vmax.f32 %v2110_v26, 0.0 }
 0x42b   :  { %v2120_v15 = vsub.f32 0.0, %v2118_v48 }
 0x42c   :  { %v2084_v40 = vpop.f32.mrf.mxu2 }
 0x42d   :  { %v2122_v51 = vmul.f32 1.442695, %v2120_v15  ;;  %v2085_v1 = vadd.f32 %v2084_v40, %v2048_v39  ;;  %v2396_v15 = vand.u32 4294901760, %v4502_v41  ;;  %v4501_v39 = vld [vmem:[%s5674_s5 + $0x70] sm:$0xff] }
 0x42f   :  { %4612 = vpow2.f32 %v2122_v51  ;;  %v2114_v8 = vadd.f32 %v2113_v22, %v2085_v1  ;;  %v2434_v40 = vsub.f32 %v4502_v41, %v2396_v15  ;;  %v2398_v51 = vand.u32 4294901760, %v4501_v39  ;;  %2397 = vmatpush.msrb.mxu2 %v2396_v15  ;;  %v4500_v1 = vld [vmem:[%s5674_s5 + $0x68] sm:$0xff] }
 0x431   :  { %v2119_v32 = vand.u32 2147483647, %v2114_v8  ;;  %v2117_v23 = vmax.f32 %v2114_v8, 0.0  ;;  %v2435_v22 = vand.u32 4294901760, %v2434_v40  ;;  %v2440_v8 = vsub.f32 %v4501_v39, %v2398_v51  ;;  %2399 = vmatpush.msrb.mxu2 %v2398_v51 }
 0x433   :  { %v2121_v29 = vsub.f32 0.0, %v2119_v32  ;;  %v2400_v32 = vand.u32 4294901760, %v4500_v1 }
 0x435   :  { %v4613_v17 = vpop.eup %4612  ;;  %v2124_v0 = vmul.f32 1.442695, %v2121_v29  ;;  %v4499_v29 = vld [vmem:[%s5674_s5 + $0x60] sm:$0xff]  ;;  %2401 = vmatpush.msrb.mxu2 %v2400_v32 }
 0x436   :  { %v2126_v35 = vadd.f32 1.0, %v4613_v17  ;;  %v2436_v17 = vsub.f32 %v2434_v40, %v2435_v22 }
 0x437   :  { %4614 = vpow2.f32 %v2124_v0  ;;  %v2441_v0 = vand.u32 4294901760, %v2440_v8 }
 0x438   :  { %4616 = vlog2.f32 %v2126_v35  ;;  %v2446_v35 = vsub.f32 %v4500_v1, %v2400_v32 }
 0x43d   :  { %v4615_v43 = vpop.eup %4614 }
 0x43e   :  { %v4617_v34 = vpop.eup %4616  ;;  %v2127_v50 = vadd.f32 1.0, %v4615_v43  ;;  %v2402_v43 = vand.u32 4294901760, %v4499_v29 }
 0x43f   :  { %v2129_v49 = vmul.f32 0.6931472, %v4617_v34  ;;  %v2437_v34 = vand.u32 4294901760, %v2436_v17 }
 0x440   :  { %4618 = vlog2.f32 %v2127_v50  ;;  %v2442_v50 = vsub.f32 %v2440_v8, %v2441_v0  ;;  %2403 = vmatpush.msrb.mxu2 %v2402_v43 }
 0x441   :  { %v2132_v54 = vadd.f32 %v2129_v49, %v2116_v55  ;;  %v2447_v55 = vand.u32 4294901760, %v2446_v35  ;;  %v2452_v49 = vsub.f32 %v4499_v29, %v2402_v43  ;;  %2438 = vmatpush.msrb.mxu3 %v2437_v34 }
 0x443   :  { %v4497_v33 = vadd.f32 -0.6931472, %v2132_v54  ;;  %v2443_v54 = vand.u32 4294901760, %v2442_v50 }
 0x445   :  { %v2138_v10 = vsel %vm1082_vm2, %v4497_v33, 0  ;;  %v2448_v33 = vsub.f32 %v2446_v35, %v2447_v55  ;;  %2444 = vmatpush.msrb.mxu3 %v2443_v54  ;;  %v4639_v54 = vld [vmem:[%s5707_s1 + $0x8] sm:$0xff] }
 0x446   :  { %v4619_v52 = vpop.eup %4618  ;;  %v2163_v30 = vand.u32 4294901760, %v2138_v10 }
 0x447   :  { %v2131_v36 = vmul.f32 0.6931472, %v4619_v52  ;;  %v2449_v52 = vand.u32 4294901760, %v2448_v33 }
 0x448   :  { %v2164_v19 = vsub.f32 %v2138_v10, %v2163_v30  ;;  %2217 = vmatmul.f32.vlgmr.msra.gmra.mxu1 %v2163_v30  ;;  %v2453_v10 = vand.u32 4294901760, %v2452_v49 }
 0x449   :  { %v2133_v45 = vadd.f32 %v2131_v36, %v2117_v23  ;;  %2514 = vmatpush.msra.mxu1 %v2396_v15  ;;  %2450 = vmatpush.msrb.mxu3 %v2449_v52 }
 0x44a   :  { %2251 = vmatmul.f32.vlgmr.msra.gmra.mxu2 %v2164_v19  ;;  %v2165_v46 = vand.u32 4294901760, %v2164_v19 }
 0x44b   :  { %v4498_v14 = vadd.f32 -0.6931472, %v2133_v45  ;;  %2516 = vmatpush.msra.mxu1 %v2398_v51  ;;  %2549 = vmatpush.msra.mxu2 %v2435_v22  ;;  %v4638_v22 = vld [vmem:[%s5707_s1] sm:$0xff] }
 0x44c   :  { %2283 = vmatmul.f32.vlgmr.msra.gmra.mxu3 %v2165_v46  ;;  %v2166_v12 = vsub.f32 %v2164_v19, %v2165_v46  ;;  %v4553_v19 = vld [vmem:[%s5675_s6 + $0x1] ss:$0 sm:$0xff] }
 0x44d   :  { %v2141_v6 = vsel %vm1082_vm2, %v4498_v14, 0  ;;  %2518 = vmatpush.msra.mxu1 %v2400_v32  ;;  %2553 = vmatpush.msra.mxu2 %v2441_v0 }
 0x44e   :  { %v2167_v5 = vand.u32 4294901760, %v2166_v12  ;;  %v2171_v44 = vand.u32 4294901760, %v2141_v6 }
 0x44f   :  { %2520 = vmatpush.msra.mxu1 %v2402_v43  ;;  %2557 = vmatpush.msra.mxu2 %v2447_v55 }
 0x450   :  { %2168 = vmatmul.f32.vlgmr.msra.gmra.mxu0 %v2167_v5  ;;  %2221 = vmatmul.f32.gmra.mxu1 %v2171_v44  ;;  %v2172_v2 = vsub.f32 %v2141_v6, %v2171_v44 }
 0x451   :  { %2480 = vmatpush.msra.mxu0 %v2434_v40  ;;  %2561 = vmatpush.msra.mxu2 %v2453_v10 }
 0x452   :  { %2256 = vmatmul.f32.gmra.mxu2 %v2172_v2  ;;  %v2173_v26 = vand.u32 4294901760, %v2172_v2 }
 0x453   :  { %2483 = vmatpush.msra.mxu0 %v2440_v8 }
 0x454   :  { %2289 = vmatmul.f32.gmra.mxu3 %v2173_v26  ;;  %v2174_v53 = vsub.f32 %v2172_v2, %v2173_v26 }
 0x455   :  { %2486 = vmatpush.msra.mxu0 %v2446_v35 }
 0x456   :  { %v2175_v48 = vand.u32 4294901760, %v2174_v53 }
 0x457   :  { %2489 = vmatpush.msra.mxu0 %v2452_v49 }
 0x458   :  { %2176 = vmatmul.f32.gmra.mxu0 %v2175_v48  ;;  %2351 = vmatmul.f32.vlgmr.msrb.gmra.mxu1 %v2163_v30 }
 0x460   :  { %2322 = vmatmul.f32.vlgmr.msrb.gmra.mxu0 %v2163_v30  ;;  %2355 = vmatmul.f32.gmra.mxu1 %v2171_v44  ;;  %v2454_v30 = vsub.f32 %v2452_v49, %v2453_v10 }
 0x462   :  { %v2455_v23 = vand.u32 4294901760, %v2454_v30 }
 0x464   :  { %2456 = vmatpush.msrb.mxu3 %v2455_v23 }
 0x466   :  { %2584 = vmatpush.msra.mxu3 %v2396_v15 }
 0x468   :  { %2326 = vmatmul.f32.gmra.mxu0 %v2171_v44  ;;  %2586 = vmatpush.msra.mxu3 %v2398_v51 }
 0x46a   :  { %2588 = vmatpush.msra.mxu3 %v2400_v32 }
 0x46c   :  { %2590 = vmatpush.msra.mxu3 %v2402_v43 }
 0x4c5   :  { %v2218_v36 = vpop.f32.mrf.mxu1 }
 0x4cd   :  { %v2169_v45 = vpop.f32.mrf.mxu0  ;;  %v2222_v14 = vpop.f32.mrf.mxu1 }
 0x4ce   :  { %v2170_v46 = vadd.f32 %v4553_v19, %v2169_v45  ;;  %v2252_v6 = vpop.f32.mrf.mxu2 }
 0x4cf   :  { %v2284_v26 = vpop.f32.mrf.mxu3 }
 0x4d0   :  { %v2219_v12 = vadd.f32 %v2218_v36, %v2170_v46 }
 0x4d2   :  { %v2253_v44 = vadd.f32 %v2252_v6, %v2219_v12 }
 0x4d4   :  { %v2285_v53 = vadd.f32 %v2284_v26, %v2253_v44 }
 0x4d5   :  { %v2177_v5 = vpop.f32.mrf.mxu0  ;;  %v2352_v41 = vpop.f32.mrf.mxu1 }
 0x4d6   :  { %v2178_v2 = vadd.f32 %v4553_v19, %v2177_v5  ;;  %v2257_v40 = vpop.f32.mrf.mxu2 }
 0x4d7   :  { %v2290_v32 = vpop.f32.mrf.mxu3 }
 0x4d8   :  { %v2223_v48 = vadd.f32 %v2222_v14, %v2178_v2 }
 0x4da   :  { %v2258_v51 = vadd.f32 %v2257_v40, %v2223_v48 }
 0x4dc   :  { %v2291_v29 = vadd.f32 %v2290_v32, %v2258_v51 }
 0x4dd   :  { %v2323_v15 = vpop.f32.mrf.mxu0  ;;  %v2356_v50 = vpop.f32.mrf.mxu1 }
 0x4de   :  { %v2324_v39 = vadd.f32 %v2323_v15, %v2285_v53 }
 0x4e0   :  { %v2353_v1 = vadd.f32 %v2352_v41, %v2324_v39 }
 0x4e2   :  { %v5458_v8 = vadd.f32 %v4638_v22, %v2353_v1 }
 0x4e4   :  { %v2379_v17 = vsel %vm1082_vm2, %v5458_v8, 0 }
 0x4e5   :  { %v2404_v0 = vand.u32 4294901760, %v2379_v17  ;;  %v2327_v35 = vpop.f32.mrf.mxu0 }
 0x4e6   :  { %v2328_v43 = vadd.f32 %v2327_v35, %v2291_v29 }
 0x4e7   :  { %v2405_v34 = vsub.f32 %v2379_v17, %v2404_v0  ;;  %2458 = vmatmul.f32.vlgmr.msrb.gmra.mxu3 %v2404_v0 }
 0x4e8   :  { %v2357_v55 = vadd.f32 %v2356_v50, %v2328_v43 }
 0x4e9   :  { %2492 = vmatmul.f32.vlgmr.msra.gmra.mxu0 %v2405_v34  ;;  %v2406_v49 = vand.u32 4294901760, %v2405_v34 }
 0x4ea   :  { %v5465_v33 = vadd.f32 %v4639_v54, %v2357_v55 }
 0x4eb   :  { %2524 = vmatmul.f32.vlgmr.msra.gmra.mxu1 %v2406_v49  ;;  %v2407_v10 = vsub.f32 %v2405_v34, %v2406_v49 }
 0x4ec   :  { %v2382_v52 = vsel %vm1082_vm2, %v5465_v33, 0 }
 0x4ed   :  { %v2408_v30 = vand.u32 4294901760, %v2407_v10  ;;  %v2412_v23 = vand.u32 4294901760, %v2382_v52 }
 0x4ef   :  { %2409 = vmatmul.f32.vlgmr.msrb.gmra.mxu2 %v2408_v30  ;;  %2462 = vmatmul.f32.gmra.mxu3 %v2412_v23  ;;  %v2413_v36 = vsub.f32 %v2382_v52, %v2412_v23 }
 0x4f1   :  { %2497 = vmatmul.f32.gmra.mxu0 %v2413_v36  ;;  %v2414_v19 = vand.u32 4294901760, %v2413_v36 }
 0x4f3   :  { %2530 = vmatmul.f32.gmra.mxu1 %v2414_v19  ;;  %v2415_v45 = vsub.f32 %v2413_v36, %v2414_v19 }
 0x4f5   :  { %v2416_v46 = vand.u32 4294901760, %v2415_v45 }
 0x4f7   :  { %2417 = vmatmul.f32.gmra.mxu2 %v2416_v46  ;;  %2592 = vmatmul.f32.vlgmr.msra.gmra.mxu3 %v2404_v0 }
 0x4ff   :  { %2563 = vmatmul.f32.vlgmr.msra.gmra.mxu2 %v2404_v0  ;;  %2596 = vmatmul.f32.gmra.mxu3 %v2412_v23 }
 0x507   :  { %2567 = vmatmul.f32.gmra.mxu2 %v2412_v23 }
 0x566   :  { %v2493_v44 = vpop.f32.mrf.mxu0 }
 0x568   :  { %v2525_v53 = vpop.f32.mrf.mxu1 }
 0x56a   :  { %v2459_v14 = vpop.f32.mrf.mxu3 }
 0x56e   :  { %v2498_v51 = vpop.f32.mrf.mxu0 }
 0x570   :  { %v2531_v32 = vpop.f32.mrf.mxu1 }
 0x572   :  { %v2410_v12 = vpop.f32.mrf.mxu2  ;;  %v2463_v6 = vpop.f32.mrf.mxu3 }
 0x573   :  { %v2460_v5 = vadd.f32 %v2459_v14, %v2410_v12 }
 0x575   :  { %v2494_v26 = vadd.f32 %v2493_v44, %v2460_v5 }
 0x577   :  { %v2526_v41 = vadd.f32 %v2525_v53, %v2494_v26  ;;  %v2925_v53 = vpop.permute.xlu2 %2924 }
 0x57a   :  { %v2418_v2 = vpop.f32.mrf.mxu2  ;;  %v2593_v15 = vpop.f32.mrf.mxu3 }
 0x57b   :  { %v2464_v48 = vadd.f32 %v2463_v6, %v2418_v2 }
 0x57d   :  { %v2499_v1 = vadd.f32 %v2498_v51, %v2464_v48 }
 0x57f   :  { %v2532_v17 = vadd.f32 %v2531_v32, %v2499_v1  ;;  %v2927_v1 = vpop.permute.xlu2 %2926 }
 0x582   :  { %v2564_v39 = vpop.f32.mrf.mxu2  ;;  %v2597_v43 = vpop.f32.mrf.mxu3 }
 0x583   :  { %v2565_v40 = vadd.f32 %v2564_v39, %v2526_v41 }
 0x585   :  { %v2594_v22 = vadd.f32 %v2593_v15, %v2565_v40 }
 0x587   :  { %v2616_v29 = vand.u32 4294901760, %v2594_v22 }
 0x589   :  { %v2688_v50 = vsub.f32 %v2594_v22, %v2616_v29 }
 0x58a   :  { %v2568_v0 = vpop.f32.mrf.mxu2 }
 0x58b   :  { %v2569_v35 = vadd.f32 %v2568_v0, %v2532_v17  ;;  %v2689_v54 = vand.u32 4294901760, %v2688_v50  ;;  %v2929_v0 = vpop.permute.xlu2 %2928 }
 0x58d   :  { %v2598_v34 = vadd.f32 %v2597_v43, %v2569_v35  ;;  %v2690_v30 = vsub.f32 %v2688_v50, %v2689_v54 }
 0x58f   :  { %v2614_v55 = vand.u32 4294901760, %v2598_v34  ;;  %v2691_v36 = vand.u32 4294901760, %v2690_v30 }
 0x591   :  { %v2682_v49 = vsub.f32 %v2598_v34, %v2614_v55  ;;  %2615 = vmatpush.msrb.mxu0 %v2614_v55  ;;  %2784 = vmatpush.msrb.mxu3 %v2614_v55 }
 0x593   :  { %2617 = vmatpush.msrb.mxu0 %v2616_v29  ;;  %2734 = vmatpush.msrb.mxu2 %v2682_v49  ;;  %v2683_v10 = vand.u32 4294901760, %v2682_v49 }
 0x594   :  { %2786 = vmatpush.msrb.mxu3 %v2616_v29  ;;  %2623 = vmatmul.f32.vlgmr.msrb.gmra.mxu0 %v5149_v37  ;;  %v5722_v37 = vld [vmem:[#allocation7_spill] sm:$0xff] }
 0x595   :  { %2790 = vmatmul.f32.vlgmr.msrb.gmra.mxu3 %v5128_v13  ;;  %2737 = vmatpush.msrb.mxu2 %v2688_v50  ;;  %v2684_v52 = vsub.f32 %v2682_v49, %v2683_v10  ;;  %v5720_v13 = vld [vmem:[#allocation5_spill] sm:$0xff] }
 0x596   :  { %2841 = vmatpush.msra.mxu0 %v2683_v10  ;;  %2740 = vmatmul.f32.vlgmr.msrb.gmra.mxu2 %v5117_v11  ;;  %v5719_v11 = vld [vmem:[#allocation11_spill] sm:$0xff] }
 0x597   :  { %v2685_v23 = vand.u32 4294901760, %v2684_v52 }
 0x598   :  { %2845 = vmatpush.msra.mxu0 %v2689_v54 }
 0x599   :  { %2686 = vmatpush.msrb.mxu1 %v2685_v23 }
 0x59b   :  { %2692 = vmatpush.msrb.mxu1 %v2691_v36 }
 0x59c   :  { %2631 = vmatmul.f32.gmra.mxu0 %v5177_v18  ;;  %4511 = vmatmul.msk.f32.vlgmr.msrb.gmra.mxu1 %vm190_vm0, %v5110_v9  ;;  %v5726_v18 = vld [vmem:[#allocation10_spill] sm:$0xff] }
 0x59d   :  { %2796 = vmatmul.f32.gmra.mxu3 %v5154_v42  ;;  %2886 = vmatpush.msra.mxu1 %v2614_v55  ;;  %v5723_v42 = vld [vmem:[#allocation13_spill] sm:$0xff]  ;;  %v2931_v55 = vpop.permute.xlu2 %2930 }
 0x59e   :  { %2745 = vmatmul.f32.gmra.mxu2 %v5144_v27  ;;  %v5721_v27 = vld [vmem:[#allocation9_spill] sm:$0xff] }
 0x59f   :  { %2888 = vmatpush.msra.mxu1 %v2616_v29 }
 0x5a4   :  { %2639 = vmatmul.f32.gmra.mxu0 %v5200_v20  ;;  %4512 = vmatmul.msk.f32.gmra.mxu1 %vm190_vm0, %v5125_v58  ;;  %v5727_v20 = vld [vmem:[#allocation8_spill] sm:$0xff] }
 0x5a5   :  { %2802 = vmatmul.f32.gmra.mxu3 %v5175_v56  ;;  %v5725_v56 = vld [vmem:[#allocation12_spill] sm:$0xff] }
 0x5a6   :  { %2750 = vmatmul.f32.gmra.mxu2 %v5159_v16  ;;  %v5724_v16 = vld [vmem:[#allocation6_spill] sm:$0xff] }
 0x5ac   :  { %2647 = vmatmul.f32.gmra.mxu0 %v5227_v31  ;;  %4513 = vmatmul.msk.f32.gmra.mxu1 %vm190_vm0, %v5142_v61 }
 0x5ad   :  { %2808 = vmatmul.f32.gmra.mxu3 %v5205_v3 }
 0x5ae   :  { %2755 = vmatmul.f32.gmra.mxu2 %v5194_v7 }
 0x5b4   :  { %2655 = vmatmul.f32.gmra.mxu0 %v5719_v11  ;;  %4514 = vmatmul.msk.f32.gmra.mxu1 %vm190_vm0, %v5720_v13 }
 0x5b5   :  { %2814 = vmatmul.f32.gmra.mxu3 %v5721_v27 }
 0x5b6   :  { %2760 = vmatmul.f32.gmra.mxu2 %v5722_v37 }
 0x5bc   :  { %2663 = vmatmul.f32.gmra.mxu0 %v5723_v42  ;;  %4515 = vmatmul.msk.f32.gmra.mxu1 %vm190_vm0, %v5724_v16 }
 0x5bd   :  { %2820 = vmatmul.f32.gmra.mxu3 %v5725_v56  ;;  %v2923_v56 = vpop.permute.xlu2 %2922 }
 0x5be   :  { %2765 = vmatmul.f32.gmra.mxu2 %v5726_v18 }
 0x5c4   :  { %4516 = vmatmul.msk.f32.gmra.mxu1 %vm190_vm0, %v5727_v20  ;;  %4517 = vmatmul.msk.f32.vlgmr.msra.gmra.mxu0 %vm190_vm0, %v5110_v9 }
 0x5cc   :  { %4518 = vmatmul.msk.f32.gmra.mxu0 %vm190_vm0, %v5125_v58  ;;  %4523 = vmatmul.msk.f32.vlgmr.msra.gmra.mxu1 %vm190_vm0, %v5110_v9 }
 0x5d4   :  { %4519 = vmatmul.msk.f32.gmra.mxu0 %vm190_vm0, %v5142_v61  ;;  %4524 = vmatmul.msk.f32.gmra.mxu1 %vm190_vm0, %v5125_v58 }
 0x5dc   :  { %4520 = vmatmul.msk.f32.gmra.mxu0 %vm190_vm0, %v5720_v13  ;;  %4525 = vmatmul.msk.f32.gmra.mxu1 %vm190_vm0, %v5142_v61 }
 0x5e4   :  { %4521 = vmatmul.msk.f32.gmra.mxu0 %vm190_vm0, %v5724_v16  ;;  %4526 = vmatmul.msk.f32.gmra.mxu1 %vm190_vm0, %v5720_v13 }
 0x5ec   :  { %4522 = vmatmul.msk.f32.gmra.mxu0 %vm190_vm0, %v5727_v20  ;;  %4527 = vmatmul.msk.f32.gmra.mxu1 %vm190_vm0, %v5724_v16 }
 0x5f4   :  { %4528 = vmatmul.msk.f32.gmra.mxu1 %vm190_vm0, %v5727_v20 }
 0x611   :  { %v2624_v9 = vpop.f32.mrf.mxu0 }
 0x618   :  { %v2791_v26 = vpop.f32.mrf.mxu3 }
 0x619   :  { %v2632_v58 = vpop.f32.mrf.mxu0  ;;  %v2695_v7 = vpop.f32.mrf.mxu1 }
 0x61a   :  { %v2696_v3 = vadd.f32 %v2695_v7, %v2624_v9  ;;  %v2741_v5 = vpop.f32.mrf.mxu2 }
 0x61c   :  { %v2742_v18 = vadd.f32 %v2741_v5, %v2696_v3 }
 0x620   :  { %v2797_v39 = vpop.f32.mrf.mxu3 }
 0x621   :  { %v2640_v61 = vpop.f32.mrf.mxu0  ;;  %v2699_v31 = vpop.f32.mrf.mxu1 }
 0x622   :  { %v2700_v19 = vadd.f32 %v2699_v31, %v2632_v58  ;;  %v2746_v48 = vpop.f32.mrf.mxu2 }
 0x624   :  { %v2747_v27 = vadd.f32 %v2746_v48, %v2700_v19 }
 0x628   :  { %v2803_v32 = vpop.f32.mrf.mxu3 }
 0x629   :  { %v2648_v45 = vpop.f32.mrf.mxu0  ;;  %v2703_v46 = vpop.f32.mrf.mxu1 }
 0x62a   :  { %v2704_v14 = vadd.f32 %v2703_v46, %v2640_v61  ;;  %v2751_v22 = vpop.f32.mrf.mxu2  ;;  %v2798_v61 = vadd.f32 %v2797_v39, %v2747_v27 }
 0x62c   :  { %v2752_v13 = vadd.f32 %v2751_v22, %v2704_v14 }
 0x62e   :  { %v2804_v20 = vadd.f32 %v2803_v32, %v2752_v13 }
 0x630   :  { %v2809_v43 = vpop.f32.mrf.mxu3 }
 0x631   :  { %v2656_v12 = vpop.f32.mrf.mxu0  ;;  %v2707_v6 = vpop.f32.mrf.mxu1 }
 0x632   :  { %v2756_v35 = vpop.f32.mrf.mxu2  ;;  %v2708_v49 = vadd.f32 %v2707_v6, %v2648_v45 }
 0x634   :  { %v2757_v30 = vadd.f32 %v2756_v35, %v2708_v49 }
 0x636   :  { %v2810_v42 = vadd.f32 %v2809_v43, %v2757_v30 }
 0x638   :  { %v2815_v36 = vpop.f32.mrf.mxu3 }
 0x639   :  { %v2664_v44 = vpop.f32.mrf.mxu0  ;;  %v2711_v2 = vpop.f32.mrf.mxu1 }
 0x63a   :  { %v2712_v54 = vadd.f32 %v2711_v2, %v2656_v12  ;;  %v2761_v10 = vpop.f32.mrf.mxu2  ;;  %v2792_v2 = vadd.f32 %v2791_v26, %v2742_v18  ;;  %v2921_v26 = vpop.permute.xlu2 %2920 }
 0x63c   :  { %v2762_v23 = vadd.f32 %v2761_v10, %v2712_v54 }
 0x63e   :  { %v2816_v16 = vadd.f32 %v2815_v36, %v2762_v23 }
 0x640   :  { %v2821_v19 = vpop.f32.mrf.mxu3 }
 0x641   :  { %v2715_v41 = vpop.f32.mrf.mxu1  ;;  %v2848_v15 = vpop.f32.mrf.mxu0 }
 0x642   :  { %v2716_v37 = vadd.f32 %v2715_v41, %v2664_v44  ;;  %v2766_v7 = vpop.f32.mrf.mxu2  ;;  %v2849_v48 = vadd.f32 %v2848_v15, %v2792_v2 }
 0x644   :  { %v2767_v45 = vadd.f32 %v2766_v7, %v2716_v37 }
 0x646   :  { %v2822_v3 = vadd.f32 %v2821_v19, %v2767_v45 }
 0x649   :  { %v2852_v40 = vpop.f32.mrf.mxu0  ;;  %v2891_v51 = vpop.f32.mrf.mxu1 }
 0x64a   :  { %v2853_v35 = vadd.f32 %v2852_v40, %v2798_v61  ;;  %v2892_v5 = vadd.f32 %v2891_v51, %v2849_v48 }
 0x64c   :  { %v2938_v40 = vmul.f32 %v2921_v26, %v2892_v5 }
 0x651   :  { %v2856_v29 = vpop.f32.mrf.mxu0  ;;  %v2895_v17 = vpop.f32.mrf.mxu1 }
 0x652   :  { %v2857_v46 = vadd.f32 %v2856_v29, %v2804_v20  ;;  %v2896_v41 = vadd.f32 %v2895_v17, %v2853_v35  ;;  %v4503_v35 = vld [vmem:[%s5674_s5 + $0x80] sm:$0xff] }
 0x654   :  { %v2939_v54 = vmul.f32 %v2923_v56, %v2896_v41 }
 0x656   :  { %v5530_v17 = vand.u32 4294901760, %v2939_v54 }
 0x658   :  { %v3018_v36 = vsub.f32 %v2939_v54, %v5530_v17 }
 0x659   :  { %v2860_v34 = vpop.f32.mrf.mxu0  ;;  %v2899_v50 = vpop.f32.mrf.mxu1 }
 0x65a   :  { %v2861_v9 = vadd.f32 %v2860_v34, %v2810_v42  ;;  %v2900_v49 = vadd.f32 %v2899_v50, %v2857_v46  ;;  %v3019_v18 = vand.u32 4294901760, %v3018_v36 }
 0x65c   :  { %v2940_v32 = vmul.f32 %v2925_v53, %v2900_v49  ;;  %v3020_v61 = vsub.f32 %v3018_v36, %v3019_v18 }
 0x65e   :  { %v5527_v50 = vand.u32 4294901760, %v2940_v32  ;;  %v3021_v46 = vand.u32 4294901760, %v3020_v61 }
 0x661   :  { %v2903_v52 = vpop.f32.mrf.mxu1  ;;  %v2864_v11 = vpop.f32.mrf.mxu0 }
 0x662   :  { %v2865_v58 = vadd.f32 %v2864_v11, %v2816_v16  ;;  %v2904_v12 = vadd.f32 %v2903_v52, %v2861_v9  ;;  %v3012_v52 = vsub.f32 %v2940_v32, %v5527_v50 }
 0x664   :  { %v2941_v22 = vmul.f32 %v2927_v1, %v2904_v12  ;;  %v5533_v1 = vand.u32 4294901760, %v2938_v40  ;;  %v3013_v42 = vand.u32 4294901760, %v3012_v52 }
 0x666   :  { %v5525_v29 = vand.u32 4294901760, %v2941_v22  ;;  %v3014_v9 = vsub.f32 %v3012_v52, %v3013_v42 }
 0x668   :  { %v3006_v51 = vsub.f32 %v2941_v22, %v5525_v29 }
 0x669   :  { %v2907_v31 = vpop.f32.mrf.mxu1  ;;  %v2868_v44 = vpop.f32.mrf.mxu0 }
 0x66a   :  { %v2908_v6 = vadd.f32 %v2907_v31, %v2865_v58  ;;  %v2869_v43 = vadd.f32 %v2868_v44, %v2822_v3  ;;  %v3007_v13 = vand.u32 4294901760, %v3006_v51  ;;  %v3015_v31 = vand.u32 4294901760, %v3014_v9 }
 0x66b   :  { %v3213_v44 = vand.u32 4294901760, %v4503_v35 }
 0x66c   :  { %v2942_v14 = vmul.f32 %v2929_v0, %v2908_v6  ;;  %v3008_v56 = vsub.f32 %v3006_v51, %v3007_v13 }
 0x66d   :  { %v3263_v32 = vsub.f32 %v4503_v35, %v3213_v44 }
 0x66e   :  { %v5523_v34 = vand.u32 4294901760, %v2942_v14  ;;  %v3009_v7 = vand.u32 4294901760, %v3008_v56 }
 0x670   :  { %v3000_v0 = vsub.f32 %v2942_v14, %v5523_v34 }
 0x671   :  { %v2911_v39 = vpop.f32.mrf.mxu1 }
 0x672   :  { %v2912_v10 = vadd.f32 %v2911_v39, %v2869_v43  ;;  %v3001_v23 = vand.u32 4294901760, %v3000_v0  ;;  %v3264_v39 = vand.u32 4294901760, %v3263_v32 }
 0x674   :  { %v2943_v15 = vmul.f32 %v2931_v55, %v2912_v10  ;;  %v3024_v55 = vsub.f32 %v2938_v40, %v5533_v1  ;;  %v3002_v37 = vsub.f32 %v3000_v0, %v3001_v23 }
 0x676   :  { %v2954_v53 = vand.u32 4294901760, %v2943_v15  ;;  %v3003_v20 = vand.u32 4294901760, %v3002_v37  ;;  %v3025_v58 = vand.u32 4294901760, %v3024_v55 }
 0x678   :  { %v2994_v30 = vsub.f32 %v2943_v15, %v2954_v53  ;;  %2955 = vmatpush.msra.mxu2 %v2954_v53  ;;  %v3026_v45 = vsub.f32 %v3024_v55, %v3025_v58 }
 0x67a   :  { %v2995_v11 = vand.u32 4294901760, %v2994_v30  ;;  %2957 = vmatpush.msra.mxu2 %v5523_v34  ;;  %v3027_v12 = vand.u32 4294901760, %v3026_v45 }
 0x67c   :  { %2959 = vmatpush.msra.mxu2 %v5525_v29  ;;  %v2996_v27 = vsub.f32 %v2994_v30, %v2995_v11 }
 0x67e   :  { %2961 = vmatpush.msra.mxu2 %v5527_v50  ;;  %v2997_v16 = vand.u32 4294901760, %v2996_v27 }
 0x680   :  { %2963 = vmatpush.msra.mxu2 %v5530_v17  ;;  %2998 = vmatpush.msra.mxu3 %v2997_v16 }
 0x682   :  { %2965 = vmatpush.msra.mxu2 %v5533_v1  ;;  %3004 = vmatpush.msra.mxu3 %v3003_v20 }
 0x683   :  { %2971 = vmatmul.f32.vlgmr.msra.gmra.mxu2 %v5353_v60  ;;  %v4505_v60 = vld [vmem:[%s5674_s5 + $0x90] sm:$0xff] }
 0x684   :  { %3050 = vmatpush.msrb.mxu2 %v2994_v30  ;;  %3010 = vmatpush.msra.mxu3 %v3009_v7 }
 0x686   :  { %3053 = vmatpush.msrb.mxu2 %v3000_v0  ;;  %3016 = vmatpush.msra.mxu3 %v3015_v31 }
 0x688   :  { %3056 = vmatpush.msrb.mxu2 %v3006_v51  ;;  %3022 = vmatpush.msra.mxu3 %v3021_v46 }
 0x68a   :  { %3059 = vmatpush.msrb.mxu2 %v3012_v52  ;;  %3028 = vmatpush.msra.mxu3 %v3027_v12 }
 0x68b   :  { %4529 = vmatmul.msk.f32.vlgmr.msra.gmra.mxu3 %vm125_vm10, %v5294_v28  ;;  %2979 = vmatmul.f32.gmra.mxu2 %v5367_v59  ;;  %v3209_v59 = vand.u32 4294901760, %v4505_v60 }
 0x68c   :  { %3062 = vmatpush.msrb.mxu2 %v3018_v36  ;;  %3088 = vmatpush.msrb.mxu3 %v2954_v53 }
 0x68e   :  { %3065 = vmatpush.msrb.mxu2 %v3024_v55  ;;  %3090 = vmatpush.msrb.mxu3 %v5523_v34 }
 0x690   :  { %3125 = vmatpush.msra.mxu2 %v2995_v11  ;;  %3092 = vmatpush.msrb.mxu3 %v5525_v29 }
 0x692   :  { %3129 = vmatpush.msra.mxu2 %v3001_v23  ;;  %3094 = vmatpush.msrb.mxu3 %v5527_v50 }
 0x693   :  { %4530 = vmatmul.msk.f32.gmra.mxu3 %vm125_vm10, %v5316_v21  ;;  %3068 = vmatmul.f32.vlgmr.msrb.gmra.mxu2 %v5307_v57  ;;  %v4506_v57 = vld [vmem:[%s5674_s5 + $0x98] sm:$0xff] }
 0x694   :  { %3133 = vmatpush.msra.mxu2 %v3007_v13  ;;  %3096 = vmatpush.msrb.mxu3 %v5530_v17 }
 0x696   :  { %3137 = vmatpush.msra.mxu2 %v3013_v42  ;;  %3098 = vmatpush.msrb.mxu3 %v5533_v1 }
 0x698   :  { %3141 = vmatpush.msra.mxu2 %v3019_v18  ;;  %3166 = vmatpush.msra.mxu3 %v2954_v53 }
 0x69a   :  { %3145 = vmatpush.msra.mxu2 %v3025_v58  ;;  %3168 = vmatpush.msra.mxu3 %v5523_v34 }
 0x69b   :  { %3102 = vmatmul.f32.vlgmr.msrb.gmra.mxu3 %v5328_v24  ;;  %3073 = vmatmul.f32.gmra.mxu2 %v5345_v63  ;;  %v3207_v63 = vand.u32 4294901760, %v4506_v57 }
 0x69c   :  { %3170 = vmatpush.msra.mxu3 %v5525_v29  ;;  %v3265_v29 = vsub.f32 %v3263_v32, %v3264_v39 }
 0x69d   :  { %3208 = vmatpush.msrb.mxu0 %v3207_v63 }
 0x69e   :  { %3172 = vmatpush.msra.mxu3 %v5527_v50  ;;  %v3266_v26 = vand.u32 4294901760, %v3265_v29 }
 0x69f   :  { %3210 = vmatpush.msrb.mxu0 %v3209_v59 }
 0x6a0   :  { %3174 = vmatpush.msra.mxu3 %v5530_v17 }
 0x6a2   :  { %3176 = vmatpush.msra.mxu3 %v5533_v1 }
 0x6a3   :  { %3108 = vmatmul.f32.gmra.mxu3 %v5356_v38  ;;  %4531 = vmatmul.msk.f32.vlgmr.msra.gmra.mxu2 %vm125_vm10, %v5294_v28  ;;  %v3245_v38 = vsub.f32 %v4506_v57, %v3207_v63 }
 0x6a4   :  { %3325 = vmatpush.msrb.mxu3 %v3207_v63 }
 0x6a5   :  { %v3246_v6 = vand.u32 4294901760, %v3245_v38  ;;  %3291 = vmatpush.msrb.mxu2 %v3245_v38 }
 0x6a6   :  { %3327 = vmatpush.msrb.mxu3 %v3209_v59 }
 0x6a7   :  { %v3247_v49 = vsub.f32 %v3245_v38, %v3246_v6  ;;  %v4510_v38 = vld [vmem:[%s5674_s5 + $0xb8] sm:$0xff] }
 0x6a9   :  { %v3248_v22 = vand.u32 4294901760, %v3247_v49  ;;  %v4508_v49 = vld [vmem:[%s5674_s5 + $0xa8] sm:$0xff] }
 0x6ab   :  { %4533 = vmatmul.msk.f32.vlgmr.msra.gmra.mxu3 %vm125_vm10, %v5294_v28  ;;  %4532 = vmatmul.msk.f32.gmra.mxu2 %vm125_vm10, %v5316_v21  ;;  %v4504_v28 = vld [vmem:[%s5674_s5 + $0x88] sm:$0xff] }
 0x6ac   :  { %v3211_v2 = vand.u32 4294901760, %v4504_v28  ;;  %3249 = vmatpush.msrb.mxu1 %v3248_v22  ;;  %v4507_v22 = vld [vmem:[%s5674_s5 + $0xa0] sm:$0xff] }
 0x6ae   :  { %v3257_v19 = vsub.f32 %v4504_v28, %v3211_v2  ;;  %3329 = vmatpush.msrb.mxu3 %v3211_v2  ;;  %3212 = vmatpush.msrb.mxu0 %v3211_v2  ;;  %v4509_v28 = vld [vmem:[%s5674_s5 + $0xb0] sm:$0xff] }
 0x6b0   :  { %v3258_v5 = vand.u32 4294901760, %v3257_v19  ;;  %3331 = vmatpush.msrb.mxu3 %v3213_v44  ;;  %3214 = vmatpush.msrb.mxu0 %v3213_v44 }
 0x6b2   :  { %v3259_v34 = vsub.f32 %v3257_v19, %v3258_v5  ;;  %3360 = vmatpush.msra.mxu0 %v3246_v6 }
 0x6b3   :  { %4534 = vmatmul.msk.f32.gmra.mxu3 %vm125_vm10, %v5316_v21  ;;  %v3251_v21 = vsub.f32 %v4505_v60, %v3209_v59 }
 0x6b4   :  { %v3260_v54 = vand.u32 4294901760, %v3259_v34 }
 0x6b5   :  { %v3252_v14 = vand.u32 4294901760, %v3251_v21  ;;  %3294 = vmatpush.msrb.mxu2 %v3251_v21 }
 0x6b7   :  { %v3253_v3 = vsub.f32 %v3251_v21, %v3252_v14  ;;  %3297 = vmatpush.msrb.mxu2 %v3257_v19  ;;  %3364 = vmatpush.msra.mxu0 %v3252_v14 }
 0x6b9   :  { %v3254_v43 = vand.u32 4294901760, %v3253_v3  ;;  %3300 = vmatpush.msrb.mxu2 %v3263_v32  ;;  %3368 = vmatpush.msra.mxu0 %v3258_v5 }
 0x6bb   :  { %3255 = vmatpush.msrb.mxu1 %v3254_v43  ;;  %3372 = vmatpush.msra.mxu0 %v3264_v39  ;;  %v3456_v43 = vand.u32 4294901760, %v4507_v22 }
 0x6bd   :  { %3261 = vmatpush.msrb.mxu1 %v3260_v54 }
 0x6bf   :  { %3267 = vmatpush.msrb.mxu1 %v3266_v26 }
 0x6c1   :  { %3395 = vmatpush.msra.mxu1 %v3207_v63 }
 0x6c3   :  { %3397 = vmatpush.msra.mxu1 %v3209_v59  ;;  %v3450_v59 = vand.u32 4294901760, %v4510_v38 }
 0x6c5   :  { %3399 = vmatpush.msra.mxu1 %v3211_v2  ;;  %v3488_v21 = vsub.f32 %v4510_v38, %v3450_v59  ;;  %v3452_v2 = vand.u32 4294901760, %v4509_v28  ;;  %3451 = vmatpush.msra.mxu2 %v3450_v59 }
 0x6c7   :  { %3401 = vmatpush.msra.mxu1 %v3213_v44  ;;  %v3489_v44 = vand.u32 4294901760, %v3488_v21  ;;  %3453 = vmatpush.msra.mxu2 %v3452_v2 }
 0x6c9   :  { %v3490_v3 = vsub.f32 %v3488_v21, %v3489_v44 }
 0x6cb   :  { %v3491_v29 = vand.u32 4294901760, %v3490_v3 }
 0x6cd   :  { %3492 = vmatpush.msra.mxu3 %v3491_v29 }
 0x706   :  { %v2972_v24 = vpop.f32.mrf.mxu2 }
 0x70e   :  { %v3031_v48 = vpop.f32.mrf.mxu3  ;;  %v2980_v41 = vpop.f32.mrf.mxu2 }
 0x70f   :  { %v3032_v17 = vadd.f32 %v3031_v48, %v2972_v24  ;;  %v4554_v24 = vld [vmem:[%s5675_s6 + $0x2] ss:$0 sm:$0xff]  ;;  %v3494_v48 = vsub.f32 %v4509_v28, %v3452_v2 }
 0x711   :  { %v3495_v5 = vand.u32 4294901760, %v3494_v48 }
 0x716   :  { %v3035_v10 = vpop.f32.mrf.mxu3  ;;  %v3069_v40 = vpop.f32.mrf.mxu2 }
 0x717   :  { %v3070_v53 = vadd.f32 %v3069_v40, %v3032_v17  ;;  %v3036_v23 = vadd.f32 %v3035_v10, %v2980_v41  ;;  %v3454_v41 = vand.u32 4294901760, %v4508_v49  ;;  %v3496_v10 = vsub.f32 %v3494_v48, %v3495_v5 }
 0x718   :  { %v3506_v40 = vsub.f32 %v4507_v22, %v3456_v43 }
 0x719   :  { %v3500_v32 = vsub.f32 %v4508_v49, %v3454_v41  ;;  %3455 = vmatpush.msra.mxu2 %v3454_v41 }
 0x71b   :  { %v3501_v26 = vand.u32 4294901760, %v3500_v32  ;;  %3457 = vmatpush.msra.mxu2 %v3456_v43 }
 0x71e   :  { %v3103_v50 = vpop.f32.mrf.mxu3  ;;  %v3074_v0 = vpop.f32.mrf.mxu2 }
 0x71f   :  { %v3104_v1 = vadd.f32 %v3103_v50, %v3070_v53  ;;  %v3075_v11 = vadd.f32 %v3074_v0, %v3036_v23  ;;  %v3497_v50 = vand.u32 4294901760, %v3496_v10  ;;  %v3502_v0 = vsub.f32 %v3500_v32, %v3501_v26 }
 0x721   :  { %3498 = vmatpush.msra.mxu3 %v3497_v50 }
 0x726   :  { %v3109_v15 = vpop.f32.mrf.mxu3  ;;  %v3148_v51 = vpop.f32.mrf.mxu2 }
 0x727   :  { %v3149_v52 = vadd.f32 %v3148_v51, %v3104_v1  ;;  %v3110_v27 = vadd.f32 %v3109_v15, %v3075_v11  ;;  %v3507_v15 = vand.u32 4294901760, %v3506_v40 }
 0x72e   :  { %v3179_v30 = vpop.f32.mrf.mxu3  ;;  %v3152_v55 = vpop.f32.mrf.mxu2 }
 0x72f   :  { %v3180_v36 = vadd.f32 %v3179_v30, %v3149_v52  ;;  %v3153_v16 = vadd.f32 %v3152_v55, %v3110_v27  ;;  %v3503_v52 = vand.u32 4294901760, %v3502_v0  ;;  %v3508_v30 = vsub.f32 %v3506_v40, %v3507_v15 }
 0x731   :  { %v3186_v13 = vmul.f32 %v3180_v36, %v5415_v62  ;;  %3504 = vmatpush.msra.mxu3 %v3503_v52  ;;  %v3509_v11 = vand.u32 4294901760, %v3508_v30 }
 0x733   :  { %v3190_v37 = vsel %vm1082_vm2, %v3186_v13, 0  ;;  %3510 = vmatpush.msra.mxu3 %v3509_v11 }
 0x734   :  { %v3215_v42 = vand.u32 4294901760, %v3190_v37 }
 0x736   :  { %v3216_v56 = vsub.f32 %v3190_v37, %v3215_v42  ;;  %v3183_v18 = vpop.f32.mrf.mxu3  ;;  %3269 = vmatmul.f32.vlgmr.msrb.gmra.mxu1 %v3215_v42 }
 0x737   :  { %v3184_v20 = vadd.f32 %v3183_v18, %v3153_v16  ;;  %3568 = vmatpush.msrb.mxu1 %v3450_v59 }
 0x738   :  { %v3217_v9 = vand.u32 4294901760, %v3216_v56  ;;  %3303 = vmatmul.f32.vlgmr.msrb.gmra.mxu2 %v3216_v56 }
 0x739   :  { %v3187_v58 = vmul.f32 %v3184_v20, %v5419_v47  ;;  %3570 = vmatpush.msrb.mxu1 %v3452_v2  ;;  %3603 = vmatpush.msrb.mxu2 %v3489_v44 }
 0x73a   :  { %v3218_v7 = vsub.f32 %v3216_v56, %v3217_v9  ;;  %3335 = vmatmul.f32.vlgmr.msrb.gmra.mxu3 %v3217_v9 }
 0x73b   :  { %v3193_v61 = vsel %vm1082_vm2, %v3187_v58, 0  ;;  %3572 = vmatpush.msrb.mxu1 %v3454_v41  ;;  %3607 = vmatpush.msrb.mxu2 %v3495_v5 }
 0x73c   :  { %v3219_v31 = vand.u32 4294901760, %v3218_v7  ;;  %v3223_v62 = vand.u32 4294901760, %v3193_v61  ;;  %3638 = vmatpush.msrb.mxu3 %v3450_v59 }
 0x73d   :  { %3574 = vmatpush.msrb.mxu1 %v3456_v43  ;;  %3611 = vmatpush.msrb.mxu2 %v3501_v26 }
 0x73e   :  { %3220 = vmatmul.f32.vlgmr.msrb.gmra.mxu0 %v3219_v31  ;;  %3273 = vmatmul.f32.gmra.mxu1 %v3223_v62  ;;  %v3224_v45 = vsub.f32 %v3193_v61, %v3223_v62 }
 0x73f   :  { %3534 = vmatpush.msrb.mxu0 %v3488_v21  ;;  %3615 = vmatpush.msrb.mxu2 %v3507_v15 }
 0x740   :  { %3308 = vmatmul.f32.gmra.mxu2 %v3224_v45  ;;  %v3225_v46 = vand.u32 4294901760, %v3224_v45  ;;  %3640 = vmatpush.msrb.mxu3 %v3452_v2 }
 0x741   :  { %3537 = vmatpush.msrb.mxu0 %v3494_v48 }
 0x742   :  { %3341 = vmatmul.f32.gmra.mxu3 %v3225_v46  ;;  %v3226_v12 = vsub.f32 %v3224_v45, %v3225_v46 }
 0x743   :  { %3540 = vmatpush.msrb.mxu0 %v3500_v32  ;;  %3642 = vmatpush.msrb.mxu3 %v3454_v41 }
 0x744   :  { %v3227_v57 = vand.u32 4294901760, %v3226_v12 }
 0x745   :  { %3543 = vmatpush.msrb.mxu0 %v3506_v40  ;;  %3644 = vmatpush.msrb.mxu3 %v3456_v43 }
 0x746   :  { %3228 = vmatmul.f32.gmra.mxu0 %v3227_v57  ;;  %3403 = vmatmul.f32.vlgmr.msra.gmra.mxu1 %v3215_v42 }
 0x74e   :  { %3374 = vmatmul.f32.vlgmr.msra.gmra.mxu0 %v3215_v42  ;;  %3407 = vmatmul.f32.gmra.mxu1 %v3223_v62 }
 0x756   :  { %3378 = vmatmul.f32.gmra.mxu0 %v3223_v62 }
 0x7b3   :  { %v3270_v47 = vpop.f32.mrf.mxu1 }
 0x7bb   :  { %v3221_v63 = vpop.f32.mrf.mxu0  ;;  %v3274_v6 = vpop.f32.mrf.mxu1 }
 0x7bc   :  { %v3222_v60 = vadd.f32 %v4554_v24, %v3221_v63  ;;  %v3304_v14 = vpop.f32.mrf.mxu2 }
 0x7bd   :  { %v3336_v54 = vpop.f32.mrf.mxu3 }
 0x7be   :  { %v3271_v35 = vadd.f32 %v3270_v47, %v3222_v60 }
 0x7c0   :  { %v3305_v34 = vadd.f32 %v3304_v14, %v3271_v35 }
 0x7c2   :  { %v3337_v17 = vadd.f32 %v3336_v54, %v3305_v34  ;;  %v4556_v34 = vld [vmem:[%s5673_s4] ss:$0 sm:$0xff] }
 0x7c3   :  { %v3229_v19 = vpop.f32.mrf.mxu0  ;;  %v3404_v53 = vpop.f32.mrf.mxu1  ;;  %vm122_vm6 = vcmp.eq.s32.totalorder %v5289_v4, %v4556_v34 }
 0x7c4   :  { %v3230_v39 = vadd.f32 %v4554_v24, %v3229_v19  ;;  %v3309_v36 = vpop.f32.mrf.mxu2  ;;  %v4452_v54 = vsel %vm122_vm6, 1.0, %v5718_v25 }
 0x7c5   :  { %v3342_v37 = vpop.f32.mrf.mxu3  ;;  %v165_v10 = vsel %vm164_vm7, %v4452_v54, 0.0 }
 0x7c6   :  { %v3275_v51 = vadd.f32 %v3274_v6, %v3230_v39  ;;  %v4555_v39 = vld [vmem:[%s5675_s6 + $0x3] ss:$0 sm:$0xff]  ;;  %166 = vadd.xlane.f32.xlu0 %v165_v10  ;;  %s4669_s6 = smov [#allocation2]  }
 0x7c7   :  { %s4433_s1 = sshll.u32 %s4669_s6, 4  ;;  %s4434_s1 = int_to_ptr.vmem [resolvable:$true] %s4433_s1 }
 0x7c8   :  { %v3310_v13 = vadd.f32 %v3309_v36, %v3275_v51  ;;  %v3657_v36 = vsel %vm190_vm0, %v4452_v54, 0 }
 0x7ca   :  { %v3343_v42 = vadd.f32 %v3342_v37, %v3310_v13 }
 0x7cb   :  { %v3375_v1 = vpop.f32.mrf.mxu0  ;;  %v3408_v9 = vpop.f32.mrf.mxu1 }
 0x7cc   :  { %v3376_v23 = vadd.f32 %v3375_v1, %v3337_v17 }
 0x7ce   :  { %v3405_v55 = vadd.f32 %v3404_v53, %v3376_v23 }
 0x7d0   :  { %v3413_v27 = vand.u32 2147483647, %v3405_v55  ;;  %v3411_v47 = vmax.f32 %v3405_v55, 0.0  ;;  %v3678_v55 = vsub.f32 %v3657_v36, %v3657_v36 }
 0x7d2   :  { %v3415_v16 = vsub.f32 0.0, %v3413_v27 }
 0x7d3   :  { %v3379_v56 = vpop.f32.mrf.mxu0 }
 0x7d4   :  { %v3417_v18 = vmul.f32 1.442695, %v3415_v16  ;;  %v3380_v20 = vadd.f32 %v3379_v56, %v3343_v42  ;;  %v3679_v56 = vand.u32 4294901760, %v3678_v55 }
 0x7d6   :  { %4620 = vpow2.f32 %v3417_v18  ;;  %v3409_v58 = vadd.f32 %v3408_v9, %v3380_v20 }
 0x7d8   :  { %v3414_v7 = vand.u32 2147483647, %v3409_v58  ;;  %v3412_v6 = vmax.f32 %v3409_v58, 0.0 }
 0x7da   :  { %v3416_v61 = vsub.f32 0.0, %v3414_v7  ;;  %v3680_v7 = vsub.f32 %v3678_v55, %v3679_v56 }
 0x7dc   :  { %v4621_v31 = vpop.eup %4620  ;;  %v3419_v62 = vmul.f32 1.442695, %v3416_v61 }
 0x7dd   :  { %v3421_v45 = vadd.f32 1.0, %v4621_v31 }
 0x7de   :  { %4622 = vpow2.f32 %v3419_v62 }
 0x7df   :  { %4624 = vlog2.f32 %v3421_v45  ;;  %v3681_v45 = vand.u32 4294901760, %v3680_v7 }
 0x7e4   :  { %v4623_v46 = vpop.eup %4622 }
 0x7e5   :  { %v4625_v12 = vpop.eup %4624  ;;  %v3422_v57 = vadd.f32 1.0, %v4623_v46 }
 0x7e6   :  { %v3424_v24 = vmul.f32 0.6931472, %v4625_v12 }
 0x7e7   :  { %4626 = vlog2.f32 %v3422_v57 }
 0x7e8   :  { %v3427_v63 = vadd.f32 %v3424_v24, %v3411_v47 }
 0x7ea   :  { %v4535_v60 = vadd.f32 -0.6931472, %v3427_v63  ;;  %v3822_v63 = vld [vmem:[%s5680_s11 + $0x18] sm:$0xff] }
 0x7ec   :  { %v3433_v38 = vsel %vm1082_vm2, %v4535_v60, 0  ;;  %v3842_v60 = vand.u32 4294901760, %v3822_v63 }
 0x7ed   :  { %v4627_v59 = vpop.eup %4626  ;;  %v3458_v28 = vand.u32 4294901760, %v3433_v38 }
 0x7ee   :  { %v3426_v21 = vmul.f32 0.6931472, %v4627_v59  ;;  %v3872_v59 = vsub.f32 %v3822_v63, %v3842_v60 }
 0x7ef   :  { %v3459_v2 = vsub.f32 %v3433_v38, %v3458_v28  ;;  %3512 = vmatmul.f32.vlgmr.msra.gmra.mxu3 %v3458_v28  ;;  %v3821_v38 = vld [vmem:[%s5680_s11 + $0x10] sm:$0xff] }
 0x7f0   :  { %v3428_v35 = vadd.f32 %v3426_v21, %v3412_v6  ;;  %v3820_v6 = vld [vmem:[%s5680_s11 + $0x8] sm:$0xff]  ;;  %v3873_v21 = vand.u32 4294901760, %v3872_v59 }
 0x7f1   :  { %3546 = vmatmul.f32.vlgmr.msrb.gmra.mxu0 %v3459_v2  ;;  %v3460_v49 = vand.u32 4294901760, %v3459_v2 }
 0x7f2   :  { %v4536_v14 = vadd.f32 -0.6931472, %v3428_v35 }
 0x7f3   :  { %3578 = vmatmul.f32.vlgmr.msrb.gmra.mxu1 %v3460_v49  ;;  %v3461_v19 = vsub.f32 %v3459_v2, %v3460_v49  ;;  %v3846_v2 = vand.u32 4294901760, %v3820_v6  ;;  %v3819_v49 = vld [vmem:[%s5680_s11] sm:$0xff] }
 0x7f4   :  { %v3436_v44 = vsel %vm1082_vm2, %v4536_v14, 0  ;;  %v3874_v14 = vsub.f32 %v3872_v59, %v3873_v21 }
 0x7f5   :  { %v3462_v48 = vand.u32 4294901760, %v3461_v19  ;;  %v3466_v41 = vand.u32 4294901760, %v3436_v44 }
 0x7f7   :  { %3463 = vmatmul.f32.vlgmr.msra.gmra.mxu2 %v3462_v48  ;;  %3516 = vmatmul.f32.gmra.mxu3 %v3466_v41  ;;  %v3467_v22 = vsub.f32 %v3436_v44, %v3466_v41  ;;  %v3848_v44 = vand.u32 4294901760, %v3819_v49  ;;  %v3884_v48 = vsub.f32 %v3820_v6, %v3846_v2 }
 0x7f9   :  { %3551 = vmatmul.f32.gmra.mxu0 %v3467_v22  ;;  %v3468_v3 = vand.u32 4294901760, %v3467_v22 }
 0x7fb   :  { %3584 = vmatmul.f32.gmra.mxu1 %v3468_v3  ;;  %v3469_v5 = vsub.f32 %v3467_v22, %v3468_v3  ;;  %v3875_v22 = vand.u32 4294901760, %v3874_v14 }
 0x7fd   :  { %v3470_v32 = vand.u32 4294901760, %v3469_v5  ;;  %v3885_v5 = vand.u32 4294901760, %v3884_v48 }
 0x7ff   :  { %3471 = vmatmul.f32.gmra.mxu2 %v3470_v32  ;;  %3646 = vmatmul.f32.vlgmr.msrb.gmra.mxu3 %v3458_v28  ;;  %v3890_v32 = vsub.f32 %v3819_v49, %v3848_v44 }
 0x807   :  { %3617 = vmatmul.f32.vlgmr.msrb.gmra.mxu2 %v3458_v28  ;;  %3650 = vmatmul.f32.gmra.mxu3 %v3466_v41  ;;  %v3844_v28 = vand.u32 4294901760, %v3821_v38 }
 0x809   :  { %v3878_v35 = vsub.f32 %v3821_v38, %v3844_v28 }
 0x80b   :  { %v3879_v19 = vand.u32 4294901760, %v3878_v35 }
 0x80d   :  { %v3880_v3 = vsub.f32 %v3878_v35, %v3879_v19 }
 0x80f   :  { %3621 = vmatmul.f32.gmra.mxu2 %v3466_v41  ;;  %v3881_v34 = vand.u32 4294901760, %v3880_v3 }
 0x839   :  { %v167_v41 = vpop.xlane.xlu0 %166 }
 0x86e   :  { %v3547_v0 = vpop.f32.mrf.mxu0 }
 0x870   :  { %v3579_v53 = vpop.f32.mrf.mxu1 }
 0x872   :  { %v3513_v43 = vpop.f32.mrf.mxu3 }
 0x876   :  { %v3552_v25 = vpop.f32.mrf.mxu0 }
 0x878   :  { %v3585_v37 = vpop.f32.mrf.mxu1 }
 0x87a   :  { %v3464_v29 = vpop.f32.mrf.mxu2  ;;  %v3517_v40 = vpop.f32.mrf.mxu3 }
 0x87b   :  { %v3465_v26 = vadd.f32 %v4555_v39, %v3464_v29 }
 0x87d   :  { %v3514_v50 = vadd.f32 %v3513_v43, %v3465_v26  ;;  %v168_v43 = vmax.f32 %v167_v41, 1.0 }
 0x87f   :  { %v3548_v51 = vadd.f32 %v3547_v0, %v3514_v50  ;;  %4628 = vrcp.f32 %v168_v43  ;;  %v178_v36 = vand.u32 2147483647, %v168_v43 }
 0x881   :  { %v3580_v4 = vadd.f32 %v3579_v53, %v3548_v51  ;;  %vm179_vm10 = vcmp.eq.f32.partialorder %v178_v36, 8.507059e+37 }
 0x882   :  { %v3472_v15 = vpop.f32.mrf.mxu2  ;;  %v3647_v52 = vpop.f32.mrf.mxu3 }
 0x883   :  { %v3473_v17 = vadd.f32 %v4555_v39, %v3472_v15  ;;  %v3886_v39 = vsub.f32 %v3884_v48, %v3885_v5 }
 0x885   :  { %v3518_v1 = vadd.f32 %v3517_v40, %v3473_v17  ;;  %v3887_v29 = vand.u32 4294901760, %v3886_v39  ;;  %v4629_v40 = vpop.eup %4628 }
 0x886   :  { %v170_v50 = vmul.f32 %v4629_v40, %v168_v43  ;;  %vm175_vm8 = vweird.f32 %v4629_v40 }
 0x887   :  { %v3553_v13 = vadd.f32 %v3552_v25, %v3518_v1 }
 0x888   :  { %v171_v15 = vsub.f32 1.0, %v170_v50 }
 0x889   :  { %v3586_v42 = vadd.f32 %v3585_v37, %v3553_v13 }
 0x88a   :  { %v3618_v30 = vpop.f32.mrf.mxu2  ;;  %v3651_v9 = vpop.f32.mrf.mxu3  ;;  %v172_v17 = vmul.f32 %v4629_v40, %v171_v15 }
 0x88b   :  { %v3619_v23 = vadd.f32 %v3618_v30, %v3580_v4 }
 0x88d   :  { %v3648_v11 = vadd.f32 %v3647_v52, %v3619_v23  ;;  %v180_v52 = vand.u32 2147483648, %v168_v43  ;;  %v173_v23 = vadd.f32 %v4629_v40, %v172_v17 }
 0x88f   :  { %v3654_v27 = vadd.f32 %v3648_v11, %v5458_v8  ;;  %v181_v13 = vor.u32 1.1754944e-38, %v180_v52 }
 0x891   :  { %v3675_v18 = vand.u32 4294901760, %v3654_v27 }
 0x892   :  { %v3622_v16 = vpop.f32.mrf.mxu2 }
 0x893   :  { %v3623_v20 = vadd.f32 %v3622_v16, %v3586_v42  ;;  %v3707_v31 = vsub.f32 %v3654_v27, %v3675_v18 }
 0x895   :  { %v3652_v58 = vadd.f32 %v3651_v9, %v3623_v20  ;;  %v3708_v12 = vand.u32 4294901760, %v3707_v31 }
 0x897   :  { %v3655_v61 = vadd.f32 %v3652_v58, %v5465_v33  ;;  %v3709_v47 = vsub.f32 %v3707_v31, %v3708_v12 }
 0x899   :  { %v3673_v62 = vand.u32 4294901760, %v3655_v61  ;;  %v3710_v24 = vand.u32 4294901760, %v3709_v47 }
 0x89b   :  { %v3701_v46 = vsub.f32 %v3655_v61, %v3673_v62  ;;  %3674 = vmatpush.msra.mxu0 %v3673_v62  ;;  %3758 = vmatpush.msra.mxu3 %v3673_v62 }
 0x89d   :  { %3676 = vmatpush.msra.mxu0 %v3675_v18  ;;  %3733 = vmatpush.msra.mxu2 %v3701_v46  ;;  %v3702_v8 = vand.u32 4294901760, %v3701_v46 }
 0x89e   :  { %3760 = vmatpush.msra.mxu3 %v3675_v18  ;;  %3682 = vmatmul.f32.vlgmr.msra.gmra.mxu0 %v3681_v45  ;;  %v4557_v45 = vld [vmem:[%s5681_s12] ss:$0 sm:$0xff] }
 0x89f   :  { %3736 = vmatpush.msra.mxu2 %v3707_v31  ;;  %3785 = vmatpush.msrb.mxu0 %v3702_v8  ;;  %v3703_v57 = vsub.f32 %v3701_v46, %v3702_v8  ;;  %v4028_v31 = vld [vmem:[%s5682_s13 + $0x18] sm:$0xff]  ;;  %v4027_v46 = vld [vmem:[%s5682_s13 + $0x10] sm:$0xff] }
 0x8a0   :  { %3739 = vmatmul.f32.vlgmr.msra.gmra.mxu2 %v3678_v55  ;;  %3764 = vmatmul.f32.vlgmr.msra.gmra.mxu3 %v3679_v56  ;;  %v4050_v8 = vand.u32 4294901760, %v4027_v46 }
 0x8a1   :  { %3789 = vmatpush.msrb.mxu0 %v3708_v12  ;;  %v3704_v33 = vand.u32 4294901760, %v3703_v57  ;;  %3843 = vmatpush.msrb.mxu2 %v3842_v60  ;;  %v4026_v57 = vld [vmem:[%s5682_s13 + $0x8] sm:$0xff] }
 0x8a2   :  { %3876 = vmatpush.msrb.mxu3 %v3875_v22  ;;  %v4084_v63 = vsub.f32 %v4027_v46, %v4050_v8 }
 0x8a3   :  { %3705 = vmatpush.msra.mxu1 %v3704_v33  ;;  %3845 = vmatpush.msrb.mxu2 %v3844_v28 }
 0x8a4   :  { %3914 = vmatpush.msra.mxu0 %v3872_v59  ;;  %3882 = vmatpush.msrb.mxu3 %v3881_v34  ;;  %v4025_v59 = vld [vmem:[%s5682_s13] sm:$0xff]  ;;  %v4085_v6 = vand.u32 4294901760, %v4084_v63 }
 0x8a5   :  { %3711 = vmatpush.msra.mxu1 %v3710_v24  ;;  %3847 = vmatpush.msrb.mxu2 %v3846_v2 }
 0x8a6   :  { %4537 = vmatmul.msk.f32.vlgmr.msra.gmra.mxu1 %vm190_vm0, %v4452_v54  ;;  %4538 = vmatmul.msk.f32.vlgmr.msrb.gmra.mxu0 %vm190_vm0, %v4452_v54 }
 0x8a7   :  { %3810 = vmatpush.msrb.mxu1 %v3673_v62  ;;  %3917 = vmatpush.msra.mxu0 %v3878_v35  ;;  %v4048_v62 = vand.u32 4294901760, %v4028_v31 }
 0x8a8   :  { %3849 = vmatpush.msrb.mxu2 %v3848_v44  ;;  %3888 = vmatpush.msrb.mxu3 %v3887_v29 }
 0x8a9   :  { %3812 = vmatpush.msrb.mxu1 %v3675_v18  ;;  %3920 = vmatpush.msra.mxu0 %v3884_v48  ;;  %v4078_v12 = vsub.f32 %v4028_v31, %v4048_v62 }
 0x8aa   :  { %3972 = vmatpush.msra.mxu2 %v3873_v21 }
 0x8ab   :  { %3943 = vmatpush.msra.mxu1 %v3842_v60  ;;  %3923 = vmatpush.msra.mxu0 %v3890_v32  ;;  %v4079_v24 = vand.u32 4294901760, %v4078_v12 }
 0x8ac   :  { %3976 = vmatpush.msra.mxu2 %v3879_v19  ;;  %v4086_v19 = vsub.f32 %v4084_v63, %v4085_v6 }
 0x8ad   :  { %3945 = vmatpush.msra.mxu1 %v3844_v28  ;;  %4049 = vmatpush.msrb.mxu0 %v4048_v62 }
 0x8ae   :  { %4539 = vmatmul.msk.f32.vlgmr.msrb.gmra.mxu1 %vm190_vm0, %v4452_v54  ;;  %v3891_v54 = vand.u32 4294901760, %v3890_v32  ;;  %3980 = vmatpush.msra.mxu2 %v3885_v5  ;;  %vm174_vm0 = vweird.f32 %v168_v43  ;;  %v4087_v3 = vand.u32 4294901760, %v4086_v19 }
 0x8af   :  { %3947 = vmatpush.msra.mxu1 %v3846_v2  ;;  %vm176_vm9 = vmor %vm174_vm0, %vm175_vm8  ;;  %4051 = vmatpush.msrb.mxu0 %v4050_v8 }
 0x8b0   :  { %v3892_v10 = vsub.f32 %v3890_v32, %v3891_v54  ;;  %3984 = vmatpush.msra.mxu2 %v3891_v54  ;;  %v177_v27 = vsel %vm176_vm9, %v4629_v40, %v173_v23 }
 0x8b1   :  { %3949 = vmatpush.msra.mxu1 %v3848_v44  ;;  %v182_v16 = vsel %vm179_vm10, %v181_v13, %v177_v27  ;;  %v4234_v27 = vld [vmem:[%s5684_s15 + $0x18] sm:$0xff] }
 0x8b2   :  { %v3893_v26 = vand.u32 4294901760, %v3892_v10 }
 0x8b4   :  { %3894 = vmatpush.msrb.mxu3 %v3893_v26 }
 0x8b6   :  { %4003 = vmatpush.msra.mxu3 %v3842_v60  ;;  %v4052_v60 = vand.u32 4294901760, %v4026_v57 }
 0x8b8   :  { %4005 = vmatpush.msra.mxu3 %v3844_v28  ;;  %v4080_v28 = vsub.f32 %v4078_v12, %v4079_v24  ;;  %v4090_v21 = vsub.f32 %v4026_v57, %v4052_v60  ;;  %4053 = vmatpush.msrb.mxu0 %v4052_v60 }
 0x8ba   :  { %4007 = vmatpush.msra.mxu3 %v3846_v2  ;;  %v4054_v2 = vand.u32 4294901760, %v4025_v59  ;;  %v4081_v14 = vand.u32 4294901760, %v4080_v28 }
 0x8bc   :  { %4009 = vmatpush.msra.mxu3 %v3848_v44  ;;  %v4091_v44 = vand.u32 4294901760, %v4090_v21  ;;  %v4096_v48 = vsub.f32 %v4025_v59, %v4054_v2  ;;  %4055 = vmatpush.msrb.mxu0 %v4054_v2 }
 0x8bd   :  { %4082 = vmatpush.msrb.mxu1 %v4081_v14 }
 0x8be   :  { %v4092_v5 = vsub.f32 %v4090_v21, %v4091_v44  ;;  %v4097_v32 = vand.u32 4294901760, %v4096_v48 }
 0x8bf   :  { %4088 = vmatpush.msrb.mxu1 %v4087_v3 }
 0x8c0   :  { %v4093_v39 = vand.u32 4294901760, %v4092_v5  ;;  %v4098_v54 = vsub.f32 %v4096_v48, %v4097_v32 }
 0x8c2   :  { %4094 = vmatpush.msrb.mxu1 %v4093_v39  ;;  %v4099_v26 = vand.u32 4294901760, %v4098_v54 }
 0x8c4   :  { %4100 = vmatpush.msrb.mxu1 %v4099_v26 }
 0x91b   :  { %v3683_v0 = vpop.f32.mrf.mxu0 }
 0x923   :  { %v3714_v51 = vpop.f32.mrf.mxu1  ;;  %v3740_v53 = vpop.f32.mrf.mxu2 }
 0x924   :  { %v3715_v1 = vadd.f32 %v3714_v51, %v3683_v0  ;;  %v3765_v4 = vpop.f32.mrf.mxu3  ;;  %v3792_v25 = vpop.f32.mrf.mxu0 }
 0x926   :  { %v3741_v30 = vadd.f32 %v3740_v53, %v3715_v1 }
 0x928   :  { %v3766_v11 = vadd.f32 %v3765_v4, %v3741_v30 }
 0x92a   :  { %v3793_v55 = vadd.f32 %v3792_v25, %v3766_v11 }
 0x92b   :  { %v3815_v37 = vpop.f32.mrf.mxu1 }
 0x92c   :  { %v3816_v42 = vadd.f32 %v3815_v37, %v3793_v55  ;;  %v4254_v37 = vand.u32 4294901760, %v4234_v27 }
 0x92e   :  { %v3818_v56 = vmul.f32 %v3816_v42, %v182_v16  ;;  %v4558_v42 = vld [vmem:[%s5683_s14] ss:$0 sm:$0xff]  ;;  %v4233_v16 = vld [vmem:[%s5684_s15 + $0x10] sm:$0xff] }
 0x930   :  { %v3828_v18 = vsel %vm1082_vm2, %v3818_v56, 0  ;;  %v4284_v56 = vsub.f32 %v4234_v27, %v4254_v37 }
 0x931   :  { %v3850_v20 = vand.u32 4294901760, %v3828_v18 }
 0x933   :  { %v3851_v9 = vsub.f32 %v3828_v18, %v3850_v20  ;;  %3896 = vmatmul.f32.vlgmr.msrb.gmra.mxu3 %v3850_v20  ;;  %v4256_v18 = vand.u32 4294901760, %v4233_v16 }
 0x934   :  { %4149 = vmatpush.msrb.mxu3 %v4048_v62 }
 0x935   :  { %v3852_v58 = vand.u32 4294901760, %v3851_v9  ;;  %3926 = vmatmul.f32.vlgmr.msra.gmra.mxu0 %v3851_v9 }
 0x936   :  { %4151 = vmatpush.msrb.mxu3 %v4050_v8  ;;  %4178 = vmatpush.msra.mxu0 %v4079_v24 }
 0x937   :  { %v3853_v7 = vsub.f32 %v3851_v9, %v3852_v58  ;;  %3953 = vmatmul.f32.vlgmr.msra.gmra.mxu1 %v3852_v58 }
 0x938   :  { %4153 = vmatpush.msrb.mxu3 %v4052_v60  ;;  %4182 = vmatpush.msra.mxu0 %v4085_v6 }
 0x939   :  { %v3854_v61 = vand.u32 4294901760, %v3853_v7  ;;  %4209 = vmatpush.msra.mxu1 %v4048_v62  ;;  %v4285_v7 = vand.u32 4294901760, %v4284_v56 }
 0x93a   :  { %4155 = vmatpush.msrb.mxu3 %v4054_v2  ;;  %4186 = vmatpush.msra.mxu0 %v4091_v44 }
 0x93b   :  { %3855 = vmatmul.f32.vlgmr.msrb.gmra.mxu2 %v3854_v61  ;;  %4011 = vmatmul.f32.vlgmr.msra.gmra.mxu3 %v3850_v20  ;;  %v4290_v61 = vsub.f32 %v4233_v16, %v4256_v18  ;;  %v4286_v46 = vsub.f32 %v4284_v56, %v4285_v7 }
 0x93c   :  { %4120 = vmatpush.msrb.mxu2 %v4078_v12  ;;  %4190 = vmatpush.msra.mxu0 %v4097_v32 }
 0x93d   :  { %4211 = vmatpush.msra.mxu1 %v4050_v8  ;;  %v4291_v12 = vand.u32 4294901760, %v4290_v61  ;;  %v4287_v24 = vand.u32 4294901760, %v4286_v46 }
 0x93e   :  { %4123 = vmatpush.msrb.mxu2 %v4084_v63 }
 0x93f   :  { %4213 = vmatpush.msra.mxu1 %v4052_v60  ;;  %v4292_v63 = vsub.f32 %v4290_v61, %v4291_v12  ;;  %4288 = vmatpush.msra.mxu3 %v4287_v24 }
 0x940   :  { %4126 = vmatpush.msrb.mxu2 %v4090_v21 }
 0x941   :  { %4215 = vmatpush.msra.mxu1 %v4054_v2  ;;  %v4293_v6 = vand.u32 4294901760, %v4292_v63 }
 0x942   :  { %4129 = vmatpush.msrb.mxu2 %v4096_v48 }
 0x943   :  { %3986 = vmatmul.f32.vlgmr.msra.gmra.mxu2 %v3850_v20  ;;  %v4232_v20 = vld [vmem:[%s5684_s15 + $0x8] sm:$0xff]  ;;  %4294 = vmatpush.msra.mxu3 %v4293_v6 }
 0x944   :  { %4255 = vmatpush.msra.mxu2 %v4254_v37  ;;  %v4258_v31 = vand.u32 4294901760, %v4232_v20 }
 0x946   :  { %4257 = vmatpush.msra.mxu2 %v4256_v18  ;;  %v4296_v8 = vsub.f32 %v4232_v20, %v4258_v31 }
 0x948   :  { %4259 = vmatpush.msra.mxu2 %v4258_v31  ;;  %v4297_v60 = vand.u32 4294901760, %v4296_v8 }
 0x94a   :  { %v4298_v21 = vsub.f32 %v4296_v8, %v4297_v60 }
 0x94c   :  { %v4299_v14 = vand.u32 4294901760, %v4298_v21 }
 0x94e   :  { %4300 = vmatpush.msra.mxu3 %v4299_v14 }
 0x9b2   :  { %v3927_v49 = vpop.f32.mrf.mxu0 }
 0x9b4   :  { %v3954_v22 = vpop.f32.mrf.mxu1 }
 0x9b6   :  { %v3897_v33 = vpop.f32.mrf.mxu3 }
 0x9be   :  { %v3856_v47 = vpop.f32.mrf.mxu2  ;;  %v4012_v10 = vpop.f32.mrf.mxu3 }
 0x9bf   :  { %v3857_v38 = vadd.f32 %v4557_v45, %v3856_v47  ;;  %v4231_v45 = vld [vmem:[%s5684_s15] sm:$0xff] }
 0x9c0   :  { %v4260_v57 = vand.u32 4294901760, %v4231_v45 }
 0x9c1   :  { %v3898_v35 = vadd.f32 %v3897_v33, %v3857_v38 }
 0x9c2   :  { %v4302_v38 = vsub.f32 %v4231_v45, %v4260_v57  ;;  %4261 = vmatpush.msra.mxu2 %v4260_v57 }
 0x9c3   :  { %v3928_v41 = vadd.f32 %v3927_v49, %v3898_v35 }
 0x9c4   :  { %v4303_v2 = vand.u32 4294901760, %v4302_v38 }
 0x9c5   :  { %v3955_v43 = vadd.f32 %v3954_v22, %v3928_v41 }
 0x9c6   :  { %v3987_v34 = vpop.f32.mrf.mxu2  ;;  %v4304_v19 = vsub.f32 %v4302_v38, %v4303_v2 }
 0x9c7   :  { %v3988_v29 = vadd.f32 %v3987_v34, %v3955_v43 }
 0x9c8   :  { %v4305_v41 = vand.u32 4294901760, %v4304_v19 }
 0x9c9   :  { %v4013_v40 = vadd.f32 %v4012_v10, %v3988_v29 }
 0x9ca   :  { %4306 = vmatpush.msra.mxu3 %v4305_v41 }
 0x9cb   :  { %v4016_v50 = vand.u32 2147483647, %v4013_v40  ;;  %v4015_v1 = vmax.f32 %v4013_v40, 0.0 }
 0x9cd   :  { %v4017_v0 = vsub.f32 0.0, %v4016_v50 }
 0x9cf   :  { %v4018_v15 = vmul.f32 1.442695, %v4017_v0 }
 0x9d1   :  { %4630 = vpow2.f32 %v4018_v15 }
 0x9d7   :  { %v4631_v17 = vpop.eup %4630 }
 0x9d8   :  { %v4020_v51 = vadd.f32 1.0, %v4631_v17 }
 0x9da   :  { %4632 = vlog2.f32 %v4020_v51 }
 0x9e0   :  { %v4633_v53 = vpop.eup %4632 }
 0x9e1   :  { %v4022_v4 = vmul.f32 0.6931472, %v4633_v53  ;;  %v4559_v53 = vld [vmem:[%s5685_s16] ss:$0 sm:$0xff] }
 0x9e3   :  { %v4023_v52 = vadd.f32 %v4022_v4, %v4015_v1 }
 0x9e5   :  { %v4540_v30 = vadd.f32 -0.6931472, %v4023_v52 }
 0x9e7   :  { %v4034_v23 = vsel %vm1082_vm2, %v4540_v30, 0 }
 0x9e8   :  { %v4056_v36 = vand.u32 4294901760, %v4034_v23 }
 0x9ea   :  { %v4057_v25 = vsub.f32 %v4034_v23, %v4056_v36  ;;  %4102 = vmatmul.f32.vlgmr.msrb.gmra.mxu1 %v4056_v36 }
 0x9eb   :  { %4355 = vmatpush.msrb.mxu1 %v4254_v37 }
 0x9ec   :  { %4132 = vmatmul.f32.vlgmr.msrb.gmra.mxu2 %v4057_v25  ;;  %v4058_v11 = vand.u32 4294901760, %v4057_v25 }
 0x9ed   :  { %4357 = vmatpush.msrb.mxu1 %v4256_v18  ;;  %4384 = vmatpush.msrb.mxu2 %v4285_v7 }
 0x9ee   :  { %4159 = vmatmul.f32.vlgmr.msrb.gmra.mxu3 %v4058_v11  ;;  %v4059_v13 = vsub.f32 %v4057_v25, %v4058_v11 }
 0x9ef   :  { %4359 = vmatpush.msrb.mxu1 %v4258_v31  ;;  %4388 = vmatpush.msrb.mxu2 %v4291_v12 }
 0x9f0   :  { %v4060_v55 = vand.u32 4294901760, %v4059_v13  ;;  %4415 = vmatpush.msrb.mxu3 %v4254_v37 }
 0x9f1   :  { %4361 = vmatpush.msrb.mxu1 %v4260_v57  ;;  %4392 = vmatpush.msrb.mxu2 %v4297_v60 }
 0x9f2   :  { %4061 = vmatmul.f32.vlgmr.msrb.gmra.mxu0 %v4060_v55  ;;  %4217 = vmatmul.f32.vlgmr.msra.gmra.mxu1 %v4056_v36 }
 0x9f3   :  { %4326 = vmatpush.msrb.mxu0 %v4284_v56  ;;  %4396 = vmatpush.msrb.mxu2 %v4303_v2 }
 0x9f4   :  { %4417 = vmatpush.msrb.mxu3 %v4256_v18 }
 0x9f5   :  { %4329 = vmatpush.msrb.mxu0 %v4290_v61 }
 0x9f6   :  { %4419 = vmatpush.msrb.mxu3 %v4258_v31 }
 0x9f7   :  { %4332 = vmatpush.msrb.mxu0 %v4296_v8 }
 0x9f8   :  { %4421 = vmatpush.msrb.mxu3 %v4260_v57 }
 0x9f9   :  { %4335 = vmatpush.msrb.mxu0 %v4302_v38 }
 0x9fa   :  { %4192 = vmatmul.f32.vlgmr.msra.gmra.mxu0 %v4056_v36 }
 0xa67   :  { %v4103_v9 = vpop.f32.mrf.mxu1 }
 0xa6f   :  { %v4062_v58 = vpop.f32.mrf.mxu0  ;;  %v4133_v33 = vpop.f32.mrf.mxu2 }
 0xa70   :  { %v4063_v62 = vadd.f32 %v4558_v42, %v4062_v58  ;;  %v4218_v48 = vpop.f32.mrf.mxu1 }
 0xa71   :  { %v4160_v28 = vpop.f32.mrf.mxu3 }
 0xa72   :  { %v4104_v47 = vadd.f32 %v4103_v9, %v4063_v62 }
 0xa74   :  { %v4134_v59 = vadd.f32 %v4133_v33, %v4104_v47 }
 0xa76   :  { %v4161_v35 = vadd.f32 %v4160_v28, %v4134_v59 }
 0xa77   :  { %v4193_v49 = vpop.f32.mrf.mxu0 }
 0xa78   :  { %v4194_v44 = vadd.f32 %v4193_v49, %v4161_v35 }
 0xa7a   :  { %v4219_v22 = vadd.f32 %v4218_v48, %v4194_v44 }
 0xa7c   :  { %v4222_v3 = vand.u32 2147483647, %v4219_v22  ;;  %v4221_v54 = vmax.f32 %v4219_v22, 0.0 }
 0xa7e   :  { %v4223_v5 = vsub.f32 0.0, %v4222_v3 }
 0xa80   :  { %v4224_v32 = vmul.f32 1.442695, %v4223_v5 }
 0xa82   :  { %4634 = vpow2.f32 %v4224_v32 }
 0xa88   :  { %v4635_v43 = vpop.eup %4634 }
 0xa89   :  { %v4226_v34 = vadd.f32 1.0, %v4635_v43 }
 0xa8b   :  { %4636 = vlog2.f32 %v4226_v34 }
 0xa91   :  { %v4637_v39 = vpop.eup %4636 }
 0xa92   :  { %v4228_v29 = vmul.f32 0.6931472, %v4637_v39 }
 0xa94   :  { %v4229_v10 = vadd.f32 %v4228_v29, %v4221_v54 }
 0xa96   :  { %v4541_v26 = vadd.f32 -0.6931472, %v4229_v10 }
 0xa98   :  { %v4240_v40 = vsel %vm1082_vm2, %v4541_v26, 0 }
 0xa99   :  { %v4262_v50 = vand.u32 4294901760, %v4240_v40 }
 0xa9b   :  { %v4263_v0 = vsub.f32 %v4240_v40, %v4262_v50  ;;  %4308 = vmatmul.f32.vlgmr.msra.gmra.mxu3 %v4262_v50 }
 0xa9d   :  { %4338 = vmatmul.f32.vlgmr.msrb.gmra.mxu0 %v4263_v0  ;;  %v4264_v15 = vand.u32 4294901760, %v4263_v0 }
 0xa9f   :  { %4365 = vmatmul.f32.vlgmr.msrb.gmra.mxu1 %v4264_v15  ;;  %v4265_v17 = vsub.f32 %v4263_v0, %v4264_v15 }
 0xaa1   :  { %v4266_v51 = vand.u32 4294901760, %v4265_v17 }
 0xaa3   :  { %4267 = vmatmul.f32.vlgmr.msra.gmra.mxu2 %v4266_v51  ;;  %4423 = vmatmul.f32.vlgmr.msrb.gmra.mxu3 %v4262_v50 }
 0xaab   :  { %4398 = vmatmul.f32.vlgmr.msrb.gmra.mxu2 %v4262_v50 }
 0xb1a   :  { %v4339_v23 = vpop.f32.mrf.mxu0 }
 0xb1c   :  { %v4366_v25 = vpop.f32.mrf.mxu1 }
 0xb1e   :  { %v4309_v1 = vpop.f32.mrf.mxu3 }
 0xb26   :  { %v4268_v4 = vpop.f32.mrf.mxu2  ;;  %v4424_v27 = vpop.f32.mrf.mxu3 }
 0xb27   :  { %v4269_v52 = vadd.f32 %v4559_v53, %v4268_v4 }
 0xb29   :  { %v4310_v30 = vadd.f32 %v4309_v1, %v4269_v52 }
 0xb2b   :  { %v4340_v36 = vadd.f32 %v4339_v23, %v4310_v30 }
 0xb2d   :  { %v4367_v11 = vadd.f32 %v4366_v25, %v4340_v36 }
 0xb2e   :  { %v4399_v13 = vpop.f32.mrf.mxu2 }
 0xb2f   :  { %v4400_v55 = vadd.f32 %v4399_v13, %v4367_v11 }
 0xb31   :  { %v4425_v37 = vadd.f32 %v4424_v27, %v4400_v55 }
 0xb33   :  { %4427 = vst [vmem:[#allocation2] sm:$0x3] %v4425_v37 }
 0xb34   :  { %4438 = dma.vmem_to_hbm [thread:$0]  %s4434_s1, 32, %s4436_s30, [#allocation3]  }
 0xb35   :  { %4664 = dma.done.wait [#allocation3], 32  }
 0xb36   :  { %4665 = vsyncadd [#allocation3], 4294967264 }
 0xb37   :  { %4443 = vsyncpa [#allocation3], 1 }

</bundles_post_ra>
